<compile_context>
chip_gen: v6e
topology: v6e:2x2x1
jax: 0.10.0
libtpu: 0.0.40
codegen_flags: <defaults>
</compile_context>

<pallas_src>
import functools
import math

import jax
import jax.numpy as jnp
from jax.experimental import pallas as pl
from jax.experimental.pallas import tpu as pltpu


def _vmem_limit_bytes():
    """v5e/v6e have 128 MiB physical VMEM -> allow ~96 MiB scoped; v7x has
    64 MiB -> stay at 48 MiB.  Conservative fallback if the query fails."""
    try:
        cap = pltpu.get_tpu_info().vmem_capacity_bytes
    except Exception:  # defensive: query unavailable / non-TPU tracer context
        cap = 0
    if cap >= 96 * 1024 * 1024:
        return 96 * 1024 * 1024
    return 48 * 1024 * 1024


_VMEM_LIMIT = _vmem_limit_bytes()


def _pick_tile(dim, target, granule):
    """Largest divisor of `dim` that is <= target and a multiple of `granule`.

    Falls back to the full dim (always a legal Pallas block size).  Note: if
    dim is not a multiple of `granule` this degenerates to one big block.
    """
    if dim <= target or dim % granule != 0:
        return dim
    t = (target // granule) * granule
    while t >= granule:
        if dim % t == 0:
            return t
        t -= granule
    return dim


# ---------------------------------------------------------------------------
# Tiled matmul + bias (+ optional ReLU)
# ---------------------------------------------------------------------------

def _matmul_bias_kernel(x_ref, w_ref, b_ref, o_ref, acc_ref, *, activation):
    k = pl.program_id(2)

    @pl.when(k == 0)
    def _():
        acc_ref[...] = jnp.zeros_like(acc_ref)

    acc_ref[...] += jnp.dot(x_ref[...], w_ref[...],
                            preferred_element_type=jnp.float32)

    @pl.when(k == pl.num_programs(2) - 1)
    def _():
        y = acc_ref[...] + b_ref[...].astype(jnp.float32)
        if activation == "relu":
            y = jnp.maximum(y, 0.0)
        o_ref[...] = y.astype(o_ref.dtype)


def matmul_bias(x, w, b, activation=None, *, tm=512, tn=1024, tk=512):
    """x:[M,K] @ w:[K,N] + b:[N], tiled with a K-reduction accumulator."""
    M, K = x.shape
    N = w.shape[1]
    bm = _pick_tile(M, tm, 8)
    bn = _pick_tile(N, tn, 128)
    bk = _pick_tile(K, tk, 128)
    grid = (M // bm, N // bn, K // bk)
    return pl.pallas_call(
        functools.partial(_matmul_bias_kernel, activation=activation),
        out_shape=jax.ShapeDtypeStruct((M, N), x.dtype),
        grid=grid,
        in_specs=[
            pl.BlockSpec((bm, bk), lambda i, j, k: (i, k)),
            pl.BlockSpec((bk, bn), lambda i, j, k: (k, j)),
            pl.BlockSpec((1, bn), lambda i, j, k: (0, j)),
        ],
        out_specs=pl.BlockSpec((bm, bn), lambda i, j, k: (i, j)),
        scratch_shapes=[pltpu.VMEM((bm, bn), jnp.float32)],
        compiler_params=pltpu.CompilerParams(
            dimension_semantics=("parallel", "parallel", "arbitrary"),
            vmem_limit_bytes=_VMEM_LIMIT),
    )(x, w, b.reshape(1, N))


# ---------------------------------------------------------------------------
# Tiled matmul + bias + residual add + LayerNorm (fused epilogue)
# ---------------------------------------------------------------------------

def _matmul_bias_add_ln_kernel(x_ref, w_ref, b_ref, r_ref, g_ref, bb_ref,
                               o_ref, acc_ref, *, eps):
    k = pl.program_id(1)

    @pl.when(k == 0)
    def _():
        acc_ref[...] = jnp.zeros_like(acc_ref)

    acc_ref[...] += jnp.dot(x_ref[...], w_ref[...],
                            preferred_element_type=jnp.float32)

    @pl.when(k == pl.num_programs(1) - 1)
    def _():
        y = (acc_ref[...] + b_ref[...].astype(jnp.float32)
             + r_ref[...].astype(jnp.float32))
        mean = jnp.mean(y, axis=-1, keepdims=True)
        c = y - mean
        var = jnp.mean(c * c, axis=-1, keepdims=True)
        yn = c * jax.lax.rsqrt(var + eps)
        o_ref[...] = (yn * g_ref[...].astype(jnp.float32)
                      + bb_ref[...].astype(jnp.float32)).astype(o_ref.dtype)


def matmul_bias_add_ln(x, w, b, residual, gamma, beta, *, eps=1e-5,
                       tm=256, tk=512):
    """LayerNorm(residual + x @ w + b) * gamma + beta, fused.

    LayerNorm reduces over the full output dim, so N is kept un-tiled (one
    (tm, N) output block per row tile); K is the reduction grid axis.
    """
    M, K = x.shape
    N = w.shape[1]
    bm = _pick_tile(M, tm, 8)
    bk = _pick_tile(K, tk, 128)
    grid = (M // bm, K // bk)
    # TODO(synk): the bias/residual/gamma/beta blocks are k-invariant; once
    # pipeline_mode=pl.Buffered(1) is battle-tested, single-buffer them to
    # free VMEM on v7x.
    return pl.pallas_call(
        functools.partial(_matmul_bias_add_ln_kernel, eps=eps),
        out_shape=jax.ShapeDtypeStruct((M, N), x.dtype),
        grid=grid,
        in_specs=[
            pl.BlockSpec((bm, bk), lambda i, k: (i, k)),
            pl.BlockSpec((bk, N), lambda i, k: (k, 0)),
            pl.BlockSpec((1, N), lambda i, k: (0, 0)),
            pl.BlockSpec((bm, N), lambda i, k: (i, 0)),
            pl.BlockSpec((1, N), lambda i, k: (0, 0)),
            pl.BlockSpec((1, N), lambda i, k: (0, 0)),
        ],
        out_specs=pl.BlockSpec((bm, N), lambda i, k: (i, 0)),
        scratch_shapes=[pltpu.VMEM((bm, N), jnp.float32)],
        compiler_params=pltpu.CompilerParams(
            dimension_semantics=("parallel", "arbitrary"),
            vmem_limit_bytes=_VMEM_LIMIT),
    )(x, w, b.reshape(1, N), residual, gamma.reshape(1, N), beta.reshape(1, N))


# ---------------------------------------------------------------------------
# Flash attention (online softmax), heads packed along lanes
# ---------------------------------------------------------------------------

def _mha_flash_kernel(*refs, num_heads, head_dim, q_start, k_start, v_start,
                      has_bias):
    if has_bias:
        q_ref, kv_ref, bias_ref, o_ref, m_sc, l_sc, acc_sc = refs
    else:
        q_ref, kv_ref, o_ref, m_sc, l_sc, acc_sc = refs

    ki = pl.program_id(2)

    @pl.when(ki == 0)
    def _():
        # -1e30 (not -inf) so exp(m_prev - m_new) underflows to 0 without NaN.
        m_sc[...] = jnp.full_like(m_sc, -1e30)
        l_sc[...] = jnp.zeros_like(l_sc)
        acc_sc[...] = jnp.zeros_like(acc_sc)

    E = num_heads * head_dim
    # Contiguous Q / K / V slabs in native dtype (no f32 up-cast before MXU).
    q_all = q_ref[:, q_start:q_start + E]        # [tq, E]
    k_all = kv_ref[:, k_start:k_start + E]       # [tk, E]
    v_all = kv_ref[:, v_start:v_start + E]       # [tk, E]

    # Additive mask bias (f32), computed/loaded once and shared by all heads.
    bias = bias_ref[...] if has_bias else None

    # Static unroll over heads.  The 1/sqrt(Dh) scale is folded into the Q
    # projection weights, so no per-score scaling here.
    # TODO(synk): for Dh < 128 a head-batched layout would feed the MXU and
    # lanes more densely; kept packed to avoid wrapper-side transposes.
    for h in range(num_heads):
        lo = h * head_dim
        qh = q_all[:, lo:lo + head_dim]
        kh = k_all[:, lo:lo + head_dim]
        vh = v_all[:, lo:lo + head_dim]
        # q @ k^T without materializing a transpose: contract the Dh axes.
        s = jax.lax.dot_general(qh, kh, (((1,), (1,)), ((), ())),
                                preferred_element_type=jnp.float32)
        if bias is not None:
            s = s + bias
        m_prev = m_sc[h]                                        # [tq, 1]
        m_new = jnp.maximum(m_prev, jnp.max(s, axis=-1, keepdims=True))
        alpha = jnp.exp(m_prev - m_new)
        p = jnp.exp(s - m_new)
        l_sc[h] = alpha * l_sc[h] + jnp.sum(p, axis=-1, keepdims=True)
        acc_sc[h] = alpha * acc_sc[h] + jax.lax.dot_general(
            p.astype(vh.dtype), vh, (((1,), (0,)), ((), ())),
            preferred_element_type=jnp.float32)
        m_sc[h] = m_new

    @pl.when(ki == pl.num_programs(2) - 1)
    def _():
        for h in range(num_heads):
            lo = h * head_dim
            # l >= 1 by construction (the running max contributes exp(0)=1),
            # so the approximate EUP reciprocal is safe.
            inv = pl.reciprocal(l_sc[h], approx=True)
            o_ref[:, lo:lo + head_dim] = (acc_sc[h] * inv).astype(o_ref.dtype)


def flash_attention(q_arr, kv_arr, attn_bias, *, num_heads, head_dim,
                    q_start, k_start, v_start, out_dim, tq=128, tk=256):
    """Online-softmax attention.

    q_arr : [B, Sq, Wq]  (Q lives at lanes [q_start : q_start+E])
    kv_arr: [B, Sk, Wkv] (K at [k_start:+E], V at [v_start:+E]); may be the
            same array as q_arr (packed QKV for self-attention).
    attn_bias: [Sq, Sk] f32 additive bias (0 / -1e9) or None.
    """
    B, Sq, Wq = q_arr.shape
    _, Sk, Wkv = kv_arr.shape
    bq = _pick_tile(Sq, tq, 8)
    bk = _pick_tile(Sk, tk, 8)
    grid = (B, Sq // bq, Sk // bk)
    has_bias = attn_bias is not None

    in_specs = [
        # q block index is ki-invariant -> fetched once per (b, q-tile).
        pl.BlockSpec((None, bq, Wq), lambda b, qi, ki: (b, qi, 0)),
        pl.BlockSpec((None, bk, Wkv), lambda b, qi, ki: (b, ki, 0)),
    ]
    args = [q_arr, kv_arr]
    if has_bias:
        in_specs.append(pl.BlockSpec((bq, bk), lambda b, qi, ki: (qi, ki)))
        args.append(attn_bias)

    kernel = functools.partial(
        _mha_flash_kernel, num_heads=num_heads, head_dim=head_dim,
        q_start=q_start, k_start=k_start, v_start=v_start, has_bias=has_bias)

    return pl.pallas_call(
        kernel,
        out_shape=jax.ShapeDtypeStruct((B, Sq, out_dim), q_arr.dtype),
        grid=grid,
        in_specs=in_specs,
        out_specs=pl.BlockSpec((None, bq, out_dim), lambda b, qi, ki: (b, qi, 0)),
        scratch_shapes=[
            pltpu.VMEM((num_heads, bq, 1), jnp.float32),          # running max
            pltpu.VMEM((num_heads, bq, 1), jnp.float32),          # running sum
            pltpu.VMEM((num_heads, bq, head_dim), jnp.float32),   # accumulator
        ],
        compiler_params=pltpu.CompilerParams(
            dimension_semantics=("parallel", "parallel", "arbitrary"),
            vmem_limit_bytes=_VMEM_LIMIT),
    )(*args)


# ---------------------------------------------------------------------------
# Module-level composition (glue in plain JAX; reshapes are metadata-only)
# ---------------------------------------------------------------------------

def decoder_block_forward(params, x, enc_output, tgt_mask, memory_mask,
                          num_heads):
    """Matches DecoderBlock.forward (dropout = identity / inference)."""
    B, Sq, E = x.shape
    Sk = enc_output.shape[1]
    Dh = E // num_heads
    scale = 1.0 / math.sqrt(Dh)
    x_flat = x.reshape(B * Sq, E)
    enc_flat = enc_output.reshape(B * Sk, E)

    def to_bias(m):
        # additive f32 bias: 0 where attended, -1e9 where blocked (applied to
        # f32 scores inside the kernel, so no bf16 saturation issues).
        if m is None:
            return None
        return jnp.where(m != 0, 0.0, -1e9).astype(jnp.float32)

    tgt_bias = to_bias(tgt_mask)
    mem_bias = to_bias(memory_mask)

    # --- self-attention: fused QKV projection -> flash attention -----------
    sa = params["self_attn"]
    # fold 1/sqrt(Dh) into the Q columns of the fused QKV projection (free).
    q_scale = jnp.concatenate([
        jnp.full((E,), scale, dtype=sa["w_qkv"].dtype),
        jnp.ones((2 * E,), dtype=sa["w_qkv"].dtype)])
    qkv = matmul_bias(x_flat, sa["w_qkv"] * q_scale,
                      sa["b_qkv"] * q_scale).reshape(B, Sq, 3 * E)
    sa_out = flash_attention(qkv, qkv, tgt_bias, num_heads=num_heads,
                             head_dim=Dh, q_start=0, k_start=E, v_start=2 * E,
                             out_dim=E).reshape(B * Sq, E)
    # fused: output projection + residual add + LayerNorm1
    x1 = matmul_bias_add_ln(sa_out, sa["w_o"], sa["b_o"], x_flat,
                            params["norm1_g"], params["norm1_b"])

    # --- encoder-decoder attention ------------------------------------------
    ca = params["enc_dec_attn"]
    q = matmul_bias(x1, ca["w_q"] * scale, ca["b_q"] * scale).reshape(B, Sq, E)
    kv = matmul_bias(enc_flat, ca["w_kv"], ca["b_kv"]).reshape(B, Sk, 2 * E)
    ca_out = flash_attention(q, kv, mem_bias, num_heads=num_heads,
                             head_dim=Dh, q_start=0, k_start=0, v_start=E,
                             out_dim=E).reshape(B * Sq, E)
    x2 = matmul_bias_add_ln(ca_out, ca["w_o"], ca["b_o"], x1,
                            params["norm2_g"], params["norm2_b"])

    # --- positionwise FFN: matmul+ReLU, then fused matmul+add+LayerNorm3 ----
    h = matmul_bias(x2, params["ff_w1"], params["ff_b1"], activation="relu")
    x3 = matmul_bias_add_ln(h, params["ff_w2"], params["ff_b2"], x2,
                            params["norm3_g"], params["norm3_b"])
    return x3.reshape(B, Sq, E)
    # TODO(synk): dropout layers are identity (inference semantics); no
    # stochastic dropout replication is attempted.


# ---------------------------------------------------------------------------
# Deterministic parameter init (fused/packed weight layout)
# ---------------------------------------------------------------------------

def init_params(key, embed_dim, ff_hidden_dim):
    ks = jax.random.split(key, 4)
    s = 0.02

    def self_attn_params(k):
        kq, ko = jax.random.split(k, 2)
        return {
            "w_qkv": s * jax.random.normal(kq, (embed_dim, 3 * embed_dim), jnp.float32),
            "b_qkv": jnp.zeros((3 * embed_dim,), jnp.float32),
            "w_o": s * jax.random.normal(ko, (embed_dim, embed_dim), jnp.float32),
            "b_o": jnp.zeros((embed_dim,), jnp.float32),
        }

    def cross_attn_params(k):
        kq, kkv, ko = jax.random.split(k, 3)
        return {
            "w_q": s * jax.random.normal(kq, (embed_dim, embed_dim), jnp.float32),
            "b_q": jnp.zeros((embed_dim,), jnp.float32),
            "w_kv": s * jax.random.normal(kkv, (embed_dim, 2 * embed_dim), jnp.float32),
            "b_kv": jnp.zeros((2 * embed_dim,), jnp.float32),
            "w_o": s * jax.random.normal(ko, (embed_dim, embed_dim), jnp.float32),
            "b_o": jnp.zeros((embed_dim,), jnp.float32),
        }

    return {
        "self_attn": self_attn_params(ks[0]),
        "enc_dec_attn": cross_attn_params(ks[1]),
        "ff_w1": s * jax.random.normal(ks[2], (embed_dim, ff_hidden_dim), jnp.float32),
        "ff_b1": jnp.zeros((ff_hidden_dim,), jnp.float32),
        "ff_w2": s * jax.random.normal(ks[3], (ff_hidden_dim, embed_dim), jnp.float32),
        "ff_b2": jnp.zeros((embed_dim,), jnp.float32),
        "norm1_g": jnp.ones((embed_dim,), jnp.float32),
        "norm1_b": jnp.zeros((embed_dim,), jnp.float32),
        "norm2_g": jnp.ones((embed_dim,), jnp.float32),
        "norm2_b": jnp.zeros((embed_dim,), jnp.float32),
        "norm3_g": jnp.ones((embed_dim,), jnp.float32),
        "norm3_b": jnp.zeros((embed_dim,), jnp.float32),
    }


# ---------------------------------------------------------------------------
# Pure-JAX reference (same packed-weight parameterization, unfolded scale)
# ---------------------------------------------------------------------------

def reference_forward(params, x, enc_output, tgt_mask, memory_mask, num_heads):
    B, Sq, E = x.shape
    Dh = E // num_heads

    def attend(q, k, v, mask):
        qh = q.reshape(B, -1, num_heads, Dh).transpose(0, 2, 1, 3)
        kh = k.reshape(B, -1, num_heads, Dh).transpose(0, 2, 1, 3)
        vh = v.reshape(B, -1, num_heads, Dh).transpose(0, 2, 1, 3)
        s = jnp.einsum("bhqd,bhkd->bhqk", qh, kh) / jnp.sqrt(Dh)
        if mask is not None:
            s = jnp.where(mask[None, None] != 0, s, -1e9)
        p = jax.nn.softmax(s, axis=-1)
        o = jnp.einsum("bhqk,bhkd->bhqd", p, vh)
        return o.transpose(0, 2, 1, 3).reshape(B, -1, E)

    def ln(y, g, b, eps=1e-5):
        mu = y.mean(-1, keepdims=True)
        var = ((y - mu) ** 2).mean(-1, keepdims=True)
        return (y - mu) / jnp.sqrt(var + eps) * g + b

    sp = params["self_attn"]
    qkv = x.reshape(-1, E) @ sp["w_qkv"] + sp["b_qkv"]
    q, k, v = jnp.split(qkv, 3, axis=-1)
    sa = attend(q, k, v, tgt_mask).reshape(-1, E) @ sp["w_o"] + sp["b_o"]
    x1 = ln(x.reshape(-1, E) + sa, params["norm1_g"], params["norm1_b"])

    cp = params["enc_dec_attn"]
    qc = x1 @ cp["w_q"] + cp["b_q"]
    kvc = enc_output.reshape(-1, E) @ cp["w_kv"] + cp["b_kv"]
    kc, vc = jnp.split(kvc, 2, axis=-1)
    ca = attend(qc, kc, vc, memory_mask).reshape(-1, E) @ cp["w_o"] + cp["b_o"]
    x2 = ln(x1 + ca, params["norm2_g"], params["norm2_b"])

    h = jnp.maximum(x2 @ params["ff_w1"] + params["ff_b1"], 0.0)
    ff = h @ params["ff_w2"] + params["ff_b2"]
    x3 = ln(x2 + ff, params["norm3_g"], params["norm3_b"])
    return x3.reshape(B, Sq, E)


# ---------------------------------------------------------------------------

if __name__ == "__main__":
    # small shapes: batch=2, tgt_seq=8, src_seq=8, embed=32, heads=4, ff=64
    B, S_tgt, S_src = 2, 8, 8
    embed_dim, num_heads, ff_hidden_dim = 32, 4, 64

    key = jax.random.PRNGKey(0)
    k_p, k_x, k_e = jax.random.split(key, 3)

    params = init_params(k_p, embed_dim, ff_hidden_dim)
    x = jax.random.normal(k_x, (B, S_tgt, embed_dim), jnp.float32)
    enc_output = jax.random.normal(k_e, (B, S_src, embed_dim), jnp.float32)

    # causal mask for self-attention (mask==0 -> blocked); memory_mask = None
    # (the module's default) exercises the bias-free cross-attention path.
    tgt_mask = jnp.tril(jnp.ones((S_tgt, S_tgt), jnp.float32))
    memory_mask = None

    fwd = jax.jit(functools.partial(decoder_block_forward, num_heads=num_heads))
    out = fwd(params, x, enc_output, tgt_mask, memory_mask)
    out = jax.block_until_ready(out)

    ref = reference_forward(params, x, enc_output, tgt_mask, memory_mask,
                            num_heads)

    assert out.shape == (B, S_tgt, embed_dim)
    assert bool(jnp.all(jnp.isfinite(out)))
    max_err = float(jnp.max(jnp.abs(out - ref)))
    assert max_err < 2e-2, f"max abs error vs reference: {max_err}"
    print("KERNEL_OK")
</pallas_src>

<mosaic_0001>
module attributes {stable_mosaic.version = 11 : i64} {
  func.func @_matmul_bias_kernel(%arg0: i32, %arg1: i32, %arg2: i32, %arg3: memref<16x32xf32, #tpu.memory_space<vmem>>, %arg4: memref<32x64xf32, #tpu.memory_space<vmem>>, %arg5: memref<1x64xf32, #tpu.memory_space<vmem>>, %arg6: memref<16x64xf32, #tpu.memory_space<vmem>>, %arg7: memref<16x64xf32, #tpu.memory_space<vmem>>) attributes {dimension_semantics = [#tpu.dimension_semantics<parallel>, #tpu.dimension_semantics<parallel>, #tpu.dimension_semantics<arbitrary>], iteration_bounds = array<i64: 1, 1, 1>, scalar_prefetch = 0 : i64, scratch_operands = 1 : i64, tpu.core_type = #tpu.core_type<tc>, window_params = [{transform_indices = @transform_0, window_bounds = array<i64: 16, 32>}, {transform_indices = @transform_1, window_bounds = array<i64: 32, 64>}, {transform_indices = @transform_2, window_bounds = array<i64: 1, 64>}, {transform_indices = @transform_3, window_bounds = array<i64: 16, 64>}]} {
    %c0_i32 = arith.constant 0 : i32
    %0 = arith.cmpi eq, %arg2, %c0_i32 : i32
    %1 = arith.extui %0 : i1 to i32
    %c0_i32_0 = arith.constant 0 : i32
    %2 = arith.cmpi ne, %1, %c0_i32_0 : i32
    scf.if %2 {
      %cst_10 = arith.constant 0.000000e+00 : f32
      %12 = vector.broadcast %cst_10 : f32 to vector<16x64xf32>
      %c0_11 = arith.constant 0 : index
      %c0_12 = arith.constant 0 : index
      %13 = vector.load %arg7[%c0_11, %c0_12] : memref<16x64xf32, #tpu.memory_space<vmem>>, vector<16x64xf32>
      tpu.vector_store %arg7[%c0_11, %c0_12], %12 {strides = array<i32>} : memref<16x64xf32, #tpu.memory_space<vmem>>, vector<16x64xf32>,
    } else {
    }
    %c0 = arith.constant 0 : index
    %c0_1 = arith.constant 0 : index
    %3 = vector.load %arg7[%c0, %c0_1] : memref<16x64xf32, #tpu.memory_space<vmem>>, vector<16x64xf32>
    %c0_2 = arith.constant 0 : index
    %c0_3 = arith.constant 0 : index
    %4 = vector.load %arg3[%c0_2, %c0_3] : memref<16x32xf32, #tpu.memory_space<vmem>>, vector<16x32xf32>
    %c0_4 = arith.constant 0 : index
    %c0_5 = arith.constant 0 : index
    %5 = vector.load %arg4[%c0_4, %c0_5] : memref<32x64xf32, #tpu.memory_space<vmem>>, vector<32x64xf32>
    %cst = arith.constant dense<0.000000e+00> : vector<16x64xf32>
    %6 = tpu.matmul %4, %5, %cst {dimension_numbers = #tpu.dot_dimension_numbers<[1], [0], [0], [1], [0, 0, 1, 1], [], []>} : vector<16x32xf32>, vector<32x64xf32>, vector<16x64xf32> -> vector<16x64xf32>
    %7 = arith.addf %3, %6 : vector<16x64xf32>
    %c0_6 = arith.constant 0 : index
    %c0_7 = arith.constant 0 : index
    %8 = vector.load %arg7[%c0_6, %c0_7] : memref<16x64xf32, #tpu.memory_space<vmem>>, vector<16x64xf32>
    tpu.vector_store %arg7[%c0_6, %c0_7], %7 {strides = array<i32>} : memref<16x64xf32, #tpu.memory_space<vmem>>, vector<16x64xf32>,
    %c0_i32_8 = arith.constant 0 : i32
    %9 = arith.cmpi eq, %arg2, %c0_i32_8 : i32
    %10 = arith.extui %9 : i1 to i32
    %c0_i32_9 = arith.constant 0 : i32
    %11 = arith.cmpi ne, %10, %c0_i32_9 : i32
    scf.if %11 {
      %c0_10 = arith.constant 0 : index
      %c0_11 = arith.constant 0 : index
      %12 = vector.load %arg7[%c0_10, %c0_11] : memref<16x64xf32, #tpu.memory_space<vmem>>, vector<16x64xf32>
      %c0_12 = arith.constant 0 : index
      %c0_13 = arith.constant 0 : index
      %13 = vector.load %arg5[%c0_12, %c0_13] : memref<1x64xf32, #tpu.memory_space<vmem>>, vector<1x64xf32>
      %14 = vector.broadcast %13 : vector<1x64xf32> to vector<16x64xf32>
      %15 = arith.addf %12, %14 : vector<16x64xf32>
      %c0_14 = arith.constant 0 : index
      %c0_15 = arith.constant 0 : index
      %16 = vector.load %arg6[%c0_14, %c0_15] : memref<16x64xf32, #tpu.memory_space<vmem>>, vector<16x64xf32>
      tpu.vector_store %arg6[%c0_14, %c0_15], %15 {strides = array<i32>} : memref<16x64xf32, #tpu.memory_space<vmem>>, vector<16x64xf32>,
    } else {
    }
    return
  }
  func.func @transform_0(%arg0: i32, %arg1: i32, %arg2: i32) -> (i32, i32) {
    %c0_i32 = arith.constant 0 : i32
    return %arg0, %arg2 : i32, i32
  }
  func.func @transform_1(%arg0: i32, %arg1: i32, %arg2: i32) -> (i32, i32) {
    %c0_i32 = arith.constant 0 : i32
    return %arg2, %arg1 : i32, i32
  }
  func.func @transform_2(%arg0: i32, %arg1: i32, %arg2: i32) -> (i32, i32) {
    %c0_i32 = arith.constant 0 : i32
    %c0_i32_0 = arith.constant 0 : i32
    return %c0_i32, %arg1 : i32, i32
  }
  func.func @transform_3(%arg0: i32, %arg1: i32, %arg2: i32) -> (i32, i32) {
    %c0_i32 = arith.constant 0 : i32
    return %arg0, %arg1 : i32, i32
  }
}

module attributes {stable_mosaic.version = 11 : i64} {
  func.func @_matmul_bias_kernel(%arg0: i32, %arg1: i32, %arg2: i32, %arg3: memref<16x32xf32, #tpu.memory_space<vmem>>, %arg4: memref<32x96xf32, #tpu.memory_space<vmem>>, %arg5: memref<1x96xf32, #tpu.memory_space<vmem>>, %arg6: memref<16x96xf32, #tpu.memory_space<vmem>>, %arg7: memref<16x96xf32, #tpu.memory_space<vmem>>) attributes {dimension_semantics = [#tpu.dimension_semantics<parallel>, #tpu.dimension_semantics<parallel>, #tpu.dimension_semantics<arbitrary>], iteration_bounds = array<i64: 1, 1, 1>, scalar_prefetch = 0 : i64, scratch_operands = 1 : i64, tpu.core_type = #tpu.core_type<tc>, window_params = [{transform_indices = @transform_0, window_bounds = array<i64: 16, 32>}, {transform_indices = @transform_1, window_bounds = array<i64: 32, 96>}, {transform_indices = @transform_2, window_bounds = array<i64: 1, 96>}, {transform_indices = @transform_3, window_bounds = array<i64: 16, 96>}]} {
    %c0_i32 = arith.constant 0 : i32
    %0 = arith.cmpi eq, %arg2, %c0_i32 : i32
    %1 = arith.extui %0 : i1 to i32
    %c0_i32_0 = arith.constant 0 : i32
    %2 = arith.cmpi ne, %1, %c0_i32_0 : i32
    scf.if %2 {
      %cst_10 = arith.constant 0.000000e+00 : f32
      %12 = vector.broadcast %cst_10 : f32 to vector<16x96xf32>
      %c0_11 = arith.constant 0 : index
      %c0_12 = arith.constant 0 : index
      %13 = vector.load %arg7[%c0_11, %c0_12] : memref<16x96xf32, #tpu.memory_space<vmem>>, vector<16x96xf32>
      tpu.vector_store %arg7[%c0_11, %c0_12], %12 {strides = array<i32>} : memref<16x96xf32, #tpu.memory_space<vmem>>, vector<16x96xf32>,
    } else {
    }
    %c0 = arith.constant 0 : index
    %c0_1 = arith.constant 0 : index
    %3 = vector.load %arg7[%c0, %c0_1] : memref<16x96xf32, #tpu.memory_space<vmem>>, vector<16x96xf32>
    %c0_2 = arith.constant 0 : index
    %c0_3 = arith.constant 0 : index
    %4 = vector.load %arg3[%c0_2, %c0_3] : memref<16x32xf32, #tpu.memory_space<vmem>>, vector<16x32xf32>
    %c0_4 = arith.constant 0 : index
    %c0_5 = arith.constant 0 : index
    %5 = vector.load %arg4[%c0_4, %c0_5] : memref<32x96xf32, #tpu.memory_space<vmem>>, vector<32x96xf32>
    %cst = arith.constant dense<0.000000e+00> : vector<16x96xf32>
    %6 = tpu.matmul %4, %5, %cst {dimension_numbers = #tpu.dot_dimension_numbers<[1], [0], [0], [1], [0, 0, 1, 1], [], []>} : vector<16x32xf32>, vector<32x96xf32>, vector<16x96xf32> -> vector<16x96xf32>
    %7 = arith.addf %3, %6 : vector<16x96xf32>
    %c0_6 = arith.constant 0 : index
    %c0_7 = arith.constant 0 : index
    %8 = vector.load %arg7[%c0_6, %c0_7] : memref<16x96xf32, #tpu.memory_space<vmem>>, vector<16x96xf32>
    tpu.vector_store %arg7[%c0_6, %c0_7], %7 {strides = array<i32>} : memref<16x96xf32, #tpu.memory_space<vmem>>, vector<16x96xf32>,
    %c0_i32_8 = arith.constant 0 : i32
    %9 = arith.cmpi eq, %arg2, %c0_i32_8 : i32
    %10 = arith.extui %9 : i1 to i32
    %c0_i32_9 = arith.constant 0 : i32
    %11 = arith.cmpi ne, %10, %c0_i32_9 : i32
    scf.if %11 {
      %c0_10 = arith.constant 0 : index
      %c0_11 = arith.constant 0 : index
      %12 = vector.load %arg7[%c0_10, %c0_11] : memref<16x96xf32, #tpu.memory_space<vmem>>, vector<16x96xf32>
      %c0_12 = arith.constant 0 : index
      %c0_13 = arith.constant 0 : index
      %13 = vector.load %arg5[%c0_12, %c0_13] : memref<1x96xf32, #tpu.memory_space<vmem>>, vector<1x96xf32>
      %14 = vector.broadcast %13 : vector<1x96xf32> to vector<16x96xf32>
      %15 = arith.addf %12, %14 : vector<16x96xf32>
      %c0_14 = arith.constant 0 : index
      %c0_15 = arith.constant 0 : index
      %16 = vector.load %arg6[%c0_14, %c0_15] : memref<16x96xf32, #tpu.memory_space<vmem>>, vector<16x96xf32>
      tpu.vector_store %arg6[%c0_14, %c0_15], %15 {strides = array<i32>} : memref<16x96xf32, #tpu.memory_space<vmem>>, vector<16x96xf32>,
    } else {
    }
    return
  }
  func.func @transform_0(%arg0: i32, %arg1: i32, %arg2: i32) -> (i32, i32) {
    %c0_i32 = arith.constant 0 : i32
    return %arg0, %arg2 : i32, i32
  }
  func.func @transform_1(%arg0: i32, %arg1: i32, %arg2: i32) -> (i32, i32) {
    %c0_i32 = arith.constant 0 : i32
    return %arg2, %arg1 : i32, i32
  }
  func.func @transform_2(%arg0: i32, %arg1: i32, %arg2: i32) -> (i32, i32) {
    %c0_i32 = arith.constant 0 : i32
    %c0_i32_0 = arith.constant 0 : i32
    return %c0_i32, %arg1 : i32, i32
  }
  func.func @transform_3(%arg0: i32, %arg1: i32, %arg2: i32) -> (i32, i32) {
    %c0_i32 = arith.constant 0 : i32
    return %arg0, %arg1 : i32, i32
  }
}

module attributes {stable_mosaic.version = 11 : i64} {
  func.func @_matmul_bias_add_ln_kernel(%arg0: i32, %arg1: i32, %arg2: memref<16x32xf32, #tpu.memory_space<vmem>>, %arg3: memref<32x32xf32, #tpu.memory_space<vmem>>, %arg4: memref<1x32xf32, #tpu.memory_space<vmem>>, %arg5: memref<16x32xf32, #tpu.memory_space<vmem>>, %arg6: memref<1x32xf32, #tpu.memory_space<vmem>>, %arg7: memref<1x32xf32, #tpu.memory_space<vmem>>, %arg8: memref<16x32xf32, #tpu.memory_space<vmem>>, %arg9: memref<16x32xf32, #tpu.memory_space<vmem>>) attributes {dimension_semantics = [#tpu.dimension_semantics<parallel>, #tpu.dimension_semantics<arbitrary>], iteration_bounds = array<i64: 1, 1>, scalar_prefetch = 0 : i64, scratch_operands = 1 : i64, tpu.core_type = #tpu.core_type<tc>, window_params = [{transform_indices = @transform_0, window_bounds = array<i64: 16, 32>}, {transform_indices = @transform_1, window_bounds = array<i64: 32, 32>}, {pipeline_mode = #tpu.pipeline_mode<synchronous>, transform_indices = @transform_2, window_bounds = array<i64: 1, 32>}, {transform_indices = @transform_3, window_bounds = array<i64: 16, 32>}, {pipeline_mode = #tpu.pipeline_mode<synchronous>, transform_indices = @transform_4, window_bounds = array<i64: 1, 32>}, {pipeline_mode = #tpu.pipeline_mode<synchronous>, transform_indices = @transform_5, window_bounds = array<i64: 1, 32>}, {transform_indices = @transform_6, window_bounds = array<i64: 16, 32>}]} {
    %c0_i32 = arith.constant 0 : i32
    %0 = arith.cmpi eq, %arg1, %c0_i32 : i32
    %1 = arith.extui %0 : i1 to i32
    %c0_i32_0 = arith.constant 0 : i32
    %2 = arith.cmpi ne, %1, %c0_i32_0 : i32
    scf.if %2 {
      %cst_10 = arith.constant 0.000000e+00 : f32
      %12 = vector.broadcast %cst_10 : f32 to vector<16x32xf32>
      %c0_11 = arith.constant 0 : index
      %c0_12 = arith.constant 0 : index
      %13 = vector.load %arg9[%c0_11, %c0_12] : memref<16x32xf32, #tpu.memory_space<vmem>>, vector<16x32xf32>
      tpu.vector_store %arg9[%c0_11, %c0_12], %12 {strides = array<i32>} : memref<16x32xf32, #tpu.memory_space<vmem>>, vector<16x32xf32>,
    } else {
    }
    %c0 = arith.constant 0 : index
    %c0_1 = arith.constant 0 : index
    %3 = vector.load %arg9[%c0, %c0_1] : memref<16x32xf32, #tpu.memory_space<vmem>>, vector<16x32xf32>
    %c0_2 = arith.constant 0 : index
    %c0_3 = arith.constant 0 : index
    %4 = vector.load %arg2[%c0_2, %c0_3] : memref<16x32xf32, #tpu.memory_space<vmem>>, vector<16x32xf32>
    %c0_4 = arith.constant 0 : index
    %c0_5 = arith.constant 0 : index
    %5 = vector.load %arg3[%c0_4, %c0_5] : memref<32x32xf32, #tpu.memory_space<vmem>>, vector<32x32xf32>
    %cst = arith.constant dense<0.000000e+00> : vector<16x32xf32>
    %6 = tpu.matmul %4, %5, %cst {dimension_numbers = #tpu.dot_dimension_numbers<[1], [0], [0], [1], [0, 0, 1, 1], [], []>} : vector<16x32xf32>, vector<32x32xf32>, vector<16x32xf32> -> vector<16x32xf32>
    %7 = arith.addf %3, %6 : vector<16x32xf32>
    %c0_6 = arith.constant 0 : index
    %c0_7 = arith.constant 0 : index
    %8 = vector.load %arg9[%c0_6, %c0_7] : memref<16x32xf32, #tpu.memory_space<vmem>>, vector<16x32xf32>
    tpu.vector_store %arg9[%c0_6, %c0_7], %7 {strides = array<i32>} : memref<16x32xf32, #tpu.memory_space<vmem>>, vector<16x32xf32>,
    %c0_i32_8 = arith.constant 0 : i32
    %9 = arith.cmpi eq, %arg1, %c0_i32_8 : i32
    %10 = arith.extui %9 : i1 to i32
    %c0_i32_9 = arith.constant 0 : i32
    %11 = arith.cmpi ne, %10, %c0_i32_9 : i32
    scf.if %11 {
      %c0_10 = arith.constant 0 : index
      %c0_11 = arith.constant 0 : index
      %12 = vector.load %arg9[%c0_10, %c0_11] : memref<16x32xf32, #tpu.memory_space<vmem>>, vector<16x32xf32>
      %c0_12 = arith.constant 0 : index
      %c0_13 = arith.constant 0 : index
      %13 = vector.load %arg4[%c0_12, %c0_13] : memref<1x32xf32, #tpu.memory_space<vmem>>, vector<1x32xf32>
      %14 = vector.broadcast %13 : vector<1x32xf32> to vector<16x32xf32>
      %15 = arith.addf %12, %14 : vector<16x32xf32>
      %c0_14 = arith.constant 0 : index
      %c0_15 = arith.constant 0 : index
      %16 = vector.load %arg5[%c0_14, %c0_15] : memref<16x32xf32, #tpu.memory_space<vmem>>, vector<16x32xf32>
      %17 = arith.addf %15, %16 : vector<16x32xf32>
      %cst_16 = arith.constant dense<0.000000e+00> : vector<16xf32>
      %18 = vector.multi_reduction <add>, %17, %cst_16 [1] : vector<16x32xf32> to vector<16xf32>
      %19 = vector.shape_cast %18 : vector<16xf32> to vector<16x1xf32>
      %cst_17 = arith.constant 3.200000e+01 : f32
      %20 = vector.broadcast %cst_17 : f32 to vector<16x1xf32>
      %21 = arith.divf %19, %20 : vector<16x1xf32>
      %22 = vector.broadcast %21 : vector<16x1xf32> to vector<16x32xf32>
      %23 = arith.subf %17, %22 : vector<16x32xf32>
      %24 = arith.mulf %23, %23 : vector<16x32xf32>
      %cst_18 = arith.constant dense<0.000000e+00> : vector<16xf32>
      %25 = vector.multi_reduction <add>, %24, %cst_18 [1] : vector<16x32xf32> to vector<16xf32>
      %26 = vector.shape_cast %25 : vector<16xf32> to vector<16x1xf32>
      %cst_19 = arith.constant 3.200000e+01 : f32
      %27 = vector.broadcast %cst_19 : f32 to vector<16x1xf32>
      %28 = arith.divf %26, %27 : vector<16x1xf32>
      %cst_20 = arith.constant 9.99999974E-6 : f32
      %29 = vector.broadcast %cst_20 : f32 to vector<16x1xf32>
      %30 = arith.addf %28, %29 : vector<16x1xf32>
      %31 = math.rsqrt %30 : vector<16x1xf32>
      %32 = vector.broadcast %31 : vector<16x1xf32> to vector<16x32xf32>
      %33 = arith.mulf %23, %32 : vector<16x32xf32>
      %c0_21 = arith.constant 0 : index
      %c0_22 = arith.constant 0 : index
      %34 = vector.load %arg6[%c0_21, %c0_22] : memref<1x32xf32, #tpu.memory_space<vmem>>, vector<1x32xf32>
      %35 = vector.broadcast %34 : vector<1x32xf32> to vector<16x32xf32>
      %36 = arith.mulf %33, %35 : vector<16x32xf32>
      %c0_23 = arith.constant 0 : index
      %c0_24 = arith.constant 0 : index
      %37 = vector.load %arg7[%c0_23, %c0_24] : memref<1x32xf32, #tpu.memory_space<vmem>>, vector<1x32xf32>
      %38 = vector.broadcast %37 : vector<1x32xf32> to vector<16x32xf32>
      %39 = arith.addf %36, %38 : vector<16x32xf32>
      %c0_25 = arith.constant 0 : index
      %c0_26 = arith.constant 0 : index
      %40 = vector.load %arg8[%c0_25, %c0_26] : memref<16x32xf32, #tpu.memory_space<vmem>>, vector<16x32xf32>
      tpu.vector_store %arg8[%c0_25, %c0_26], %39 {strides = array<i32>} : memref<16x32xf32, #tpu.memory_space<vmem>>, vector<16x32xf32>,
    } else {
    }
    return
  }
  func.func @transform_0(%arg0: i32, %arg1: i32) -> (i32, i32) {
    %c0_i32 = arith.constant 0 : i32
    return %arg0, %arg1 : i32, i32
  }
  func.func @transform_1(%arg0: i32, %arg1: i32) -> (i32, i32) {
    %c0_i32 = arith.constant 0 : i32
    %c0_i32_0 = arith.constant 0 : i32
    return %arg1, %c0_i32 : i32, i32
  }
  func.func @transform_2(%arg0: i32, %arg1: i32) -> (i32, i32) {
    %c0_i32 = arith.constant 0 : i32
    %c0_i32_0 = arith.constant 0 : i32
    %c0_i32_1 = arith.constant 0 : i32
    return %c0_i32, %c0_i32_0 : i32, i32
  }
  func.func @transform_3(%arg0: i32, %arg1: i32) -> (i32, i32) {
    %c0_i32 = arith.constant 0 : i32
    %c0_i32_0 = arith.constant 0 : i32
    return %arg0, %c0_i32 : i32, i32
  }
  func.func @transform_4(%arg0: i32, %arg1: i32) -> (i32, i32) {
    %c0_i32 = arith.constant 0 : i32
    %c0_i32_0 = arith.constant 0 : i32
    %c0_i32_1 = arith.constant 0 : i32
    return %c0_i32, %c0_i32_0 : i32, i32
  }
  func.func @transform_5(%arg0: i32, %arg1: i32) -> (i32, i32) {
    %c0_i32 = arith.constant 0 : i32
    %c0_i32_0 = arith.constant 0 : i32
    %c0_i32_1 = arith.constant 0 : i32
    return %c0_i32, %c0_i32_0 : i32, i32
  }
  func.func @transform_6(%arg0: i32, %arg1: i32) -> (i32, i32) {
    %c0_i32 = arith.constant 0 : i32
    %c0_i32_0 = arith.constant 0 : i32
    return %arg0, %c0_i32 : i32, i32
  }
}

module attributes {stable_mosaic.version = 11 : i64} {
  func.func @_mha_flash_kernel(%arg0: i32, %arg1: i32, %arg2: i32, %arg3: memref<1x8x96xf32, #tpu.memory_space<vmem>>, %arg4: memref<1x8x96xf32, #tpu.memory_space<vmem>>, %arg5: memref<8x8xf32, #tpu.memory_space<vmem>>, %arg6: memref<1x8x32xf32, #tpu.memory_space<vmem>>, %arg7: memref<4x8x1xf32, #tpu.memory_space<vmem>>, %arg8: memref<4x8x1xf32, #tpu.memory_space<vmem>>, %arg9: memref<4x8x8xf32, #tpu.memory_space<vmem>>) attributes {dimension_semantics = [#tpu.dimension_semantics<parallel>, #tpu.dimension_semantics<parallel>, #tpu.dimension_semantics<arbitrary>], iteration_bounds = array<i64: 2, 1, 1>, scalar_prefetch = 0 : i64, scratch_operands = 3 : i64, tpu.core_type = #tpu.core_type<tc>, window_params = [{transform_indices = @transform_0, window_bounds = array<i64: 1, 8, 96>}, {transform_indices = @transform_1, window_bounds = array<i64: 1, 8, 96>}, {transform_indices = @transform_2, window_bounds = array<i64: 8, 8>}, {transform_indices = @transform_3, window_bounds = array<i64: 1, 8, 32>}]} {
    %c0_i32 = arith.constant 0 : i32
    %0 = arith.cmpi eq, %arg2, %c0_i32 : i32
    %1 = arith.extui %0 : i1 to i32
    %c0_i32_0 = arith.constant 0 : i32
    %2 = arith.cmpi ne, %1, %c0_i32_0 : i32
    scf.if %2 {
      %cst_95 = arith.constant -1.000000e+30 : f32
      %157 = vector.broadcast %cst_95 : f32 to vector<4x8x1xf32>
      %c0_96 = arith.constant 0 : index
      %c0_97 = arith.constant 0 : index
      %c0_98 = arith.constant 0 : index
      %158 = vector.load %arg7[%c0_96, %c0_97, %c0_98] : memref<4x8x1xf32, #tpu.memory_space<vmem>>, vector<4x8x1xf32>
      tpu.vector_store %arg7[%c0_96, %c0_97, %c0_98], %157 {strides = array<i32>} : memref<4x8x1xf32, #tpu.memory_space<vmem>>, vector<4x8x1xf32>,
      %cst_99 = arith.constant 0.000000e+00 : f32
      %159 = vector.broadcast %cst_99 : f32 to vector<4x8x1xf32>
      %c0_100 = arith.constant 0 : index
      %c0_101 = arith.constant 0 : index
      %c0_102 = arith.constant 0 : index
      %160 = vector.load %arg8[%c0_100, %c0_101, %c0_102] : memref<4x8x1xf32, #tpu.memory_space<vmem>>, vector<4x8x1xf32>
      tpu.vector_store %arg8[%c0_100, %c0_101, %c0_102], %159 {strides = array<i32>} : memref<4x8x1xf32, #tpu.memory_space<vmem>>, vector<4x8x1xf32>,
      %cst_103 = arith.constant 0.000000e+00 : f32
      %161 = vector.broadcast %cst_103 : f32 to vector<4x8x8xf32>
      %c0_104 = arith.constant 0 : index
      %c0_105 = arith.constant 0 : index
      %c0_106 = arith.constant 0 : index
      %162 = vector.load %arg9[%c0_104, %c0_105, %c0_106] : memref<4x8x8xf32, #tpu.memory_space<vmem>>, vector<4x8x8xf32>
      tpu.vector_store %arg9[%c0_104, %c0_105, %c0_106], %161 {strides = array<i32>} : memref<4x8x8xf32, #tpu.memory_space<vmem>>, vector<4x8x8xf32>,
    } else {
    }
    %c0 = arith.constant 0 : index
    %c0_1 = arith.constant 0 : index
    %c0_2 = arith.constant 0 : index
    %3 = vector.load %arg3[%c0, %c0_1, %c0_2] : memref<1x8x96xf32, #tpu.memory_space<vmem>>, vector<1x8x32xf32>
    %4 = vector.shape_cast %3 : vector<1x8x32xf32> to vector<8x32xf32>
    %c0_3 = arith.constant 0 : index
    %c0_4 = arith.constant 0 : index
    %c32 = arith.constant 32 : index
    %5 = vector.load %arg4[%c0_3, %c0_4, %c32] : memref<1x8x96xf32, #tpu.memory_space<vmem>>, vector<1x8x32xf32>
    %6 = vector.shape_cast %5 : vector<1x8x32xf32> to vector<8x32xf32>
    %c0_5 = arith.constant 0 : index
    %c0_6 = arith.constant 0 : index
    %c64 = arith.constant 64 : index
    %7 = vector.load %arg4[%c0_5, %c0_6, %c64] : memref<1x8x96xf32, #tpu.memory_space<vmem>>, vector<1x8x32xf32>
    %8 = vector.shape_cast %7 : vector<1x8x32xf32> to vector<8x32xf32>
    %c0_7 = arith.constant 0 : index
    %c0_8 = arith.constant 0 : index
    %9 = vector.load %arg5[%c0_7, %c0_8] : memref<8x8xf32, #tpu.memory_space<vmem>>, vector<8x8xf32>
    %10 = vector.extract_strided_slice %4 {offsets = [0, 0], sizes = [8, 8], strides = [1, 1]} : vector<8x32xf32> to vector<8x8xf32>
    %11 = vector.extract_strided_slice %6 {offsets = [0, 0], sizes = [8, 8], strides = [1, 1]} : vector<8x32xf32> to vector<8x8xf32>
    %12 = vector.extract_strided_slice %8 {offsets = [0, 0], sizes = [8, 8], strides = [1, 1]} : vector<8x32xf32> to vector<8x8xf32>
    %cst = arith.constant dense<0.000000e+00> : vector<8x8xf32>
    %13 = tpu.matmul %10, %11, %cst {dimension_numbers = #tpu.dot_dimension_numbers<[1], [1], [0], [0], [0, 0, 1, 0], [], []>} : vector<8x8xf32>, vector<8x8xf32>, vector<8x8xf32> -> vector<8x8xf32>
    %14 = arith.addf %13, %9 : vector<8x8xf32>
    %c0_9 = arith.constant 0 : index
    %c0_10 = arith.constant 0 : index
    %c0_11 = arith.constant 0 : index
    %15 = vector.load %arg7[%c0_9, %c0_10, %c0_11] : memref<4x8x1xf32, #tpu.memory_space<vmem>>, vector<1x8x1xf32>
    %16 = vector.shape_cast %15 : vector<1x8x1xf32> to vector<8x1xf32>
    %cst_12 = arith.constant dense<0xFF800000> : vector<8xf32>
    %17 = vector.multi_reduction <maximumf>, %14, %cst_12 [1] : vector<8x8xf32> to vector<8xf32>
    %18 = vector.shape_cast %17 : vector<8xf32> to vector<8x1xf32>
    %19 = arith.maximumf %16, %18 : vector<8x1xf32>
    %20 = arith.subf %16, %19 : vector<8x1xf32>
    %21 = math.exp %20 : vector<8x1xf32>
    %22 = vector.broadcast %19 : vector<8x1xf32> to vector<8x8xf32>
    %23 = arith.subf %14, %22 : vector<8x8xf32>
    %24 = math.exp %23 : vector<8x8xf32>
    %c0_13 = arith.constant 0 : index
    %c0_14 = arith.constant 0 : index
    %c0_15 = arith.constant 0 : index
    %25 = vector.load %arg8[%c0_13, %c0_14, %c0_15] : memref<4x8x1xf32, #tpu.memory_space<vmem>>, vector<1x8x1xf32>
    %26 = vector.shape_cast %25 : vector<1x8x1xf32> to vector<8x1xf32>
    %27 = arith.mulf %21, %26 : vector<8x1xf32>
    %cst_16 = arith.constant dense<0.000000e+00> : vector<8xf32>
    %28 = vector.multi_reduction <add>, %24, %cst_16 [1] : vector<8x8xf32> to vector<8xf32>
    %29 = vector.shape_cast %28 : vector<8xf32> to vector<8x1xf32>
    %30 = arith.addf %27, %29 : vector<8x1xf32>
    %c0_17 = arith.constant 0 : index
    %c0_18 = arith.constant 0 : index
    %c0_19 = arith.constant 0 : index
    %31 = vector.load %arg8[%c0_17, %c0_18, %c0_19] : memref<4x8x1xf32, #tpu.memory_space<vmem>>, vector<1x8x1xf32>
    %32 = vector.shape_cast %31 : vector<1x8x1xf32> to vector<8x1xf32>
    %33 = vector.shape_cast %30 : vector<8x1xf32> to vector<1x8x1xf32>
    tpu.vector_store %arg8[%c0_17, %c0_18, %c0_19], %33 {strides = array<i32>} : memref<4x8x1xf32, #tpu.memory_space<vmem>>, vector<1x8x1xf32>,
    %c0_20 = arith.constant 0 : index
    %c0_21 = arith.constant 0 : index
    %c0_22 = arith.constant 0 : index
    %34 = vector.load %arg9[%c0_20, %c0_21, %c0_22] : memref<4x8x8xf32, #tpu.memory_space<vmem>>, vector<1x8x8xf32>
    %35 = vector.shape_cast %34 : vector<1x8x8xf32> to vector<8x8xf32>
    %36 = vector.broadcast %21 : vector<8x1xf32> to vector<8x8xf32>
    %37 = arith.mulf %36, %35 : vector<8x8xf32>
    %cst_23 = arith.constant dense<0.000000e+00> : vector<8x8xf32>
    %38 = tpu.matmul %24, %12, %cst_23 {dimension_numbers = #tpu.dot_dimension_numbers<[1], [0], [0], [1], [0, 0, 1, 1], [], []>} : vector<8x8xf32>, vector<8x8xf32>, vector<8x8xf32> -> vector<8x8xf32>
    %39 = arith.addf %37, %38 : vector<8x8xf32>
    %c0_24 = arith.constant 0 : index
    %c0_25 = arith.constant 0 : index
    %c0_26 = arith.constant 0 : index
    %40 = vector.load %arg9[%c0_24, %c0_25, %c0_26] : memref<4x8x8xf32, #tpu.memory_space<vmem>>, vector<1x8x8xf32>
    %41 = vector.shape_cast %40 : vector<1x8x8xf32> to vector<8x8xf32>
    %42 = vector.shape_cast %39 : vector<8x8xf32> to vector<1x8x8xf32>
    tpu.vector_store %arg9[%c0_24, %c0_25, %c0_26], %42 {strides = array<i32>} : memref<4x8x8xf32, #tpu.memory_space<vmem>>, vector<1x8x8xf32>,
    %c0_27 = arith.constant 0 : index
    %c0_28 = arith.constant 0 : index
    %c0_29 = arith.constant 0 : index
    %43 = vector.load %arg7[%c0_27, %c0_28, %c0_29] : memref<4x8x1xf32, #tpu.memory_space<vmem>>, vector<1x8x1xf32>
    %44 = vector.shape_cast %43 : vector<1x8x1xf32> to vector<8x1xf32>
    %45 = vector.shape_cast %19 : vector<8x1xf32> to vector<1x8x1xf32>
    tpu.vector_store %arg7[%c0_27, %c0_28, %c0_29], %45 {strides = array<i32>} : memref<4x8x1xf32, #tpu.memory_space<vmem>>, vector<1x8x1xf32>,
    %46 = vector.extract_strided_slice %4 {offsets = [0, 8], sizes = [8, 8], strides = [1, 1]} : vector<8x32xf32> to vector<8x8xf32>
    %47 = vector.extract_strided_slice %6 {offsets = [0, 8], sizes = [8, 8], strides = [1, 1]} : vector<8x32xf32> to vector<8x8xf32>
    %48 = vector.extract_strided_slice %8 {offsets = [0, 8], sizes = [8, 8], strides = [1, 1]} : vector<8x32xf32> to vector<8x8xf32>
    %cst_30 = arith.constant dense<0.000000e+00> : vector<8x8xf32>
    %49 = tpu.matmul %46, %47, %cst_30 {dimension_numbers = #tpu.dot_dimension_numbers<[1], [1], [0], [0], [0, 0, 1, 0], [], []>} : vector<8x8xf32>, vector<8x8xf32>, vector<8x8xf32> -> vector<8x8xf32>
    %50 = arith.addf %49, %9 : vector<8x8xf32>
    %c1 = arith.constant 1 : index
    %c0_31 = arith.constant 0 : index
    %c0_32 = arith.constant 0 : index
    %51 = vector.load %arg7[%c1, %c0_31, %c0_32] : memref<4x8x1xf32, #tpu.memory_space<vmem>>, vector<1x8x1xf32>
    %52 = vector.shape_cast %51 : vector<1x8x1xf32> to vector<8x1xf32>
    %cst_33 = arith.constant dense<0xFF800000> : vector<8xf32>
    %53 = vector.multi_reduction <maximumf>, %50, %cst_33 [1] : vector<8x8xf32> to vector<8xf32>
    %54 = vector.shape_cast %53 : vector<8xf32> to vector<8x1xf32>
    %55 = arith.maximumf %52, %54 : vector<8x1xf32>
    %56 = arith.subf %52, %55 : vector<8x1xf32>
    %57 = math.exp %56 : vector<8x1xf32>
    %58 = vector.broadcast %55 : vector<8x1xf32> to vector<8x8xf32>
    %59 = arith.subf %50, %58 : vector<8x8xf32>
    %60 = math.exp %59 : vector<8x8xf32>
    %c1_34 = arith.constant 1 : index
    %c0_35 = arith.constant 0 : index
    %c0_36 = arith.constant 0 : index
    %61 = vector.load %arg8[%c1_34, %c0_35, %c0_36] : memref<4x8x1xf32, #tpu.memory_space<vmem>>, vector<1x8x1xf32>
    %62 = vector.shape_cast %61 : vector<1x8x1xf32> to vector<8x1xf32>
    %63 = arith.mulf %57, %62 : vector<8x1xf32>
    %cst_37 = arith.constant dense<0.000000e+00> : vector<8xf32>
    %64 = vector.multi_reduction <add>, %60, %cst_37 [1] : vector<8x8xf32> to vector<8xf32>
    %65 = vector.shape_cast %64 : vector<8xf32> to vector<8x1xf32>
    %66 = arith.addf %63, %65 : vector<8x1xf32>
    %c1_38 = arith.constant 1 : index
    %c0_39 = arith.constant 0 : index
    %c0_40 = arith.constant 0 : index
    %67 = vector.load %arg8[%c1_38, %c0_39, %c0_40] : memref<4x8x1xf32, #tpu.memory_space<vmem>>, vector<1x8x1xf32>
    %68 = vector.shape_cast %67 : vector<1x8x1xf32> to vector<8x1xf32>
    %69 = vector.shape_cast %66 : vector<8x1xf32> to vector<1x8x1xf32>
    tpu.vector_store %arg8[%c1_38, %c0_39, %c0_40], %69 {strides = array<i32>} : memref<4x8x1xf32, #tpu.memory_space<vmem>>, vector<1x8x1xf32>,
    %c1_41 = arith.constant 1 : index
    %c0_42 = arith.constant 0 : index
    %c0_43 = arith.constant 0 : index
    %70 = vector.load %arg9[%c1_41, %c0_42, %c0_43] : memref<4x8x8xf32, #tpu.memory_space<vmem>>, vector<1x8x8xf32>
    %71 = vector.shape_cast %70 : vector<1x8x8xf32> to vector<8x8xf32>
    %72 = vector.broadcast %57 : vector<8x1xf32> to vector<8x8xf32>
    %73 = arith.mulf %72, %71 : vector<8x8xf32>
    %cst_44 = arith.constant dense<0.000000e+00> : vector<8x8xf32>
    %74 = tpu.matmul %60, %48, %cst_44 {dimension_numbers = #tpu.dot_dimension_numbers<[1], [0], [0], [1], [0, 0, 1, 1], [], []>} : vector<8x8xf32>, vector<8x8xf32>, vector<8x8xf32> -> vector<8x8xf32>
    %75 = arith.addf %73, %74 : vector<8x8xf32>
    %c1_45 = arith.constant 1 : index
    %c0_46 = arith.constant 0 : index
    %c0_47 = arith.constant 0 : index
    %76 = vector.load %arg9[%c1_45, %c0_46, %c0_47] : memref<4x8x8xf32, #tpu.memory_space<vmem>>, vector<1x8x8xf32>
    %77 = vector.shape_cast %76 : vector<1x8x8xf32> to vector<8x8xf32>
    %78 = vector.shape_cast %75 : vector<8x8xf32> to vector<1x8x8xf32>
    tpu.vector_store %arg9[%c1_45, %c0_46, %c0_47], %78 {strides = array<i32>} : memref<4x8x8xf32, #tpu.memory_space<vmem>>, vector<1x8x8xf32>,
    %c1_48 = arith.constant 1 : index
    %c0_49 = arith.constant 0 : index
    %c0_50 = arith.constant 0 : index
    %79 = vector.load %arg7[%c1_48, %c0_49, %c0_50] : memref<4x8x1xf32, #tpu.memory_space<vmem>>, vector<1x8x1xf32>
    %80 = vector.shape_cast %79 : vector<1x8x1xf32> to vector<8x1xf32>
    %81 = vector.shape_cast %55 : vector<8x1xf32> to vector<1x8x1xf32>
    tpu.vector_store %arg7[%c1_48, %c0_49, %c0_50], %81 {strides = array<i32>} : memref<4x8x1xf32, #tpu.memory_space<vmem>>, vector<1x8x1xf32>,
    %82 = vector.extract_strided_slice %4 {offsets = [0, 16], sizes = [8, 8], strides = [1, 1]} : vector<8x32xf32> to vector<8x8xf32>
    %83 = vector.extract_strided_slice %6 {offsets = [0, 16], sizes = [8, 8], strides = [1, 1]} : vector<8x32xf32> to vector<8x8xf32>
    %84 = vector.extract_strided_slice %8 {offsets = [0, 16], sizes = [8, 8], strides = [1, 1]} : vector<8x32xf32> to vector<8x8xf32>
    %cst_51 = arith.constant dense<0.000000e+00> : vector<8x8xf32>
    %85 = tpu.matmul %82, %83, %cst_51 {dimension_numbers = #tpu.dot_dimension_numbers<[1], [1], [0], [0], [0, 0, 1, 0], [], []>} : vector<8x8xf32>, vector<8x8xf32>, vector<8x8xf32> -> vector<8x8xf32>
    %86 = arith.addf %85, %9 : vector<8x8xf32>
    %c2 = arith.constant 2 : index
    %c0_52 = arith.constant 0 : index
    %c0_53 = arith.constant 0 : index
    %87 = vector.load %arg7[%c2, %c0_52, %c0_53] : memref<4x8x1xf32, #tpu.memory_space<vmem>>, vector<1x8x1xf32>
    %88 = vector.shape_cast %87 : vector<1x8x1xf32> to vector<8x1xf32>
    %cst_54 = arith.constant dense<0xFF800000> : vector<8xf32>
    %89 = vector.multi_reduction <maximumf>, %86, %cst_54 [1] : vector<8x8xf32> to vector<8xf32>
    %90 = vector.shape_cast %89 : vector<8xf32> to vector<8x1xf32>
    %91 = arith.maximumf %88, %90 : vector<8x1xf32>
    %92 = arith.subf %88, %91 : vector<8x1xf32>
    %93 = math.exp %92 : vector<8x1xf32>
    %94 = vector.broadcast %91 : vector<8x1xf32> to vector<8x8xf32>
    %95 = arith.subf %86, %94 : vector<8x8xf32>
    %96 = math.exp %95 : vector<8x8xf32>
    %c2_55 = arith.constant 2 : index
    %c0_56 = arith.constant 0 : index
    %c0_57 = arith.constant 0 : index
    %97 = vector.load %arg8[%c2_55, %c0_56, %c0_57] : memref<4x8x1xf32, #tpu.memory_space<vmem>>, vector<1x8x1xf32>
    %98 = vector.shape_cast %97 : vector<1x8x1xf32> to vector<8x1xf32>
    %99 = arith.mulf %93, %98 : vector<8x1xf32>
    %cst_58 = arith.constant dense<0.000000e+00> : vector<8xf32>
    %100 = vector.multi_reduction <add>, %96, %cst_58 [1] : vector<8x8xf32> to vector<8xf32>
    %101 = vector.shape_cast %100 : vector<8xf32> to vector<8x1xf32>
    %102 = arith.addf %99, %101 : vector<8x1xf32>
    %c2_59 = arith.constant 2 : index
    %c0_60 = arith.constant 0 : index
    %c0_61 = arith.constant 0 : index
    %103 = vector.load %arg8[%c2_59, %c0_60, %c0_61] : memref<4x8x1xf32, #tpu.memory_space<vmem>>, vector<1x8x1xf32>
    %104 = vector.shape_cast %103 : vector<1x8x1xf32> to vector<8x1xf32>
    %105 = vector.shape_cast %102 : vector<8x1xf32> to vector<1x8x1xf32>
    tpu.vector_store %arg8[%c2_59, %c0_60, %c0_61], %105 {strides = array<i32>} : memref<4x8x1xf32, #tpu.memory_space<vmem>>, vector<1x8x1xf32>,
    %c2_62 = arith.constant 2 : index
    %c0_63 = arith.constant 0 : index
    %c0_64 = arith.constant 0 : index
    %106 = vector.load %arg9[%c2_62, %c0_63, %c0_64] : memref<4x8x8xf32, #tpu.memory_space<vmem>>, vector<1x8x8xf32>
    %107 = vector.shape_cast %106 : vector<1x8x8xf32> to vector<8x8xf32>
    %108 = vector.broadcast %93 : vector<8x1xf32> to vector<8x8xf32>
    %109 = arith.mulf %108, %107 : vector<8x8xf32>
    %cst_65 = arith.constant dense<0.000000e+00> : vector<8x8xf32>
    %110 = tpu.matmul %96, %84, %cst_65 {dimension_numbers = #tpu.dot_dimension_numbers<[1], [0], [0], [1], [0, 0, 1, 1], [], []>} : vector<8x8xf32>, vector<8x8xf32>, vector<8x8xf32> -> vector<8x8xf32>
    %111 = arith.addf %109, %110 : vector<8x8xf32>
    %c2_66 = arith.constant 2 : index
    %c0_67 = arith.constant 0 : index
    %c0_68 = arith.constant 0 : index
    %112 = vector.load %arg9[%c2_66, %c0_67, %c0_68] : memref<4x8x8xf32, #tpu.memory_space<vmem>>, vector<1x8x8xf32>
    %113 = vector.shape_cast %112 : vector<1x8x8xf32> to vector<8x8xf32>
    %114 = vector.shape_cast %111 : vector<8x8xf32> to vector<1x8x8xf32>
    tpu.vector_store %arg9[%c2_66, %c0_67, %c0_68], %114 {strides = array<i32>} : memref<4x8x8xf32, #tpu.memory_space<vmem>>, vector<1x8x8xf32>,
    %c2_69 = arith.constant 2 : index
    %c0_70 = arith.constant 0 : index
    %c0_71 = arith.constant 0 : index
    %115 = vector.load %arg7[%c2_69, %c0_70, %c0_71] : memref<4x8x1xf32, #tpu.memory_space<vmem>>, vector<1x8x1xf32>
    %116 = vector.shape_cast %115 : vector<1x8x1xf32> to vector<8x1xf32>
    %117 = vector.shape_cast %91 : vector<8x1xf32> to vector<1x8x1xf32>
    tpu.vector_store %arg7[%c2_69, %c0_70, %c0_71], %117 {strides = array<i32>} : memref<4x8x1xf32, #tpu.memory_space<vmem>>, vector<1x8x1xf32>,
    %118 = vector.extract_strided_slice %4 {offsets = [0, 24], sizes = [8, 8], strides = [1, 1]} : vector<8x32xf32> to vector<8x8xf32>
    %119 = vector.extract_strided_slice %6 {offsets = [0, 24], sizes = [8, 8], strides = [1, 1]} : vector<8x32xf32> to vector<8x8xf32>
    %120 = vector.extract_strided_slice %8 {offsets = [0, 24], sizes = [8, 8], strides = [1, 1]} : vector<8x32xf32> to vector<8x8xf32>
    %cst_72 = arith.constant dense<0.000000e+00> : vector<8x8xf32>
    %121 = tpu.matmul %118, %119, %cst_72 {dimension_numbers = #tpu.dot_dimension_numbers<[1], [1], [0], [0], [0, 0, 1, 0], [], []>} : vector<8x8xf32>, vector<8x8xf32>, vector<8x8xf32> -> vector<8x8xf32>
    %122 = arith.addf %121, %9 : vector<8x8xf32>
    %c3 = arith.constant 3 : index
    %c0_73 = arith.constant 0 : index
    %c0_74 = arith.constant 0 : index
    %123 = vector.load %arg7[%c3, %c0_73, %c0_74] : memref<4x8x1xf32, #tpu.memory_space<vmem>>, vector<1x8x1xf32>
    %124 = vector.shape_cast %123 : vector<1x8x1xf32> to vector<8x1xf32>
    %cst_75 = arith.constant dense<0xFF800000> : vector<8xf32>
    %125 = vector.multi_reduction <maximumf>, %122, %cst_75 [1] : vector<8x8xf32> to vector<8xf32>
    %126 = vector.shape_cast %125 : vector<8xf32> to vector<8x1xf32>
    %127 = arith.maximumf %124, %126 : vector<8x1xf32>
    %128 = arith.subf %124, %127 : vector<8x1xf32>
    %129 = math.exp %128 : vector<8x1xf32>
    %130 = vector.broadcast %127 : vector<8x1xf32> to vector<8x8xf32>
    %131 = arith.subf %122, %130 : vector<8x8xf32>
    %132 = math.exp %131 : vector<8x8xf32>
    %c3_76 = arith.constant 3 : index
    %c0_77 = arith.constant 0 : index
    %c0_78 = arith.constant 0 : index
    %133 = vector.load %arg8[%c3_76, %c0_77, %c0_78] : memref<4x8x1xf32, #tpu.memory_space<vmem>>, vector<1x8x1xf32>
    %134 = vector.shape_cast %133 : vector<1x8x1xf32> to vector<8x1xf32>
    %135 = arith.mulf %129, %134 : vector<8x1xf32>
    %cst_79 = arith.constant dense<0.000000e+00> : vector<8xf32>
    %136 = vector.multi_reduction <add>, %132, %cst_79 [1] : vector<8x8xf32> to vector<8xf32>
    %137 = vector.shape_cast %136 : vector<8xf32> to vector<8x1xf32>
    %138 = arith.addf %135, %137 : vector<8x1xf32>
    %c3_80 = arith.constant 3 : index
    %c0_81 = arith.constant 0 : index
    %c0_82 = arith.constant 0 : index
    %139 = vector.load %arg8[%c3_80, %c0_81, %c0_82] : memref<4x8x1xf32, #tpu.memory_space<vmem>>, vector<1x8x1xf32>
    %140 = vector.shape_cast %139 : vector<1x8x1xf32> to vector<8x1xf32>
    %141 = vector.shape_cast %138 : vector<8x1xf32> to vector<1x8x1xf32>
    tpu.vector_store %arg8[%c3_80, %c0_81, %c0_82], %141 {strides = array<i32>} : memref<4x8x1xf32, #tpu.memory_space<vmem>>, vector<1x8x1xf32>,
    %c3_83 = arith.constant 3 : index
    %c0_84 = arith.constant 0 : index
    %c0_85 = arith.constant 0 : index
    %142 = vector.load %arg9[%c3_83, %c0_84, %c0_85] : memref<4x8x8xf32, #tpu.memory_space<vmem>>, vector<1x8x8xf32>
    %143 = vector.shape_cast %142 : vector<1x8x8xf32> to vector<8x8xf32>
    %144 = vector.broadcast %129 : vector<8x1xf32> to vector<8x8xf32>
    %145 = arith.mulf %144, %143 : vector<8x8xf32>
    %cst_86 = arith.constant dense<0.000000e+00> : vector<8x8xf32>
    %146 = tpu.matmul %132, %120, %cst_86 {dimension_numbers = #tpu.dot_dimension_numbers<[1], [0], [0], [1], [0, 0, 1, 1], [], []>} : vector<8x8xf32>, vector<8x8xf32>, vector<8x8xf32> -> vector<8x8xf32>
    %147 = arith.addf %145, %146 : vector<8x8xf32>
    %c3_87 = arith.constant 3 : index
    %c0_88 = arith.constant 0 : index
    %c0_89 = arith.constant 0 : index
    %148 = vector.load %arg9[%c3_87, %c0_88, %c0_89] : memref<4x8x8xf32, #tpu.memory_space<vmem>>, vector<1x8x8xf32>
    %149 = vector.shape_cast %148 : vector<1x8x8xf32> to vector<8x8xf32>
    %150 = vector.shape_cast %147 : vector<8x8xf32> to vector<1x8x8xf32>
    tpu.vector_store %arg9[%c3_87, %c0_88, %c0_89], %150 {strides = array<i32>} : memref<4x8x8xf32, #tpu.memory_space<vmem>>, vector<1x8x8xf32>,
    %c3_90 = arith.constant 3 : index
    %c0_91 = arith.constant 0 : index
    %c0_92 = arith.constant 0 : index
    %151 = vector.load %arg7[%c3_90, %c0_91, %c0_92] : memref<4x8x1xf32, #tpu.memory_space<vmem>>, vector<1x8x1xf32>
    %152 = vector.shape_cast %151 : vector<1x8x1xf32> to vector<8x1xf32>
    %153 = vector.shape_cast %127 : vector<8x1xf32> to vector<1x8x1xf32>
    tpu.vector_store %arg7[%c3_90, %c0_91, %c0_92], %153 {strides = array<i32>} : memref<4x8x1xf32, #tpu.memory_space<vmem>>, vector<1x8x1xf32>,
    %c0_i32_93 = arith.constant 0 : i32
    %154 = arith.cmpi eq, %arg2, %c0_i32_93 : i32
    %155 = arith.extui %154 : i1 to i32
    %c0_i32_94 = arith.constant 0 : i32
    %156 = arith.cmpi ne, %155, %c0_i32_94 : i32
    scf.if %156 {
      %c0_95 = arith.constant 0 : index
      %c0_96 = arith.constant 0 : index
      %c0_97 = arith.constant 0 : index
      %157 = vector.load %arg8[%c0_95, %c0_96, %c0_97] : memref<4x8x1xf32, #tpu.memory_space<vmem>>, vector<1x8x1xf32>
      %158 = vector.shape_cast %157 : vector<1x8x1xf32> to vector<8x1xf32>
      %159 = tpu.reciprocal %158 {approx = true} : vector<8x1xf32> -> vector<8x1xf32>
      %c0_98 = arith.constant 0 : index
      %c0_99 = arith.constant 0 : index
      %c0_100 = arith.constant 0 : index
      %160 = vector.load %arg9[%c0_98, %c0_99, %c0_100] : memref<4x8x8xf32, #tpu.memory_space<vmem>>, vector<1x8x8xf32>
      %161 = vector.shape_cast %160 : vector<1x8x8xf32> to vector<8x8xf32>
      %162 = vector.broadcast %159 : vector<8x1xf32> to vector<8x8xf32>
      %163 = arith.mulf %161, %162 : vector<8x8xf32>
      %c0_101 = arith.constant 0 : index
      %c0_102 = arith.constant 0 : index
      %c0_103 = arith.constant 0 : index
      %164 = vector.load %arg6[%c0_101, %c0_102, %c0_103] : memref<1x8x32xf32, #tpu.memory_space<vmem>>, vector<1x8x8xf32>
      %165 = vector.shape_cast %164 : vector<1x8x8xf32> to vector<8x8xf32>
      %166 = vector.shape_cast %163 : vector<8x8xf32> to vector<1x8x8xf32>
      tpu.vector_store %arg6[%c0_101, %c0_102, %c0_103], %166 {strides = array<i32>} : memref<1x8x32xf32, #tpu.memory_space<vmem>>, vector<1x8x8xf32>,
      %c1_104 = arith.constant 1 : index
      %c0_105 = arith.constant 0 : index
      %c0_106 = arith.constant 0 : index
      %167 = vector.load %arg8[%c1_104, %c0_105, %c0_106] : memref<4x8x1xf32, #tpu.memory_space<vmem>>, vector<1x8x1xf32>
      %168 = vector.shape_cast %167 : vector<1x8x1xf32> to vector<8x1xf32>
      %169 = tpu.reciprocal %168 {approx = true} : vector<8x1xf32> -> vector<8x1xf32>
      %c1_107 = arith.constant 1 : index
      %c0_108 = arith.constant 0 : index
      %c0_109 = arith.constant 0 : index
      %170 = vector.load %arg9[%c1_107, %c0_108, %c0_109] : memref<4x8x8xf32, #tpu.memory_space<vmem>>, vector<1x8x8xf32>
      %171 = vector.shape_cast %170 : vector<1x8x8xf32> to vector<8x8xf32>
      %172 = vector.broadcast %169 : vector<8x1xf32> to vector<8x8xf32>
      %173 = arith.mulf %171, %172 : vector<8x8xf32>
      %c0_110 = arith.constant 0 : index
      %c0_111 = arith.constant 0 : index
      %c8 = arith.constant 8 : index
      %174 = vector.load %arg6[%c0_110, %c0_111, %c8] : memref<1x8x32xf32, #tpu.memory_space<vmem>>, vector<1x8x8xf32>
      %175 = vector.shape_cast %174 : vector<1x8x8xf32> to vector<8x8xf32>
      %176 = vector.shape_cast %173 : vector<8x8xf32> to vector<1x8x8xf32>
      tpu.vector_store %arg6[%c0_110, %c0_111, %c8], %176 {strides = array<i32>} : memref<1x8x32xf32, #tpu.memory_space<vmem>>, vector<1x8x8xf32>,
      %c2_112 = arith.constant 2 : index
      %c0_113 = arith.constant 0 : index
      %c0_114 = arith.constant 0 : index
      %177 = vector.load %arg8[%c2_112, %c0_113, %c0_114] : memref<4x8x1xf32, #tpu.memory_space<vmem>>, vector<1x8x1xf32>
      %178 = vector.shape_cast %177 : vector<1x8x1xf32> to vector<8x1xf32>
      %179 = tpu.reciprocal %178 {approx = true} : vector<8x1xf32> -> vector<8x1xf32>
      %c2_115 = arith.constant 2 : index
      %c0_116 = arith.constant 0 : index
      %c0_117 = arith.constant 0 : index
      %180 = vector.load %arg9[%c2_115, %c0_116, %c0_117] : memref<4x8x8xf32, #tpu.memory_space<vmem>>, vector<1x8x8xf32>
      %181 = vector.shape_cast %180 : vector<1x8x8xf32> to vector<8x8xf32>
      %182 = vector.broadcast %179 : vector<8x1xf32> to vector<8x8xf32>
      %183 = arith.mulf %181, %182 : vector<8x8xf32>
      %c0_118 = arith.constant 0 : index
      %c0_119 = arith.constant 0 : index
      %c16 = arith.constant 16 : index
      %184 = vector.load %arg6[%c0_118, %c0_119, %c16] : memref<1x8x32xf32, #tpu.memory_space<vmem>>, vector<1x8x8xf32>
      %185 = vector.shape_cast %184 : vector<1x8x8xf32> to vector<8x8xf32>
      %186 = vector.shape_cast %183 : vector<8x8xf32> to vector<1x8x8xf32>
      tpu.vector_store %arg6[%c0_118, %c0_119, %c16], %186 {strides = array<i32>} : memref<1x8x32xf32, #tpu.memory_space<vmem>>, vector<1x8x8xf32>,
      %c3_120 = arith.constant 3 : index
      %c0_121 = arith.constant 0 : index
      %c0_122 = arith.constant 0 : index
      %187 = vector.load %arg8[%c3_120, %c0_121, %c0_122] : memref<4x8x1xf32, #tpu.memory_space<vmem>>, vector<1x8x1xf32>
      %188 = vector.shape_cast %187 : vector<1x8x1xf32> to vector<8x1xf32>
      %189 = tpu.reciprocal %188 {approx = true} : vector<8x1xf32> -> vector<8x1xf32>
      %c3_123 = arith.constant 3 : index
      %c0_124 = arith.constant 0 : index
      %c0_125 = arith.constant 0 : index
      %190 = vector.load %arg9[%c3_123, %c0_124, %c0_125] : memref<4x8x8xf32, #tpu.memory_space<vmem>>, vector<1x8x8xf32>
      %191 = vector.shape_cast %190 : vector<1x8x8xf32> to vector<8x8xf32>
      %192 = vector.broadcast %189 : vector<8x1xf32> to vector<8x8xf32>
      %193 = arith.mulf %191, %192 : vector<8x8xf32>
      %c0_126 = arith.constant 0 : index
      %c0_127 = arith.constant 0 : index
      %c24 = arith.constant 24 : index
      %194 = vector.load %arg6[%c0_126, %c0_127, %c24] : memref<1x8x32xf32, #tpu.memory_space<vmem>>, vector<1x8x8xf32>
      %195 = vector.shape_cast %194 : vector<1x8x8xf32> to vector<8x8xf32>
      %196 = vector.shape_cast %193 : vector<8x8xf32> to vector<1x8x8xf32>
      tpu.vector_store %arg6[%c0_126, %c0_127, %c24], %196 {strides = array<i32>} : memref<1x8x32xf32, #tpu.memory_space<vmem>>, vector<1x8x8xf32>,
    } else {
    }
    return
  }
  func.func @transform_0(%arg0: i32, %arg1: i32, %arg2: i32) -> (i32, i32, i32) {
    %c0_i32 = arith.constant 0 : i32
    %c0_i32_0 = arith.constant 0 : i32
    return %arg0, %arg1, %c0_i32 : i32, i32, i32
  }
  func.func @transform_1(%arg0: i32, %arg1: i32, %arg2: i32) -> (i32, i32, i32) {
    %c0_i32 = arith.constant 0 : i32
    %c0_i32_0 = arith.constant 0 : i32
    return %arg0, %arg2, %c0_i32 : i32, i32, i32
  }
  func.func @transform_2(%arg0: i32, %arg1: i32, %arg2: i32) -> (i32, i32) {
    %c0_i32 = arith.constant 0 : i32
    return %arg1, %arg2 : i32, i32
  }
  func.func @transform_3(%arg0: i32, %arg1: i32, %arg2: i32) -> (i32, i32, i32) {
    %c0_i32 = arith.constant 0 : i32
    %c0_i32_0 = arith.constant 0 : i32
    return %arg0, %arg1, %c0_i32 : i32, i32, i32
  }
}

module attributes {stable_mosaic.version = 11 : i64} {
  func.func @_matmul_bias_kernel(%arg0: i32, %arg1: i32, %arg2: i32, %arg3: memref<16x32xf32, #tpu.memory_space<vmem>>, %arg4: memref<32x32xf32, #tpu.memory_space<vmem>>, %arg5: memref<1x32xf32, #tpu.memory_space<vmem>>, %arg6: memref<16x32xf32, #tpu.memory_space<vmem>>, %arg7: memref<16x32xf32, #tpu.memory_space<vmem>>) attributes {dimension_semantics = [#tpu.dimension_semantics<parallel>, #tpu.dimension_semantics<parallel>, #tpu.dimension_semantics<arbitrary>], iteration_bounds = array<i64: 1, 1, 1>, scalar_prefetch = 0 : i64, scratch_operands = 1 : i64, tpu.core_type = #tpu.core_type<tc>, window_params = [{transform_indices = @transform_0, window_bounds = array<i64: 16, 32>}, {transform_indices = @transform_1, window_bounds = array<i64: 32, 32>}, {transform_indices = @transform_2, window_bounds = array<i64: 1, 32>}, {transform_indices = @transform_3, window_bounds = array<i64: 16, 32>}]} {
    %c0_i32 = arith.constant 0 : i32
    %0 = arith.cmpi eq, %arg2, %c0_i32 : i32
    %1 = arith.extui %0 : i1 to i32
    %c0_i32_0 = arith.constant 0 : i32
    %2 = arith.cmpi ne, %1, %c0_i32_0 : i32
    scf.if %2 {
      %cst_10 = arith.constant 0.000000e+00 : f32
      %12 = vector.broadcast %cst_10 : f32 to vector<16x32xf32>
      %c0_11 = arith.constant 0 : index
      %c0_12 = arith.constant 0 : index
      %13 = vector.load %arg7[%c0_11, %c0_12] : memref<16x32xf32, #tpu.memory_space<vmem>>, vector<16x32xf32>
      tpu.vector_store %arg7[%c0_11, %c0_12], %12 {strides = array<i32>} : memref<16x32xf32, #tpu.memory_space<vmem>>, vector<16x32xf32>,
    } else {
    }
    %c0 = arith.constant 0 : index
    %c0_1 = arith.constant 0 : index
    %3 = vector.load %arg7[%c0, %c0_1] : memref<16x32xf32, #tpu.memory_space<vmem>>, vector<16x32xf32>
    %c0_2 = arith.constant 0 : index
    %c0_3 = arith.constant 0 : index
    %4 = vector.load %arg3[%c0_2, %c0_3] : memref<16x32xf32, #tpu.memory_space<vmem>>, vector<16x32xf32>
    %c0_4 = arith.constant 0 : index
    %c0_5 = arith.constant 0 : index
    %5 = vector.load %arg4[%c0_4, %c0_5] : memref<32x32xf32, #tpu.memory_space<vmem>>, vector<32x32xf32>
    %cst = arith.constant dense<0.000000e+00> : vector<16x32xf32>
    %6 = tpu.matmul %4, %5, %cst {dimension_numbers = #tpu.dot_dimension_numbers<[1], [0], [0], [1], [0, 0, 1, 1], [], []>} : vector<16x32xf32>, vector<32x32xf32>, vector<16x32xf32> -> vector<16x32xf32>
    %7 = arith.addf %3, %6 : vector<16x32xf32>
    %c0_6 = arith.constant 0 : index
    %c0_7 = arith.constant 0 : index
    %8 = vector.load %arg7[%c0_6, %c0_7] : memref<16x32xf32, #tpu.memory_space<vmem>>, vector<16x32xf32>
    tpu.vector_store %arg7[%c0_6, %c0_7], %7 {strides = array<i32>} : memref<16x32xf32, #tpu.memory_space<vmem>>, vector<16x32xf32>,
    %c0_i32_8 = arith.constant 0 : i32
    %9 = arith.cmpi eq, %arg2, %c0_i32_8 : i32
    %10 = arith.extui %9 : i1 to i32
    %c0_i32_9 = arith.constant 0 : i32
    %11 = arith.cmpi ne, %10, %c0_i32_9 : i32
    scf.if %11 {
      %c0_10 = arith.constant 0 : index
      %c0_11 = arith.constant 0 : index
      %12 = vector.load %arg7[%c0_10, %c0_11] : memref<16x32xf32, #tpu.memory_space<vmem>>, vector<16x32xf32>
      %c0_12 = arith.constant 0 : index
      %c0_13 = arith.constant 0 : index
      %13 = vector.load %arg5[%c0_12, %c0_13] : memref<1x32xf32, #tpu.memory_space<vmem>>, vector<1x32xf32>
      %14 = vector.broadcast %13 : vector<1x32xf32> to vector<16x32xf32>
      %15 = arith.addf %12, %14 : vector<16x32xf32>
      %c0_14 = arith.constant 0 : index
      %c0_15 = arith.constant 0 : index
      %16 = vector.load %arg6[%c0_14, %c0_15] : memref<16x32xf32, #tpu.memory_space<vmem>>, vector<16x32xf32>
      tpu.vector_store %arg6[%c0_14, %c0_15], %15 {strides = array<i32>} : memref<16x32xf32, #tpu.memory_space<vmem>>, vector<16x32xf32>,
    } else {
    }
    return
  }
  func.func @transform_0(%arg0: i32, %arg1: i32, %arg2: i32) -> (i32, i32) {
    %c0_i32 = arith.constant 0 : i32
    return %arg0, %arg2 : i32, i32
  }
  func.func @transform_1(%arg0: i32, %arg1: i32, %arg2: i32) -> (i32, i32) {
    %c0_i32 = arith.constant 0 : i32
    return %arg2, %arg1 : i32, i32
  }
  func.func @transform_2(%arg0: i32, %arg1: i32, %arg2: i32) -> (i32, i32) {
    %c0_i32 = arith.constant 0 : i32
    %c0_i32_0 = arith.constant 0 : i32
    return %c0_i32, %arg1 : i32, i32
  }
  func.func @transform_3(%arg0: i32, %arg1: i32, %arg2: i32) -> (i32, i32) {
    %c0_i32 = arith.constant 0 : i32
    return %arg0, %arg1 : i32, i32
  }
}

module attributes {stable_mosaic.version = 11 : i64} {
  func.func @_matmul_bias_kernel(%arg0: i32, %arg1: i32, %arg2: i32, %arg3: memref<16x32xf32, #tpu.memory_space<vmem>>, %arg4: memref<32x64xf32, #tpu.memory_space<vmem>>, %arg5: memref<1x64xf32, #tpu.memory_space<vmem>>, %arg6: memref<16x64xf32, #tpu.memory_space<vmem>>, %arg7: memref<16x64xf32, #tpu.memory_space<vmem>>) attributes {dimension_semantics = [#tpu.dimension_semantics<parallel>, #tpu.dimension_semantics<parallel>, #tpu.dimension_semantics<arbitrary>], iteration_bounds = array<i64: 1, 1, 1>, scalar_prefetch = 0 : i64, scratch_operands = 1 : i64, tpu.core_type = #tpu.core_type<tc>, window_params = [{transform_indices = @transform_0, window_bounds = array<i64: 16, 32>}, {transform_indices = @transform_1, window_bounds = array<i64: 32, 64>}, {transform_indices = @transform_2, window_bounds = array<i64: 1, 64>}, {transform_indices = @transform_3, window_bounds = array<i64: 16, 64>}]} {
    %c0_i32 = arith.constant 0 : i32
    %0 = arith.cmpi eq, %arg2, %c0_i32 : i32
    %1 = arith.extui %0 : i1 to i32
    %c0_i32_0 = arith.constant 0 : i32
    %2 = arith.cmpi ne, %1, %c0_i32_0 : i32
    scf.if %2 {
      %cst_10 = arith.constant 0.000000e+00 : f32
      %12 = vector.broadcast %cst_10 : f32 to vector<16x64xf32>
      %c0_11 = arith.constant 0 : index
      %c0_12 = arith.constant 0 : index
      %13 = vector.load %arg7[%c0_11, %c0_12] : memref<16x64xf32, #tpu.memory_space<vmem>>, vector<16x64xf32>
      tpu.vector_store %arg7[%c0_11, %c0_12], %12 {strides = array<i32>} : memref<16x64xf32, #tpu.memory_space<vmem>>, vector<16x64xf32>,
    } else {
    }
    %c0 = arith.constant 0 : index
    %c0_1 = arith.constant 0 : index
    %3 = vector.load %arg7[%c0, %c0_1] : memref<16x64xf32, #tpu.memory_space<vmem>>, vector<16x64xf32>
    %c0_2 = arith.constant 0 : index
    %c0_3 = arith.constant 0 : index
    %4 = vector.load %arg3[%c0_2, %c0_3] : memref<16x32xf32, #tpu.memory_space<vmem>>, vector<16x32xf32>
    %c0_4 = arith.constant 0 : index
    %c0_5 = arith.constant 0 : index
    %5 = vector.load %arg4[%c0_4, %c0_5] : memref<32x64xf32, #tpu.memory_space<vmem>>, vector<32x64xf32>
    %cst = arith.constant dense<0.000000e+00> : vector<16x64xf32>
    %6 = tpu.matmul %4, %5, %cst {dimension_numbers = #tpu.dot_dimension_numbers<[1], [0], [0], [1], [0, 0, 1, 1], [], []>} : vector<16x32xf32>, vector<32x64xf32>, vector<16x64xf32> -> vector<16x64xf32>
    %7 = arith.addf %3, %6 : vector<16x64xf32>
    %c0_6 = arith.constant 0 : index
    %c0_7 = arith.constant 0 : index
    %8 = vector.load %arg7[%c0_6, %c0_7] : memref<16x64xf32, #tpu.memory_space<vmem>>, vector<16x64xf32>
    tpu.vector_store %arg7[%c0_6, %c0_7], %7 {strides = array<i32>} : memref<16x64xf32, #tpu.memory_space<vmem>>, vector<16x64xf32>,
    %c0_i32_8 = arith.constant 0 : i32
    %9 = arith.cmpi eq, %arg2, %c0_i32_8 : i32
    %10 = arith.extui %9 : i1 to i32
    %c0_i32_9 = arith.constant 0 : i32
    %11 = arith.cmpi ne, %10, %c0_i32_9 : i32
    scf.if %11 {
      %c0_10 = arith.constant 0 : index
      %c0_11 = arith.constant 0 : index
      %12 = vector.load %arg7[%c0_10, %c0_11] : memref<16x64xf32, #tpu.memory_space<vmem>>, vector<16x64xf32>
      %c0_12 = arith.constant 0 : index
      %c0_13 = arith.constant 0 : index
      %13 = vector.load %arg5[%c0_12, %c0_13] : memref<1x64xf32, #tpu.memory_space<vmem>>, vector<1x64xf32>
      %14 = vector.broadcast %13 : vector<1x64xf32> to vector<16x64xf32>
      %15 = arith.addf %12, %14 : vector<16x64xf32>
      %cst_14 = arith.constant 0.000000e+00 : f32
      %16 = vector.broadcast %cst_14 : f32 to vector<16x64xf32>
      %17 = arith.maximumf %15, %16 : vector<16x64xf32>
      %c0_15 = arith.constant 0 : index
      %c0_16 = arith.constant 0 : index
      %18 = vector.load %arg6[%c0_15, %c0_16] : memref<16x64xf32, #tpu.memory_space<vmem>>, vector<16x64xf32>
      tpu.vector_store %arg6[%c0_15, %c0_16], %17 {strides = array<i32>} : memref<16x64xf32, #tpu.memory_space<vmem>>, vector<16x64xf32>,
    } else {
    }
    return
  }
  func.func @transform_0(%arg0: i32, %arg1: i32, %arg2: i32) -> (i32, i32) {
    %c0_i32 = arith.constant 0 : i32
    return %arg0, %arg2 : i32, i32
  }
  func.func @transform_1(%arg0: i32, %arg1: i32, %arg2: i32) -> (i32, i32) {
    %c0_i32 = arith.constant 0 : i32
    return %arg2, %arg1 : i32, i32
  }
  func.func @transform_2(%arg0: i32, %arg1: i32, %arg2: i32) -> (i32, i32) {
    %c0_i32 = arith.constant 0 : i32
    %c0_i32_0 = arith.constant 0 : i32
    return %c0_i32, %arg1 : i32, i32
  }
  func.func @transform_3(%arg0: i32, %arg1: i32, %arg2: i32) -> (i32, i32) {
    %c0_i32 = arith.constant 0 : i32
    return %arg0, %arg1 : i32, i32
  }
}

module attributes {stable_mosaic.version = 11 : i64} {
  func.func @_mha_flash_kernel(%arg0: i32, %arg1: i32, %arg2: i32, %arg3: memref<1x8x32xf32, #tpu.memory_space<vmem>>, %arg4: memref<1x8x64xf32, #tpu.memory_space<vmem>>, %arg5: memref<1x8x32xf32, #tpu.memory_space<vmem>>, %arg6: memref<4x8x1xf32, #tpu.memory_space<vmem>>, %arg7: memref<4x8x1xf32, #tpu.memory_space<vmem>>, %arg8: memref<4x8x8xf32, #tpu.memory_space<vmem>>) attributes {dimension_semantics = [#tpu.dimension_semantics<parallel>, #tpu.dimension_semantics<parallel>, #tpu.dimension_semantics<arbitrary>], iteration_bounds = array<i64: 2, 1, 1>, scalar_prefetch = 0 : i64, scratch_operands = 3 : i64, tpu.core_type = #tpu.core_type<tc>, window_params = [{transform_indices = @transform_0, window_bounds = array<i64: 1, 8, 32>}, {transform_indices = @transform_1, window_bounds = array<i64: 1, 8, 64>}, {transform_indices = @transform_2, window_bounds = array<i64: 1, 8, 32>}]} {
    %c0_i32 = arith.constant 0 : i32
    %0 = arith.cmpi eq, %arg2, %c0_i32 : i32
    %1 = arith.extui %0 : i1 to i32
    %c0_i32_0 = arith.constant 0 : i32
    %2 = arith.cmpi ne, %1, %c0_i32_0 : i32
    scf.if %2 {
      %cst_94 = arith.constant -1.000000e+30 : f32
      %152 = vector.broadcast %cst_94 : f32 to vector<4x8x1xf32>
      %c0_95 = arith.constant 0 : index
      %c0_96 = arith.constant 0 : index
      %c0_97 = arith.constant 0 : index
      %153 = vector.load %arg6[%c0_95, %c0_96, %c0_97] : memref<4x8x1xf32, #tpu.memory_space<vmem>>, vector<4x8x1xf32>
      tpu.vector_store %arg6[%c0_95, %c0_96, %c0_97], %152 {strides = array<i32>} : memref<4x8x1xf32, #tpu.memory_space<vmem>>, vector<4x8x1xf32>,
      %cst_98 = arith.constant 0.000000e+00 : f32
      %154 = vector.broadcast %cst_98 : f32 to vector<4x8x1xf32>
      %c0_99 = arith.constant 0 : index
      %c0_100 = arith.constant 0 : index
      %c0_101 = arith.constant 0 : index
      %155 = vector.load %arg7[%c0_99, %c0_100, %c0_101] : memref<4x8x1xf32, #tpu.memory_space<vmem>>, vector<4x8x1xf32>
      tpu.vector_store %arg7[%c0_99, %c0_100, %c0_101], %154 {strides = array<i32>} : memref<4x8x1xf32, #tpu.memory_space<vmem>>, vector<4x8x1xf32>,
      %cst_102 = arith.constant 0.000000e+00 : f32
      %156 = vector.broadcast %cst_102 : f32 to vector<4x8x8xf32>
      %c0_103 = arith.constant 0 : index
      %c0_104 = arith.constant 0 : index
      %c0_105 = arith.constant 0 : index
      %157 = vector.load %arg8[%c0_103, %c0_104, %c0_105] : memref<4x8x8xf32, #tpu.memory_space<vmem>>, vector<4x8x8xf32>
      tpu.vector_store %arg8[%c0_103, %c0_104, %c0_105], %156 {strides = array<i32>} : memref<4x8x8xf32, #tpu.memory_space<vmem>>, vector<4x8x8xf32>,
    } else {
    }
    %c0 = arith.constant 0 : index
    %c0_1 = arith.constant 0 : index
    %c0_2 = arith.constant 0 : index
    %3 = vector.load %arg3[%c0, %c0_1, %c0_2] : memref<1x8x32xf32, #tpu.memory_space<vmem>>, vector<1x8x32xf32>
    %4 = vector.shape_cast %3 : vector<1x8x32xf32> to vector<8x32xf32>
    %c0_3 = arith.constant 0 : index
    %c0_4 = arith.constant 0 : index
    %c0_5 = arith.constant 0 : index
    %5 = vector.load %arg4[%c0_3, %c0_4, %c0_5] : memref<1x8x64xf32, #tpu.memory_space<vmem>>, vector<1x8x32xf32>
    %6 = vector.shape_cast %5 : vector<1x8x32xf32> to vector<8x32xf32>
    %c0_6 = arith.constant 0 : index
    %c0_7 = arith.constant 0 : index
    %c32 = arith.constant 32 : index
    %7 = vector.load %arg4[%c0_6, %c0_7, %c32] : memref<1x8x64xf32, #tpu.memory_space<vmem>>, vector<1x8x32xf32>
    %8 = vector.shape_cast %7 : vector<1x8x32xf32> to vector<8x32xf32>
    %9 = vector.extract_strided_slice %4 {offsets = [0, 0], sizes = [8, 8], strides = [1, 1]} : vector<8x32xf32> to vector<8x8xf32>
    %10 = vector.extract_strided_slice %6 {offsets = [0, 0], sizes = [8, 8], strides = [1, 1]} : vector<8x32xf32> to vector<8x8xf32>
    %11 = vector.extract_strided_slice %8 {offsets = [0, 0], sizes = [8, 8], strides = [1, 1]} : vector<8x32xf32> to vector<8x8xf32>
    %cst = arith.constant dense<0.000000e+00> : vector<8x8xf32>
    %12 = tpu.matmul %9, %10, %cst {dimension_numbers = #tpu.dot_dimension_numbers<[1], [1], [0], [0], [0, 0, 1, 0], [], []>} : vector<8x8xf32>, vector<8x8xf32>, vector<8x8xf32> -> vector<8x8xf32>
    %c0_8 = arith.constant 0 : index
    %c0_9 = arith.constant 0 : index
    %c0_10 = arith.constant 0 : index
    %13 = vector.load %arg6[%c0_8, %c0_9, %c0_10] : memref<4x8x1xf32, #tpu.memory_space<vmem>>, vector<1x8x1xf32>
    %14 = vector.shape_cast %13 : vector<1x8x1xf32> to vector<8x1xf32>
    %cst_11 = arith.constant dense<0xFF800000> : vector<8xf32>
    %15 = vector.multi_reduction <maximumf>, %12, %cst_11 [1] : vector<8x8xf32> to vector<8xf32>
    %16 = vector.shape_cast %15 : vector<8xf32> to vector<8x1xf32>
    %17 = arith.maximumf %14, %16 : vector<8x1xf32>
    %18 = arith.subf %14, %17 : vector<8x1xf32>
    %19 = math.exp %18 : vector<8x1xf32>
    %20 = vector.broadcast %17 : vector<8x1xf32> to vector<8x8xf32>
    %21 = arith.subf %12, %20 : vector<8x8xf32>
    %22 = math.exp %21 : vector<8x8xf32>
    %c0_12 = arith.constant 0 : index
    %c0_13 = arith.constant 0 : index
    %c0_14 = arith.constant 0 : index
    %23 = vector.load %arg7[%c0_12, %c0_13, %c0_14] : memref<4x8x1xf32, #tpu.memory_space<vmem>>, vector<1x8x1xf32>
    %24 = vector.shape_cast %23 : vector<1x8x1xf32> to vector<8x1xf32>
    %25 = arith.mulf %19, %24 : vector<8x1xf32>
    %cst_15 = arith.constant dense<0.000000e+00> : vector<8xf32>
    %26 = vector.multi_reduction <add>, %22, %cst_15 [1] : vector<8x8xf32> to vector<8xf32>
    %27 = vector.shape_cast %26 : vector<8xf32> to vector<8x1xf32>
    %28 = arith.addf %25, %27 : vector<8x1xf32>
    %c0_16 = arith.constant 0 : index
    %c0_17 = arith.constant 0 : index
    %c0_18 = arith.constant 0 : index
    %29 = vector.load %arg7[%c0_16, %c0_17, %c0_18] : memref<4x8x1xf32, #tpu.memory_space<vmem>>, vector<1x8x1xf32>
    %30 = vector.shape_cast %29 : vector<1x8x1xf32> to vector<8x1xf32>
    %31 = vector.shape_cast %28 : vector<8x1xf32> to vector<1x8x1xf32>
    tpu.vector_store %arg7[%c0_16, %c0_17, %c0_18], %31 {strides = array<i32>} : memref<4x8x1xf32, #tpu.memory_space<vmem>>, vector<1x8x1xf32>,
    %c0_19 = arith.constant 0 : index
    %c0_20 = arith.constant 0 : index
    %c0_21 = arith.constant 0 : index
    %32 = vector.load %arg8[%c0_19, %c0_20, %c0_21] : memref<4x8x8xf32, #tpu.memory_space<vmem>>, vector<1x8x8xf32>
    %33 = vector.shape_cast %32 : vector<1x8x8xf32> to vector<8x8xf32>
    %34 = vector.broadcast %19 : vector<8x1xf32> to vector<8x8xf32>
    %35 = arith.mulf %34, %33 : vector<8x8xf32>
    %cst_22 = arith.constant dense<0.000000e+00> : vector<8x8xf32>
    %36 = tpu.matmul %22, %11, %cst_22 {dimension_numbers = #tpu.dot_dimension_numbers<[1], [0], [0], [1], [0, 0, 1, 1], [], []>} : vector<8x8xf32>, vector<8x8xf32>, vector<8x8xf32> -> vector<8x8xf32>
    %37 = arith.addf %35, %36 : vector<8x8xf32>
    %c0_23 = arith.constant 0 : index
    %c0_24 = arith.constant 0 : index
    %c0_25 = arith.constant 0 : index
    %38 = vector.load %arg8[%c0_23, %c0_24, %c0_25] : memref<4x8x8xf32, #tpu.memory_space<vmem>>, vector<1x8x8xf32>
    %39 = vector.shape_cast %38 : vector<1x8x8xf32> to vector<8x8xf32>
    %40 = vector.shape_cast %37 : vector<8x8xf32> to vector<1x8x8xf32>
    tpu.vector_store %arg8[%c0_23, %c0_24, %c0_25], %40 {strides = array<i32>} : memref<4x8x8xf32, #tpu.memory_space<vmem>>, vector<1x8x8xf32>,
    %c0_26 = arith.constant 0 : index
    %c0_27 = arith.constant 0 : index
    %c0_28 = arith.constant 0 : index
    %41 = vector.load %arg6[%c0_26, %c0_27, %c0_28] : memref<4x8x1xf32, #tpu.memory_space<vmem>>, vector<1x8x1xf32>
    %42 = vector.shape_cast %41 : vector<1x8x1xf32> to vector<8x1xf32>
    %43 = vector.shape_cast %17 : vector<8x1xf32> to vector<1x8x1xf32>
    tpu.vector_store %arg6[%c0_26, %c0_27, %c0_28], %43 {strides = array<i32>} : memref<4x8x1xf32, #tpu.memory_space<vmem>>, vector<1x8x1xf32>,
    %44 = vector.extract_strided_slice %4 {offsets = [0, 8], sizes = [8, 8], strides = [1, 1]} : vector<8x32xf32> to vector<8x8xf32>
    %45 = vector.extract_strided_slice %6 {offsets = [0, 8], sizes = [8, 8], strides = [1, 1]} : vector<8x32xf32> to vector<8x8xf32>
    %46 = vector.extract_strided_slice %8 {offsets = [0, 8], sizes = [8, 8], strides = [1, 1]} : vector<8x32xf32> to vector<8x8xf32>
    %cst_29 = arith.constant dense<0.000000e+00> : vector<8x8xf32>
    %47 = tpu.matmul %44, %45, %cst_29 {dimension_numbers = #tpu.dot_dimension_numbers<[1], [1], [0], [0], [0, 0, 1, 0], [], []>} : vector<8x8xf32>, vector<8x8xf32>, vector<8x8xf32> -> vector<8x8xf32>
    %c1 = arith.constant 1 : index
    %c0_30 = arith.constant 0 : index
    %c0_31 = arith.constant 0 : index
    %48 = vector.load %arg6[%c1, %c0_30, %c0_31] : memref<4x8x1xf32, #tpu.memory_space<vmem>>, vector<1x8x1xf32>
    %49 = vector.shape_cast %48 : vector<1x8x1xf32> to vector<8x1xf32>
    %cst_32 = arith.constant dense<0xFF800000> : vector<8xf32>
    %50 = vector.multi_reduction <maximumf>, %47, %cst_32 [1] : vector<8x8xf32> to vector<8xf32>
    %51 = vector.shape_cast %50 : vector<8xf32> to vector<8x1xf32>
    %52 = arith.maximumf %49, %51 : vector<8x1xf32>
    %53 = arith.subf %49, %52 : vector<8x1xf32>
    %54 = math.exp %53 : vector<8x1xf32>
    %55 = vector.broadcast %52 : vector<8x1xf32> to vector<8x8xf32>
    %56 = arith.subf %47, %55 : vector<8x8xf32>
    %57 = math.exp %56 : vector<8x8xf32>
    %c1_33 = arith.constant 1 : index
    %c0_34 = arith.constant 0 : index
    %c0_35 = arith.constant 0 : index
    %58 = vector.load %arg7[%c1_33, %c0_34, %c0_35] : memref<4x8x1xf32, #tpu.memory_space<vmem>>, vector<1x8x1xf32>
    %59 = vector.shape_cast %58 : vector<1x8x1xf32> to vector<8x1xf32>
    %60 = arith.mulf %54, %59 : vector<8x1xf32>
    %cst_36 = arith.constant dense<0.000000e+00> : vector<8xf32>
    %61 = vector.multi_reduction <add>, %57, %cst_36 [1] : vector<8x8xf32> to vector<8xf32>
    %62 = vector.shape_cast %61 : vector<8xf32> to vector<8x1xf32>
    %63 = arith.addf %60, %62 : vector<8x1xf32>
    %c1_37 = arith.constant 1 : index
    %c0_38 = arith.constant 0 : index
    %c0_39 = arith.constant 0 : index
    %64 = vector.load %arg7[%c1_37, %c0_38, %c0_39] : memref<4x8x1xf32, #tpu.memory_space<vmem>>, vector<1x8x1xf32>
    %65 = vector.shape_cast %64 : vector<1x8x1xf32> to vector<8x1xf32>
    %66 = vector.shape_cast %63 : vector<8x1xf32> to vector<1x8x1xf32>
    tpu.vector_store %arg7[%c1_37, %c0_38, %c0_39], %66 {strides = array<i32>} : memref<4x8x1xf32, #tpu.memory_space<vmem>>, vector<1x8x1xf32>,
    %c1_40 = arith.constant 1 : index
    %c0_41 = arith.constant 0 : index
    %c0_42 = arith.constant 0 : index
    %67 = vector.load %arg8[%c1_40, %c0_41, %c0_42] : memref<4x8x8xf32, #tpu.memory_space<vmem>>, vector<1x8x8xf32>
    %68 = vector.shape_cast %67 : vector<1x8x8xf32> to vector<8x8xf32>
    %69 = vector.broadcast %54 : vector<8x1xf32> to vector<8x8xf32>
    %70 = arith.mulf %69, %68 : vector<8x8xf32>
    %cst_43 = arith.constant dense<0.000000e+00> : vector<8x8xf32>
    %71 = tpu.matmul %57, %46, %cst_43 {dimension_numbers = #tpu.dot_dimension_numbers<[1], [0], [0], [1], [0, 0, 1, 1], [], []>} : vector<8x8xf32>, vector<8x8xf32>, vector<8x8xf32> -> vector<8x8xf32>
    %72 = arith.addf %70, %71 : vector<8x8xf32>
    %c1_44 = arith.constant 1 : index
    %c0_45 = arith.constant 0 : index
    %c0_46 = arith.constant 0 : index
    %73 = vector.load %arg8[%c1_44, %c0_45, %c0_46] : memref<4x8x8xf32, #tpu.memory_space<vmem>>, vector<1x8x8xf32>
    %74 = vector.shape_cast %73 : vector<1x8x8xf32> to vector<8x8xf32>
    %75 = vector.shape_cast %72 : vector<8x8xf32> to vector<1x8x8xf32>
    tpu.vector_store %arg8[%c1_44, %c0_45, %c0_46], %75 {strides = array<i32>} : memref<4x8x8xf32, #tpu.memory_space<vmem>>, vector<1x8x8xf32>,
    %c1_47 = arith.constant 1 : index
    %c0_48 = arith.constant 0 : index
    %c0_49 = arith.constant 0 : index
    %76 = vector.load %arg6[%c1_47, %c0_48, %c0_49] : memref<4x8x1xf32, #tpu.memory_space<vmem>>, vector<1x8x1xf32>
    %77 = vector.shape_cast %76 : vector<1x8x1xf32> to vector<8x1xf32>
    %78 = vector.shape_cast %52 : vector<8x1xf32> to vector<1x8x1xf32>
    tpu.vector_store %arg6[%c1_47, %c0_48, %c0_49], %78 {strides = array<i32>} : memref<4x8x1xf32, #tpu.memory_space<vmem>>, vector<1x8x1xf32>,
    %79 = vector.extract_strided_slice %4 {offsets = [0, 16], sizes = [8, 8], strides = [1, 1]} : vector<8x32xf32> to vector<8x8xf32>
    %80 = vector.extract_strided_slice %6 {offsets = [0, 16], sizes = [8, 8], strides = [1, 1]} : vector<8x32xf32> to vector<8x8xf32>
    %81 = vector.extract_strided_slice %8 {offsets = [0, 16], sizes = [8, 8], strides = [1, 1]} : vector<8x32xf32> to vector<8x8xf32>
    %cst_50 = arith.constant dense<0.000000e+00> : vector<8x8xf32>
    %82 = tpu.matmul %79, %80, %cst_50 {dimension_numbers = #tpu.dot_dimension_numbers<[1], [1], [0], [0], [0, 0, 1, 0], [], []>} : vector<8x8xf32>, vector<8x8xf32>, vector<8x8xf32> -> vector<8x8xf32>
    %c2 = arith.constant 2 : index
    %c0_51 = arith.constant 0 : index
    %c0_52 = arith.constant 0 : index
    %83 = vector.load %arg6[%c2, %c0_51, %c0_52] : memref<4x8x1xf32, #tpu.memory_space<vmem>>, vector<1x8x1xf32>
    %84 = vector.shape_cast %83 : vector<1x8x1xf32> to vector<8x1xf32>
    %cst_53 = arith.constant dense<0xFF800000> : vector<8xf32>
    %85 = vector.multi_reduction <maximumf>, %82, %cst_53 [1] : vector<8x8xf32> to vector<8xf32>
    %86 = vector.shape_cast %85 : vector<8xf32> to vector<8x1xf32>
    %87 = arith.maximumf %84, %86 : vector<8x1xf32>
    %88 = arith.subf %84, %87 : vector<8x1xf32>
    %89 = math.exp %88 : vector<8x1xf32>
    %90 = vector.broadcast %87 : vector<8x1xf32> to vector<8x8xf32>
    %91 = arith.subf %82, %90 : vector<8x8xf32>
    %92 = math.exp %91 : vector<8x8xf32>
    %c2_54 = arith.constant 2 : index
    %c0_55 = arith.constant 0 : index
    %c0_56 = arith.constant 0 : index
    %93 = vector.load %arg7[%c2_54, %c0_55, %c0_56] : memref<4x8x1xf32, #tpu.memory_space<vmem>>, vector<1x8x1xf32>
    %94 = vector.shape_cast %93 : vector<1x8x1xf32> to vector<8x1xf32>
    %95 = arith.mulf %89, %94 : vector<8x1xf32>
    %cst_57 = arith.constant dense<0.000000e+00> : vector<8xf32>
    %96 = vector.multi_reduction <add>, %92, %cst_57 [1] : vector<8x8xf32> to vector<8xf32>
    %97 = vector.shape_cast %96 : vector<8xf32> to vector<8x1xf32>
    %98 = arith.addf %95, %97 : vector<8x1xf32>
    %c2_58 = arith.constant 2 : index
    %c0_59 = arith.constant 0 : index
    %c0_60 = arith.constant 0 : index
    %99 = vector.load %arg7[%c2_58, %c0_59, %c0_60] : memref<4x8x1xf32, #tpu.memory_space<vmem>>, vector<1x8x1xf32>
    %100 = vector.shape_cast %99 : vector<1x8x1xf32> to vector<8x1xf32>
    %101 = vector.shape_cast %98 : vector<8x1xf32> to vector<1x8x1xf32>
    tpu.vector_store %arg7[%c2_58, %c0_59, %c0_60], %101 {strides = array<i32>} : memref<4x8x1xf32, #tpu.memory_space<vmem>>, vector<1x8x1xf32>,
    %c2_61 = arith.constant 2 : index
    %c0_62 = arith.constant 0 : index
    %c0_63 = arith.constant 0 : index
    %102 = vector.load %arg8[%c2_61, %c0_62, %c0_63] : memref<4x8x8xf32, #tpu.memory_space<vmem>>, vector<1x8x8xf32>
    %103 = vector.shape_cast %102 : vector<1x8x8xf32> to vector<8x8xf32>
    %104 = vector.broadcast %89 : vector<8x1xf32> to vector<8x8xf32>
    %105 = arith.mulf %104, %103 : vector<8x8xf32>
    %cst_64 = arith.constant dense<0.000000e+00> : vector<8x8xf32>
    %106 = tpu.matmul %92, %81, %cst_64 {dimension_numbers = #tpu.dot_dimension_numbers<[1], [0], [0], [1], [0, 0, 1, 1], [], []>} : vector<8x8xf32>, vector<8x8xf32>, vector<8x8xf32> -> vector<8x8xf32>
    %107 = arith.addf %105, %106 : vector<8x8xf32>
    %c2_65 = arith.constant 2 : index
    %c0_66 = arith.constant 0 : index
    %c0_67 = arith.constant 0 : index
    %108 = vector.load %arg8[%c2_65, %c0_66, %c0_67] : memref<4x8x8xf32, #tpu.memory_space<vmem>>, vector<1x8x8xf32>
    %109 = vector.shape_cast %108 : vector<1x8x8xf32> to vector<8x8xf32>
    %110 = vector.shape_cast %107 : vector<8x8xf32> to vector<1x8x8xf32>
    tpu.vector_store %arg8[%c2_65, %c0_66, %c0_67], %110 {strides = array<i32>} : memref<4x8x8xf32, #tpu.memory_space<vmem>>, vector<1x8x8xf32>,
    %c2_68 = arith.constant 2 : index
    %c0_69 = arith.constant 0 : index
    %c0_70 = arith.constant 0 : index
    %111 = vector.load %arg6[%c2_68, %c0_69, %c0_70] : memref<4x8x1xf32, #tpu.memory_space<vmem>>, vector<1x8x1xf32>
    %112 = vector.shape_cast %111 : vector<1x8x1xf32> to vector<8x1xf32>
    %113 = vector.shape_cast %87 : vector<8x1xf32> to vector<1x8x1xf32>
    tpu.vector_store %arg6[%c2_68, %c0_69, %c0_70], %113 {strides = array<i32>} : memref<4x8x1xf32, #tpu.memory_space<vmem>>, vector<1x8x1xf32>,
    %114 = vector.extract_strided_slice %4 {offsets = [0, 24], sizes = [8, 8], strides = [1, 1]} : vector<8x32xf32> to vector<8x8xf32>
    %115 = vector.extract_strided_slice %6 {offsets = [0, 24], sizes = [8, 8], strides = [1, 1]} : vector<8x32xf32> to vector<8x8xf32>
    %116 = vector.extract_strided_slice %8 {offsets = [0, 24], sizes = [8, 8], strides = [1, 1]} : vector<8x32xf32> to vector<8x8xf32>
    %cst_71 = arith.constant dense<0.000000e+00> : vector<8x8xf32>
    %117 = tpu.matmul %114, %115, %cst_71 {dimension_numbers = #tpu.dot_dimension_numbers<[1], [1], [0], [0], [0, 0, 1, 0], [], []>} : vector<8x8xf32>, vector<8x8xf32>, vector<8x8xf32> -> vector<8x8xf32>
    %c3 = arith.constant 3 : index
    %c0_72 = arith.constant 0 : index
    %c0_73 = arith.constant 0 : index
    %118 = vector.load %arg6[%c3, %c0_72, %c0_73] : memref<4x8x1xf32, #tpu.memory_space<vmem>>, vector<1x8x1xf32>
    %119 = vector.shape_cast %118 : vector<1x8x1xf32> to vector<8x1xf32>
    %cst_74 = arith.constant dense<0xFF800000> : vector<8xf32>
    %120 = vector.multi_reduction <maximumf>, %117, %cst_74 [1] : vector<8x8xf32> to vector<8xf32>
    %121 = vector.shape_cast %120 : vector<8xf32> to vector<8x1xf32>
    %122 = arith.maximumf %119, %121 : vector<8x1xf32>
    %123 = arith.subf %119, %122 : vector<8x1xf32>
    %124 = math.exp %123 : vector<8x1xf32>
    %125 = vector.broadcast %122 : vector<8x1xf32> to vector<8x8xf32>
    %126 = arith.subf %117, %125 : vector<8x8xf32>
    %127 = math.exp %126 : vector<8x8xf32>
    %c3_75 = arith.constant 3 : index
    %c0_76 = arith.constant 0 : index
    %c0_77 = arith.constant 0 : index
    %128 = vector.load %arg7[%c3_75, %c0_76, %c0_77] : memref<4x8x1xf32, #tpu.memory_space<vmem>>, vector<1x8x1xf32>
    %129 = vector.shape_cast %128 : vector<1x8x1xf32> to vector<8x1xf32>
    %130 = arith.mulf %124, %129 : vector<8x1xf32>
    %cst_78 = arith.constant dense<0.000000e+00> : vector<8xf32>
    %131 = vector.multi_reduction <add>, %127, %cst_78 [1] : vector<8x8xf32> to vector<8xf32>
    %132 = vector.shape_cast %131 : vector<8xf32> to vector<8x1xf32>
    %133 = arith.addf %130, %132 : vector<8x1xf32>
    %c3_79 = arith.constant 3 : index
    %c0_80 = arith.constant 0 : index
    %c0_81 = arith.constant 0 : index
    %134 = vector.load %arg7[%c3_79, %c0_80, %c0_81] : memref<4x8x1xf32, #tpu.memory_space<vmem>>, vector<1x8x1xf32>
    %135 = vector.shape_cast %134 : vector<1x8x1xf32> to vector<8x1xf32>
    %136 = vector.shape_cast %133 : vector<8x1xf32> to vector<1x8x1xf32>
    tpu.vector_store %arg7[%c3_79, %c0_80, %c0_81], %136 {strides = array<i32>} : memref<4x8x1xf32, #tpu.memory_space<vmem>>, vector<1x8x1xf32>,
    %c3_82 = arith.constant 3 : index
    %c0_83 = arith.constant 0 : index
    %c0_84 = arith.constant 0 : index
    %137 = vector.load %arg8[%c3_82, %c0_83, %c0_84] : memref<4x8x8xf32, #tpu.memory_space<vmem>>, vector<1x8x8xf32>
    %138 = vector.shape_cast %137 : vector<1x8x8xf32> to vector<8x8xf32>
    %139 = vector.broadcast %124 : vector<8x1xf32> to vector<8x8xf32>
    %140 = arith.mulf %139, %138 : vector<8x8xf32>
    %cst_85 = arith.constant dense<0.000000e+00> : vector<8x8xf32>
    %141 = tpu.matmul %127, %116, %cst_85 {dimension_numbers = #tpu.dot_dimension_numbers<[1], [0], [0], [1], [0, 0, 1, 1], [], []>} : vector<8x8xf32>, vector<8x8xf32>, vector<8x8xf32> -> vector<8x8xf32>
    %142 = arith.addf %140, %141 : vector<8x8xf32>
    %c3_86 = arith.constant 3 : index
    %c0_87 = arith.constant 0 : index
    %c0_88 = arith.constant 0 : index
    %143 = vector.load %arg8[%c3_86, %c0_87, %c0_88] : memref<4x8x8xf32, #tpu.memory_space<vmem>>, vector<1x8x8xf32>
    %144 = vector.shape_cast %143 : vector<1x8x8xf32> to vector<8x8xf32>
    %145 = vector.shape_cast %142 : vector<8x8xf32> to vector<1x8x8xf32>
    tpu.vector_store %arg8[%c3_86, %c0_87, %c0_88], %145 {strides = array<i32>} : memref<4x8x8xf32, #tpu.memory_space<vmem>>, vector<1x8x8xf32>,
    %c3_89 = arith.constant 3 : index
    %c0_90 = arith.constant 0 : index
    %c0_91 = arith.constant 0 : index
    %146 = vector.load %arg6[%c3_89, %c0_90, %c0_91] : memref<4x8x1xf32, #tpu.memory_space<vmem>>, vector<1x8x1xf32>
    %147 = vector.shape_cast %146 : vector<1x8x1xf32> to vector<8x1xf32>
    %148 = vector.shape_cast %122 : vector<8x1xf32> to vector<1x8x1xf32>
    tpu.vector_store %arg6[%c3_89, %c0_90, %c0_91], %148 {strides = array<i32>} : memref<4x8x1xf32, #tpu.memory_space<vmem>>, vector<1x8x1xf32>,
    %c0_i32_92 = arith.constant 0 : i32
    %149 = arith.cmpi eq, %arg2, %c0_i32_92 : i32
    %150 = arith.extui %149 : i1 to i32
    %c0_i32_93 = arith.constant 0 : i32
    %151 = arith.cmpi ne, %150, %c0_i32_93 : i32
    scf.if %151 {
      %c0_94 = arith.constant 0 : index
      %c0_95 = arith.constant 0 : index
      %c0_96 = arith.constant 0 : index
      %152 = vector.load %arg7[%c0_94, %c0_95, %c0_96] : memref<4x8x1xf32, #tpu.memory_space<vmem>>, vector<1x8x1xf32>
      %153 = vector.shape_cast %152 : vector<1x8x1xf32> to vector<8x1xf32>
      %154 = tpu.reciprocal %153 {approx = true} : vector<8x1xf32> -> vector<8x1xf32>
      %c0_97 = arith.constant 0 : index
      %c0_98 = arith.constant 0 : index
      %c0_99 = arith.constant 0 : index
      %155 = vector.load %arg8[%c0_97, %c0_98, %c0_99] : memref<4x8x8xf32, #tpu.memory_space<vmem>>, vector<1x8x8xf32>
      %156 = vector.shape_cast %155 : vector<1x8x8xf32> to vector<8x8xf32>
      %157 = vector.broadcast %154 : vector<8x1xf32> to vector<8x8xf32>
      %158 = arith.mulf %156, %157 : vector<8x8xf32>
      %c0_100 = arith.constant 0 : index
      %c0_101 = arith.constant 0 : index
      %c0_102 = arith.constant 0 : index
      %159 = vector.load %arg5[%c0_100, %c0_101, %c0_102] : memref<1x8x32xf32, #tpu.memory_space<vmem>>, vector<1x8x8xf32>
      %160 = vector.shape_cast %159 : vector<1x8x8xf32> to vector<8x8xf32>
      %161 = vector.shape_cast %158 : vector<8x8xf32> to vector<1x8x8xf32>
      tpu.vector_store %arg5[%c0_100, %c0_101, %c0_102], %161 {strides = array<i32>} : memref<1x8x32xf32, #tpu.memory_space<vmem>>, vector<1x8x8xf32>,
      %c1_103 = arith.constant 1 : index
      %c0_104 = arith.constant 0 : index
      %c0_105 = arith.constant 0 : index
      %162 = vector.load %arg7[%c1_103, %c0_104, %c0_105] : memref<4x8x1xf32, #tpu.memory_space<vmem>>, vector<1x8x1xf32>
      %163 = vector.shape_cast %162 : vector<1x8x1xf32> to vector<8x1xf32>
      %164 = tpu.reciprocal %163 {approx = true} : vector<8x1xf32> -> vector<8x1xf32>
      %c1_106 = arith.constant 1 : index
      %c0_107 = arith.constant 0 : index
      %c0_108 = arith.constant 0 : index
      %165 = vector.load %arg8[%c1_106, %c0_107, %c0_108] : memref<4x8x8xf32, #tpu.memory_space<vmem>>, vector<1x8x8xf32>
      %166 = vector.shape_cast %165 : vector<1x8x8xf32> to vector<8x8xf32>
      %167 = vector.broadcast %164 : vector<8x1xf32> to vector<8x8xf32>
      %168 = arith.mulf %166, %167 : vector<8x8xf32>
      %c0_109 = arith.constant 0 : index
      %c0_110 = arith.constant 0 : index
      %c8 = arith.constant 8 : index
      %169 = vector.load %arg5[%c0_109, %c0_110, %c8] : memref<1x8x32xf32, #tpu.memory_space<vmem>>, vector<1x8x8xf32>
      %170 = vector.shape_cast %169 : vector<1x8x8xf32> to vector<8x8xf32>
      %171 = vector.shape_cast %168 : vector<8x8xf32> to vector<1x8x8xf32>
      tpu.vector_store %arg5[%c0_109, %c0_110, %c8], %171 {strides = array<i32>} : memref<1x8x32xf32, #tpu.memory_space<vmem>>, vector<1x8x8xf32>,
      %c2_111 = arith.constant 2 : index
      %c0_112 = arith.constant 0 : index
      %c0_113 = arith.constant 0 : index
      %172 = vector.load %arg7[%c2_111, %c0_112, %c0_113] : memref<4x8x1xf32, #tpu.memory_space<vmem>>, vector<1x8x1xf32>
      %173 = vector.shape_cast %172 : vector<1x8x1xf32> to vector<8x1xf32>
      %174 = tpu.reciprocal %173 {approx = true} : vector<8x1xf32> -> vector<8x1xf32>
      %c2_114 = arith.constant 2 : index
      %c0_115 = arith.constant 0 : index
      %c0_116 = arith.constant 0 : index
      %175 = vector.load %arg8[%c2_114, %c0_115, %c0_116] : memref<4x8x8xf32, #tpu.memory_space<vmem>>, vector<1x8x8xf32>
      %176 = vector.shape_cast %175 : vector<1x8x8xf32> to vector<8x8xf32>
      %177 = vector.broadcast %174 : vector<8x1xf32> to vector<8x8xf32>
      %178 = arith.mulf %176, %177 : vector<8x8xf32>
      %c0_117 = arith.constant 0 : index
      %c0_118 = arith.constant 0 : index
      %c16 = arith.constant 16 : index
      %179 = vector.load %arg5[%c0_117, %c0_118, %c16] : memref<1x8x32xf32, #tpu.memory_space<vmem>>, vector<1x8x8xf32>
      %180 = vector.shape_cast %179 : vector<1x8x8xf32> to vector<8x8xf32>
      %181 = vector.shape_cast %178 : vector<8x8xf32> to vector<1x8x8xf32>
      tpu.vector_store %arg5[%c0_117, %c0_118, %c16], %181 {strides = array<i32>} : memref<1x8x32xf32, #tpu.memory_space<vmem>>, vector<1x8x8xf32>,
      %c3_119 = arith.constant 3 : index
      %c0_120 = arith.constant 0 : index
      %c0_121 = arith.constant 0 : index
      %182 = vector.load %arg7[%c3_119, %c0_120, %c0_121] : memref<4x8x1xf32, #tpu.memory_space<vmem>>, vector<1x8x1xf32>
      %183 = vector.shape_cast %182 : vector<1x8x1xf32> to vector<8x1xf32>
      %184 = tpu.reciprocal %183 {approx = true} : vector<8x1xf32> -> vector<8x1xf32>
      %c3_122 = arith.constant 3 : index
      %c0_123 = arith.constant 0 : index
      %c0_124 = arith.constant 0 : index
      %185 = vector.load %arg8[%c3_122, %c0_123, %c0_124] : memref<4x8x8xf32, #tpu.memory_space<vmem>>, vector<1x8x8xf32>
      %186 = vector.shape_cast %185 : vector<1x8x8xf32> to vector<8x8xf32>
      %187 = vector.broadcast %184 : vector<8x1xf32> to vector<8x8xf32>
      %188 = arith.mulf %186, %187 : vector<8x8xf32>
      %c0_125 = arith.constant 0 : index
      %c0_126 = arith.constant 0 : index
      %c24 = arith.constant 24 : index
      %189 = vector.load %arg5[%c0_125, %c0_126, %c24] : memref<1x8x32xf32, #tpu.memory_space<vmem>>, vector<1x8x8xf32>
      %190 = vector.shape_cast %189 : vector<1x8x8xf32> to vector<8x8xf32>
      %191 = vector.shape_cast %188 : vector<8x8xf32> to vector<1x8x8xf32>
      tpu.vector_store %arg5[%c0_125, %c0_126, %c24], %191 {strides = array<i32>} : memref<1x8x32xf32, #tpu.memory_space<vmem>>, vector<1x8x8xf32>,
    } else {
    }
    return
  }
  func.func @transform_0(%arg0: i32, %arg1: i32, %arg2: i32) -> (i32, i32, i32) {
    %c0_i32 = arith.constant 0 : i32
    %c0_i32_0 = arith.constant 0 : i32
    return %arg0, %arg1, %c0_i32 : i32, i32, i32
  }
  func.func @transform_1(%arg0: i32, %arg1: i32, %arg2: i32) -> (i32, i32, i32) {
    %c0_i32 = arith.constant 0 : i32
    %c0_i32_0 = arith.constant 0 : i32
    return %arg0, %arg2, %c0_i32 : i32, i32, i32
  }
  func.func @transform_2(%arg0: i32, %arg1: i32, %arg2: i32) -> (i32, i32, i32) {
    %c0_i32 = arith.constant 0 : i32
    %c0_i32_0 = arith.constant 0 : i32
    return %arg0, %arg1, %c0_i32 : i32, i32, i32
  }
}

module attributes {stable_mosaic.version = 11 : i64} {
  func.func @_matmul_bias_add_ln_kernel(%arg0: i32, %arg1: i32, %arg2: memref<16x64xf32, #tpu.memory_space<vmem>>, %arg3: memref<64x32xf32, #tpu.memory_space<vmem>>, %arg4: memref<1x32xf32, #tpu.memory_space<vmem>>, %arg5: memref<16x32xf32, #tpu.memory_space<vmem>>, %arg6: memref<1x32xf32, #tpu.memory_space<vmem>>, %arg7: memref<1x32xf32, #tpu.memory_space<vmem>>, %arg8: memref<16x32xf32, #tpu.memory_space<vmem>>, %arg9: memref<16x32xf32, #tpu.memory_space<vmem>>) attributes {dimension_semantics = [#tpu.dimension_semantics<parallel>, #tpu.dimension_semantics<arbitrary>], iteration_bounds = array<i64: 1, 1>, scalar_prefetch = 0 : i64, scratch_operands = 1 : i64, tpu.core_type = #tpu.core_type<tc>, window_params = [{transform_indices = @transform_0, window_bounds = array<i64: 16, 64>}, {transform_indices = @transform_1, window_bounds = array<i64: 64, 32>}, {pipeline_mode = #tpu.pipeline_mode<synchronous>, transform_indices = @transform_2, window_bounds = array<i64: 1, 32>}, {transform_indices = @transform_3, window_bounds = array<i64: 16, 32>}, {pipeline_mode = #tpu.pipeline_mode<synchronous>, transform_indices = @transform_4, window_bounds = array<i64: 1, 32>}, {pipeline_mode = #tpu.pipeline_mode<synchronous>, transform_indices = @transform_5, window_bounds = array<i64: 1, 32>}, {transform_indices = @transform_6, window_bounds = array<i64: 16, 32>}]} {
    %c0_i32 = arith.constant 0 : i32
    %0 = arith.cmpi eq, %arg1, %c0_i32 : i32
    %1 = arith.extui %0 : i1 to i32
    %c0_i32_0 = arith.constant 0 : i32
    %2 = arith.cmpi ne, %1, %c0_i32_0 : i32
    scf.if %2 {
      %cst_10 = arith.constant 0.000000e+00 : f32
      %12 = vector.broadcast %cst_10 : f32 to vector<16x32xf32>
      %c0_11 = arith.constant 0 : index
      %c0_12 = arith.constant 0 : index
      %13 = vector.load %arg9[%c0_11, %c0_12] : memref<16x32xf32, #tpu.memory_space<vmem>>, vector<16x32xf32>
      tpu.vector_store %arg9[%c0_11, %c0_12], %12 {strides = array<i32>} : memref<16x32xf32, #tpu.memory_space<vmem>>, vector<16x32xf32>,
    } else {
    }
    %c0 = arith.constant 0 : index
    %c0_1 = arith.constant 0 : index
    %3 = vector.load %arg9[%c0, %c0_1] : memref<16x32xf32, #tpu.memory_space<vmem>>, vector<16x32xf32>
    %c0_2 = arith.constant 0 : index
    %c0_3 = arith.constant 0 : index
    %4 = vector.load %arg2[%c0_2, %c0_3] : memref<16x64xf32, #tpu.memory_space<vmem>>, vector<16x64xf32>
    %c0_4 = arith.constant 0 : index
    %c0_5 = arith.constant 0 : index
    %5 = vector.load %arg3[%c0_4, %c0_5] : memref<64x32xf32, #tpu.memory_space<vmem>>, vector<64x32xf32>
    %cst = arith.constant dense<0.000000e+00> : vector<16x32xf32>
    %6 = tpu.matmul %4, %5, %cst {dimension_numbers = #tpu.dot_dimension_numbers<[1], [0], [0], [1], [0, 0, 1, 1], [], []>} : vector<16x64xf32>, vector<64x32xf32>, vector<16x32xf32> -> vector<16x32xf32>
    %7 = arith.addf %3, %6 : vector<16x32xf32>
    %c0_6 = arith.constant 0 : index
    %c0_7 = arith.constant 0 : index
    %8 = vector.load %arg9[%c0_6, %c0_7] : memref<16x32xf32, #tpu.memory_space<vmem>>, vector<16x32xf32>
    tpu.vector_store %arg9[%c0_6, %c0_7], %7 {strides = array<i32>} : memref<16x32xf32, #tpu.memory_space<vmem>>, vector<16x32xf32>,
    %c0_i32_8 = arith.constant 0 : i32
    %9 = arith.cmpi eq, %arg1, %c0_i32_8 : i32
    %10 = arith.extui %9 : i1 to i32
    %c0_i32_9 = arith.constant 0 : i32
    %11 = arith.cmpi ne, %10, %c0_i32_9 : i32
    scf.if %11 {
      %c0_10 = arith.constant 0 : index
      %c0_11 = arith.constant 0 : index
      %12 = vector.load %arg9[%c0_10, %c0_11] : memref<16x32xf32, #tpu.memory_space<vmem>>, vector<16x32xf32>
      %c0_12 = arith.constant 0 : index
      %c0_13 = arith.constant 0 : index
      %13 = vector.load %arg4[%c0_12, %c0_13] : memref<1x32xf32, #tpu.memory_space<vmem>>, vector<1x32xf32>
      %14 = vector.broadcast %13 : vector<1x32xf32> to vector<16x32xf32>
      %15 = arith.addf %12, %14 : vector<16x32xf32>
      %c0_14 = arith.constant 0 : index
      %c0_15 = arith.constant 0 : index
      %16 = vector.load %arg5[%c0_14, %c0_15] : memref<16x32xf32, #tpu.memory_space<vmem>>, vector<16x32xf32>
      %17 = arith.addf %15, %16 : vector<16x32xf32>
      %cst_16 = arith.constant dense<0.000000e+00> : vector<16xf32>
      %18 = vector.multi_reduction <add>, %17, %cst_16 [1] : vector<16x32xf32> to vector<16xf32>
      %19 = vector.shape_cast %18 : vector<16xf32> to vector<16x1xf32>
      %cst_17 = arith.constant 3.200000e+01 : f32
      %20 = vector.broadcast %cst_17 : f32 to vector<16x1xf32>
      %21 = arith.divf %19, %20 : vector<16x1xf32>
      %22 = vector.broadcast %21 : vector<16x1xf32> to vector<16x32xf32>
      %23 = arith.subf %17, %22 : vector<16x32xf32>
      %24 = arith.mulf %23, %23 : vector<16x32xf32>
      %cst_18 = arith.constant dense<0.000000e+00> : vector<16xf32>
      %25 = vector.multi_reduction <add>, %24, %cst_18 [1] : vector<16x32xf32> to vector<16xf32>
      %26 = vector.shape_cast %25 : vector<16xf32> to vector<16x1xf32>
      %cst_19 = arith.constant 3.200000e+01 : f32
      %27 = vector.broadcast %cst_19 : f32 to vector<16x1xf32>
      %28 = arith.divf %26, %27 : vector<16x1xf32>
      %cst_20 = arith.constant 9.99999974E-6 : f32
      %29 = vector.broadcast %cst_20 : f32 to vector<16x1xf32>
      %30 = arith.addf %28, %29 : vector<16x1xf32>
      %31 = math.rsqrt %30 : vector<16x1xf32>
      %32 = vector.broadcast %31 : vector<16x1xf32> to vector<16x32xf32>
      %33 = arith.mulf %23, %32 : vector<16x32xf32>
      %c0_21 = arith.constant 0 : index
      %c0_22 = arith.constant 0 : index
      %34 = vector.load %arg6[%c0_21, %c0_22] : memref<1x32xf32, #tpu.memory_space<vmem>>, vector<1x32xf32>
      %35 = vector.broadcast %34 : vector<1x32xf32> to vector<16x32xf32>
      %36 = arith.mulf %33, %35 : vector<16x32xf32>
      %c0_23 = arith.constant 0 : index
      %c0_24 = arith.constant 0 : index
      %37 = vector.load %arg7[%c0_23, %c0_24] : memref<1x32xf32, #tpu.memory_space<vmem>>, vector<1x32xf32>
      %38 = vector.broadcast %37 : vector<1x32xf32> to vector<16x32xf32>
      %39 = arith.addf %36, %38 : vector<16x32xf32>
      %c0_25 = arith.constant 0 : index
      %c0_26 = arith.constant 0 : index
      %40 = vector.load %arg8[%c0_25, %c0_26] : memref<16x32xf32, #tpu.memory_space<vmem>>, vector<16x32xf32>
      tpu.vector_store %arg8[%c0_25, %c0_26], %39 {strides = array<i32>} : memref<16x32xf32, #tpu.memory_space<vmem>>, vector<16x32xf32>,
    } else {
    }
    return
  }
  func.func @transform_0(%arg0: i32, %arg1: i32) -> (i32, i32) {
    %c0_i32 = arith.constant 0 : i32
    return %arg0, %arg1 : i32, i32
  }
  func.func @transform_1(%arg0: i32, %arg1: i32) -> (i32, i32) {
    %c0_i32 = arith.constant 0 : i32
    %c0_i32_0 = arith.constant 0 : i32
    return %arg1, %c0_i32 : i32, i32
  }
  func.func @transform_2(%arg0: i32, %arg1: i32) -> (i32, i32) {
    %c0_i32 = arith.constant 0 : i32
    %c0_i32_0 = arith.constant 0 : i32
    %c0_i32_1 = arith.constant 0 : i32
    return %c0_i32, %c0_i32_0 : i32, i32
  }
  func.func @transform_3(%arg0: i32, %arg1: i32) -> (i32, i32) {
    %c0_i32 = arith.constant 0 : i32
    %c0_i32_0 = arith.constant 0 : i32
    return %arg0, %c0_i32 : i32, i32
  }
  func.func @transform_4(%arg0: i32, %arg1: i32) -> (i32, i32) {
    %c0_i32 = arith.constant 0 : i32
    %c0_i32_0 = arith.constant 0 : i32
    %c0_i32_1 = arith.constant 0 : i32
    return %c0_i32, %c0_i32_0 : i32, i32
  }
  func.func @transform_5(%arg0: i32, %arg1: i32) -> (i32, i32) {
    %c0_i32 = arith.constant 0 : i32
    %c0_i32_0 = arith.constant 0 : i32
    %c0_i32_1 = arith.constant 0 : i32
    return %c0_i32, %c0_i32_0 : i32, i32
  }
  func.func @transform_6(%arg0: i32, %arg1: i32) -> (i32, i32) {
    %c0_i32 = arith.constant 0 : i32
    %c0_i32_0 = arith.constant 0 : i32
    return %arg0, %c0_i32 : i32, i32
  }
}

</mosaic_0001>

<bundles_post_ra>
// kernel: decoder_block_forward.13
= control target key start
LH: loop header
LB: loop body
LE: loop exit
PB: predicated region body
PF: predicated region fallthrough
CT: control target
= control target key end

     0   :  { %8 = vsyncpa [#allocation4], 0  ;;  %s193_s12 = smov [#allocation3]   ;;  %s250_s0 = inlined_call_operand.vmem [shape: f32[16,32], index: 0, kind: input, shape index: {}]   ;;  %s251_s1 = inlined_call_operand.vmem [shape: f32[32,64], index: 1, kind: input, shape index: {}]   ;;  %s252_s2 = inlined_call_operand.hbm [shape: f32[1,64], index: 2, kind: input, shape index: {}]   ;;  %s253_s3 = inlined_call_operand.vmem [shape: f32[16,64], index: 3, kind: output, shape index: {}]  }
   0x1   :  { %s19_s13 = sshll.u32 %s193_s12, 4  ;;  %s20_s13 = int_to_ptr.vmem [resolvable:$true] %s19_s13 }
   0x2   :  { %s179_s14 = scalar_lea.vmem %s20_s13, 16  ;;  %s183_s15 = scalar_lea.vmem %s20_s13, 32 }
   0x3   :  { %p180_p0 = scmp.ne.s32.totalorder %s20_s13, %s179_s14  ;;  %p184_p1 = scmp.lt.s32.totalorder %s20_s13, %s20_s13 }
   0x4   :  { %p185_p2 = scmp.lt.s32.totalorder %s183_s15, %s179_s14 }
   0x6   :  { %p186_p3 = por %p185_p2, %p184_p1 }
   0x8   :  { %p187_p4 = pnand %p186_p3, %p180_p0 }
   0xa   :  { %190 = shalt.err (!%p187_p4)
}
   0xb   :  { %22 = dma.hbm_to_vmem [thread:$0]  %s252_s2, 16, %s20_s13, [#allocation4]  }
   0xc   :  { %191 = dma.done.wait [#allocation4], 16  }
   0xd   :  { %192 = vsyncadd [#allocation4], 4294967280  ;;  %vm30_vm0 = vcmask 523264   ;;  %v194_v0 = vmov 0.0   ;;  %vm41_vm1 = vcmask 261120   ;;  %v40_v1 = vld [vmem:[%s251_s1 + $0x18] sm:$0xff] }
   0xe   :  { %32 = vst.msk [vmem:[#allocation2 + $0x8] sm:$0xff] %vm30_vm0, %v194_v0  ;;  %31 = vst.msk [vmem:[#allocation2] sm:$0xff] %vm30_vm0, %v194_v0  ;;  %v39_v2 = vld [vmem:[%s251_s1 + $0x10] sm:$0xff]  ;;  %158 = vmatprep.subr.mxu0 %v40_v1  ;;  %v35_v3 = vld [vmem:[%s250_s0] sm:$0xff] }
   0xf   :  { %159 = vmatpush3.msra.mxu0 %v40_v1  ;;  %v38_v4 = vld [vmem:[%s251_s1 + $0x8] sm:$0xff]  ;;  %166 = vmatprep.mubr.msk.f32.mxu0 %vm41_vm1, %v35_v3  ;;  %v37_v5 = vld [vmem:[%s251_s1] sm:$0xff]  ;;  %v151_v13 = vld [vmem:[#allocation3] ss:$0 sm:$0xff] }
  0x10   :  { %160 = vmatprep.subr.mxu0 %v39_v2  ;;  %v36_v6 = vld [vmem:[%s250_s0 + $0x8] sm:$0xff] }
  0x11   :  { %161 = vmatpush3.msra.mxu0 %v39_v2 }
  0x12   :  { %162 = vmatprep.subr.mxu0 %v38_v4 }
  0x13   :  { %163 = vmatpush3.msra.mxu0 %v38_v4 }
  0x14   :  { %164 = vmatprep.subr.mxu0 %v37_v5 }
  0x15   :  { %165 = vmatpush3.msra.mxu0 %v37_v5  ;;  %v34_v7 = vld [vmem:[#allocation2 + $0x8] sm:$0xff]  ;;  %v33_v9 = vld [vmem:[#allocation2] sm:$0xff] }
  0x16   :  { %167 = vmatmul.mubr.msk.f32.vlgmr.msra.gmra.mxu0 %vm41_vm1, %v36_v6 }
  0xd6   :  { %v168_v8 = vpop.f32.mrf.mxu0 }
  0xd7   :  { %v124_v10 = vadd.f32 %v168_v8, %v34_v7 }
  0xd8   :  { %v114_v11 = vpop.f32.mrf.mxu0 }
  0xd9   :  { %127 = vst.msk [vmem:[#allocation2 + $0x8] sm:$0xff] %vm30_vm0, %v124_v10  ;;  %v123_v12 = vadd.f32 %v114_v11, %v33_v9 }
  0xdb   :  { %126 = vst.msk [vmem:[#allocation2] sm:$0xff] %vm30_vm0, %v123_v12 }
  0xe0   :  { %v132_v14 = vld [vmem:[#allocation2 + $0x8] sm:$0xff] }
  0xe1   :  { %v141_v15 = vadd.f32 %v151_v13, %v132_v14 }
  0xe2   :  { %v131_v16 = vld [vmem:[#allocation2] sm:$0xff] }
  0xe3   :  { %143 = vst.msk [vmem:[%s253_s3 + $0x8] sm:$0xff] %vm30_vm0, %v141_v15  ;;  %v140_v17 = vadd.f32 %v151_v13, %v131_v16 }
  0xe5   :  { %142 = vst.msk [vmem:[%s253_s3] sm:$0xff] %vm30_vm0, %v140_v17 }
  0xe6   :  { %148 = vsyncpa [#allocation4], 1 }

// kernel: decoder_block_forward.9
= control target key start
LH: loop header
LB: loop body
LE: loop exit
PB: predicated region body
PF: predicated region fallthrough
CT: control target
= control target key end

     0   :  { %vm29_vm0 = vcmask 261120   ;;  %vm18_vm1 = vcmask 785408   ;;  %v157_v2 = vmov 0.0   ;;  %s213_s1 = inlined_call_operand.vmem [shape: f32[32,96], index: 1, kind: input, shape index: {}]   ;;  %s214_s0 = inlined_call_operand.vmem [shape: f32[16,32], index: 0, kind: input, shape index: {}]   ;;  %s215_s2 = inlined_call_operand.vmem [shape: f32[1,96], index: 2, kind: input, shape index: {}]   ;;  %s216_s3 = inlined_call_operand.vmem [shape: f32[16,96], index: 3, kind: output, shape index: {}]  }
   0x1   :  { %v28_v0 = vld [vmem:[%s213_s1 + $0x18] sm:$0xff]  ;;  %v27_v1 = vld [vmem:[%s213_s1 + $0x10] sm:$0xff]  ;;  %20 = vst.msk [vmem:[#allocation2 + $0x8] sm:$0xff] %vm18_vm1, %v157_v2  ;;  %19 = vst.msk [vmem:[#allocation2] sm:$0xff] %vm18_vm1, %v157_v2 }
   0x2   :  { %145 = vmatprep.subr.mxu0 %v28_v0  ;;  %v23_v3 = vld [vmem:[%s214_s0] sm:$0xff]  ;;  %v26_v4 = vld [vmem:[%s213_s1 + $0x8] sm:$0xff] }
   0x3   :  { %146 = vmatpush3.msra.mxu0 %v28_v0  ;;  %153 = vmatprep.mubr.msk.f32.mxu0 %vm29_vm0, %v23_v3  ;;  %v25_v5 = vld [vmem:[%s213_s1] sm:$0xff]  ;;  %v24_v6 = vld [vmem:[%s214_s0 + $0x8] sm:$0xff] }
   0x4   :  { %147 = vmatprep.subr.mxu0 %v27_v1  ;;  %v138_v13 = vld [vmem:[%s215_s2] ss:$0 sm:$0xff] }
   0x5   :  { %148 = vmatpush3.msra.mxu0 %v27_v1 }
   0x6   :  { %149 = vmatprep.subr.mxu0 %v26_v4 }
   0x7   :  { %150 = vmatpush3.msra.mxu0 %v26_v4 }
   0x8   :  { %151 = vmatprep.subr.mxu0 %v25_v5  ;;  %v22_v7 = vld [vmem:[#allocation2 + $0x8] sm:$0xff]  ;;  %v21_v9 = vld [vmem:[#allocation2] sm:$0xff] }
   0x9   :  { %152 = vmatpush3.msra.mxu0 %v25_v5 }
   0xa   :  { %154 = vmatmul.mubr.msk.f32.vlgmr.msra.gmra.mxu0 %vm29_vm0, %v24_v6 }
  0xca   :  { %v155_v8 = vpop.f32.mrf.mxu0 }
  0xcb   :  { %v112_v10 = vadd.f32 %v155_v8, %v22_v7 }
  0xcc   :  { %v102_v11 = vpop.f32.mrf.mxu0 }
  0xcd   :  { %115 = vst.msk [vmem:[#allocation2 + $0x8] sm:$0xff] %vm18_vm1, %v112_v10  ;;  %v111_v12 = vadd.f32 %v102_v11, %v21_v9 }
  0xcf   :  { %114 = vst.msk [vmem:[#allocation2] sm:$0xff] %vm18_vm1, %v111_v12 }
  0xd4   :  { %v120_v14 = vld [vmem:[#allocation2 + $0x8] sm:$0xff] }
  0xd5   :  { %v129_v15 = vadd.f32 %v138_v13, %v120_v14 }
  0xd6   :  { %v119_v16 = vld [vmem:[#allocation2] sm:$0xff] }
  0xd7   :  { %131 = vst.msk [vmem:[%s216_s3 + $0x8] sm:$0xff] %vm18_vm1, %v129_v15  ;;  %v128_v17 = vadd.f32 %v138_v13, %v119_v16 }
  0xd9   :  { %130 = vst.msk [vmem:[%s216_s3] sm:$0xff] %vm18_vm1, %v128_v17 }

// kernel: decoder_block_forward.11
= control target key start
LH: loop header
LB: loop body
LE: loop exit
PB: predicated region body
PF: predicated region fallthrough
CT: control target
= control target key end

     0   :  { %vm27_vm0 = vcmask 261120   ;;  %v220_v2 = vmov 0.0   ;;  %s307_s1 = inlined_call_operand.vmem [shape: f32[32,32], index: 1, kind: input, shape index: {}]   ;;  %s308_s0 = inlined_call_operand.vmem [shape: f32[16,32], index: 0, kind: input, shape index: {}]   ;;  %s309_s2 = inlined_call_operand.vmem [shape: f32[1,32], index: 2, kind: input, shape index: {}]   ;;  %s310_s3 = inlined_call_operand.vmem [shape: f32[16,32], index: 3, kind: input, shape index: {}]   ;;  %s311_s4 = inlined_call_operand.vmem [shape: f32[1,32], index: 4, kind: input, shape index: {}]   ;;  %s312_s5 = inlined_call_operand.vmem [shape: f32[1,32], index: 5, kind: input, shape index: {}]   ;;  %s313_s6 = inlined_call_operand.vmem [shape: f32[16,32], index: 6, kind: output, shape index: {}]  }
   0x1   :  { %v37_v0 = vld [vmem:[%s307_s1 + $0x18] sm:$0xff]  ;;  %v36_v1 = vld [vmem:[%s307_s1 + $0x10] sm:$0xff]  ;;  %29 = vst.msk [vmem:[#allocation2 + $0x8] sm:$0xff] %vm27_vm0, %v220_v2  ;;  %28 = vst.msk [vmem:[#allocation2] sm:$0xff] %vm27_vm0, %v220_v2 }
   0x2   :  { %204 = vmatprep.subr.mxu0 %v37_v0  ;;  %v32_v3 = vld [vmem:[%s308_s0] sm:$0xff]  ;;  %v35_v4 = vld [vmem:[%s307_s1 + $0x8] sm:$0xff] }
   0x3   :  { %205 = vmatpush3.msra.mxu0 %v37_v0  ;;  %212 = vmatprep.mubr.msk.f32.mxu0 %vm27_vm0, %v32_v3  ;;  %v34_v5 = vld [vmem:[%s307_s1] sm:$0xff]  ;;  %v33_v6 = vld [vmem:[%s308_s0 + $0x8] sm:$0xff] }
   0x4   :  { %206 = vmatprep.subr.mxu0 %v36_v1  ;;  %v195_v13 = vld [vmem:[%s309_s2] ss:$0 sm:$0xff]  ;;  %v139_v19 = vld [vmem:[%s310_s3 + $0x8] sm:$0xff] }
   0x5   :  { %207 = vmatpush3.msra.mxu0 %v36_v1  ;;  %v138_v16 = vld [vmem:[%s310_s3] sm:$0xff] }
   0x6   :  { %208 = vmatprep.subr.mxu0 %v35_v4  ;;  %v196_v41 = vld [vmem:[%s311_s4] ss:$0 sm:$0xff] }
   0x7   :  { %209 = vmatpush3.msra.mxu0 %v35_v4  ;;  %v197_v43 = vld [vmem:[%s312_s5] ss:$0 sm:$0xff] }
   0x8   :  { %210 = vmatprep.subr.mxu0 %v34_v5  ;;  %v31_v7 = vld [vmem:[#allocation2 + $0x8] sm:$0xff]  ;;  %v30_v9 = vld [vmem:[#allocation2] sm:$0xff] }
   0x9   :  { %211 = vmatpush3.msra.mxu0 %v34_v5 }
   0xa   :  { %213 = vmatmul.mubr.msk.f32.vlgmr.msra.gmra.mxu0 %vm27_vm0, %v33_v6 }
  0xca   :  { %v214_v8 = vpop.f32.mrf.mxu0 }
  0xcb   :  { %v121_v10 = vadd.f32 %v214_v8, %v31_v7 }
  0xcc   :  { %v111_v11 = vpop.f32.mrf.mxu0 }
  0xcd   :  { %123 = vst.msk [vmem:[#allocation2 + $0x8] sm:$0xff] %vm27_vm0, %v121_v10  ;;  %v120_v12 = vadd.f32 %v111_v11, %v30_v9 }
  0xcf   :  { %122 = vst.msk [vmem:[#allocation2] sm:$0xff] %vm27_vm0, %v120_v12 }
  0xd4   :  { %v128_v14 = vld [vmem:[#allocation2 + $0x8] sm:$0xff] }
  0xd5   :  { %v137_v18 = vadd.f32 %v195_v13, %v128_v14 }
  0xd6   :  { %v127_v15 = vld [vmem:[#allocation2] sm:$0xff] }
  0xd7   :  { %v136_v17 = vadd.f32 %v195_v13, %v127_v15  ;;  %v141_v22 = vadd.f32 %v139_v19, %v137_v18 }
  0xd9   :  { %v140_v20 = vadd.f32 %v138_v16, %v136_v17  ;;  %v145_v23 = vsel %vm27_vm0, %v141_v22, 0.0 }
  0xdb   :  { %v142_v21 = vsel %vm27_vm0, %v140_v20, 0.0 }
  0xdc   :  { %143 = vadd.xlane.f32.xlu0 %v142_v21 }
  0xe0   :  { %146 = vadd.xlane.f32.xlu0 %v145_v23 }
 0x165   :  { %v144_v24 = vpop.xlane.xlu0 %143 }
 0x166   :  { %v149_v25 = vmul.f32 0.03125, %v144_v24 }
 0x168   :  { %v151_v26 = vsub.f32 %v140_v20, %v149_v25 }
 0x169   :  { %v147_v27 = vpop.xlane.xlu0 %146 }
 0x16a   :  { %v150_v28 = vmul.f32 0.03125, %v147_v27  ;;  %v153_v29 = vmul.f32 %v151_v26, %v151_v26 }
 0x16c   :  { %v152_v30 = vsub.f32 %v141_v22, %v150_v28  ;;  %v155_v31 = vsel %vm27_vm0, %v153_v29, 0.0 }
 0x16d   :  { %156 = vadd.xlane.f32.xlu1 %v155_v31 }
 0x16e   :  { %v154_v32 = vmul.f32 %v152_v30, %v152_v30 }
 0x170   :  { %v158_v33 = vsel %vm27_vm0, %v154_v32, 0.0 }
 0x171   :  { %159 = vadd.xlane.f32.xlu1 %v158_v33 }
 0x1f6   :  { %v157_v34 = vpop.xlane.xlu1 %156 }
 0x1f7   :  { %v161_v35 = vmul.f32 0.03125, %v157_v34 }
 0x1f9   :  { %v163_v36 = vadd.f32 1e-05, %v161_v35 }
 0x1fa   :  { %v160_v37 = vpop.xlane.xlu1 %159 }
 0x1fb   :  { %216 = vrsqrt.f32 %v163_v36  ;;  %v162_v38 = vmul.f32 0.03125, %v160_v37 }
 0x1fd   :  { %v164_v39 = vadd.f32 1e-05, %v162_v38 }
 0x1ff   :  { %218 = vrsqrt.f32 %v164_v39 }
 0x208   :  { %v217_v40 = vpop.eup %216 }
 0x209   :  { %v167_v42 = vmul.f32 %v217_v40, %v151_v26 }
 0x20b   :  { %v176_v44 = vmul.f32 %v196_v41, %v167_v42 }
 0x20c   :  { %v219_v45 = vpop.eup %218 }
 0x20d   :  { %v185_v46 = vadd.f32 %v197_v43, %v176_v44  ;;  %v168_v47 = vmul.f32 %v219_v45, %v152_v30 }
 0x20f   :  { %187 = vst.msk [vmem:[%s313_s6] sm:$0xff] %vm27_vm0, %v185_v46  ;;  %v177_v48 = vmul.f32 %v196_v41, %v168_v47 }
 0x211   :  { %v186_v49 = vadd.f32 %v197_v43, %v177_v48 }
 0x213   :  { %188 = vst.msk [vmem:[%s313_s6 + $0x8] sm:$0xff] %vm27_vm0, %v186_v49 }

// kernel: decoder_block_forward.12
= control target key start
LH: loop header
LB: loop body
LE: loop exit
PB: predicated region body
PF: predicated region fallthrough
CT: control target
= control target key end

     0   :  { %vm18_vm0 = vcmask 261120   ;;  %v156_v2 = vmov 0.0   ;;  %s212_s1 = inlined_call_operand.vmem [shape: f32[32,32], index: 1, kind: input, shape index: {}]   ;;  %s213_s0 = inlined_call_operand.vmem [shape: f32[16,32], index: 0, kind: input, shape index: {}]   ;;  %s214_s2 = inlined_call_operand.vmem [shape: f32[1,32], index: 2, kind: input, shape index: {}]   ;;  %s215_s3 = inlined_call_operand.vmem [shape: f32[16,32], index: 3, kind: output, shape index: {}]  }
   0x1   :  { %v28_v0 = vld [vmem:[%s212_s1 + $0x18] sm:$0xff]  ;;  %v27_v1 = vld [vmem:[%s212_s1 + $0x10] sm:$0xff]  ;;  %20 = vst.msk [vmem:[#allocation2 + $0x8] sm:$0xff] %vm18_vm0, %v156_v2  ;;  %19 = vst.msk [vmem:[#allocation2] sm:$0xff] %vm18_vm0, %v156_v2 }
   0x2   :  { %144 = vmatprep.subr.mxu0 %v28_v0  ;;  %v23_v3 = vld [vmem:[%s213_s0] sm:$0xff]  ;;  %v26_v4 = vld [vmem:[%s212_s1 + $0x8] sm:$0xff] }
   0x3   :  { %145 = vmatpush3.msra.mxu0 %v28_v0  ;;  %152 = vmatprep.mubr.msk.f32.mxu0 %vm18_vm0, %v23_v3  ;;  %v25_v5 = vld [vmem:[%s212_s1] sm:$0xff]  ;;  %v24_v6 = vld [vmem:[%s213_s0 + $0x8] sm:$0xff] }
   0x4   :  { %146 = vmatprep.subr.mxu0 %v27_v1  ;;  %v137_v13 = vld [vmem:[%s214_s2] ss:$0 sm:$0xff] }
   0x5   :  { %147 = vmatpush3.msra.mxu0 %v27_v1 }
   0x6   :  { %148 = vmatprep.subr.mxu0 %v26_v4 }
   0x7   :  { %149 = vmatpush3.msra.mxu0 %v26_v4 }
   0x8   :  { %150 = vmatprep.subr.mxu0 %v25_v5  ;;  %v22_v7 = vld [vmem:[#allocation2 + $0x8] sm:$0xff]  ;;  %v21_v9 = vld [vmem:[#allocation2] sm:$0xff] }
   0x9   :  { %151 = vmatpush3.msra.mxu0 %v25_v5 }
   0xa   :  { %153 = vmatmul.mubr.msk.f32.vlgmr.msra.gmra.mxu0 %vm18_vm0, %v24_v6 }
  0xca   :  { %v154_v8 = vpop.f32.mrf.mxu0 }
  0xcb   :  { %v112_v10 = vadd.f32 %v154_v8, %v22_v7 }
  0xcc   :  { %v102_v11 = vpop.f32.mrf.mxu0 }
  0xcd   :  { %114 = vst.msk [vmem:[#allocation2 + $0x8] sm:$0xff] %vm18_vm0, %v112_v10  ;;  %v111_v12 = vadd.f32 %v102_v11, %v21_v9 }
  0xcf   :  { %113 = vst.msk [vmem:[#allocation2] sm:$0xff] %vm18_vm0, %v111_v12 }
  0xd4   :  { %v119_v14 = vld [vmem:[#allocation2 + $0x8] sm:$0xff] }
  0xd5   :  { %v128_v15 = vadd.f32 %v137_v13, %v119_v14 }
  0xd6   :  { %v118_v16 = vld [vmem:[#allocation2] sm:$0xff] }
  0xd7   :  { %130 = vst.msk [vmem:[%s215_s3 + $0x8] sm:$0xff] %vm18_vm0, %v128_v15  ;;  %v127_v17 = vadd.f32 %v137_v13, %v118_v16 }
  0xd9   :  { %129 = vst.msk [vmem:[%s215_s3] sm:$0xff] %vm18_vm0, %v127_v17 }

// kernel: decoder_block_forward.10
= control target key start
LH: loop header
LB: loop body
LE: loop exit
PB: predicated region body
PF: predicated region fallthrough
CT: control target
= control target key end

     0   :  { %s1418_s12 = smov 0   ;;  %s1420_s13 = smov 0   ;;  %s1580_s0 = inlined_call_operand.vmem [shape: f32[2,8,96], index: 0, kind: input, shape index: {}, may-alias: {0,1}]   ;;  %s1581_s1 = inlined_call_operand.vmem [shape: f32[2,8,96], index: 1, kind: input, shape index: {}, may-alias: {0,1}]   ;;  %s1582_s2 = inlined_call_operand.vmem [shape: f32[8,8], index: 2, kind: input, shape index: {}]   ;;  %s1583_s3 = inlined_call_operand.vmem [shape: f32[2,8,32], index: 3, kind: output, shape index: {}]  }
   0x1   :  { %s1422_s14 = smov 0  }
   0x2 LB: > { %s32_s15 = sadd.s32 1, %s1374_s13  ;;  %p1214_p0 = scmp.ge.s32.totalorder %s1378_s14, 1  ;;  %s1378_s14 = sphi %s1422_s14, %s13_s14   ;;  %s1374_s13 = sphi %s1420_s13, %s1585_s13   ;;  %s1370_s12 = sphi %s1418_s12, %s1584_s12  }
   0x3   : > { %p34_p1 = scmp.ge.s32.totalorder %s32_s15, 2  ;;  %p190_p2 = scmp.lt.s32.totalorder %s1378_s14, 3 }
   0x5   : > { %s1587_s15 = smov (%p34_p1, %s32_s15), 0  ;;  %p191_p3 = pnand %p1214_p0, %p190_p2 }
   0x6   : > { %p232_p4 = scmp.lt.s32.totalorder (!%p191_p3), %s1370_s12, 1  ;;  %s1382_s20 = smov (!%p191_p3), 96  }
   0x7   : > { %194 = sbr.rel (%p191_p3) target bundleno = 1507 (0x5e3), region = 32  ;;  %s1385_s26 = smov (!%p191_p3), 64  }
   0x8   : > { %s1386_s27 = smov (!%p191_p3), 88   ;;  %s1387_s28 = smov (!%p191_p3), 120  }
   0x9   : > { %s1388_s29 = smov (!%p191_p3), 80   ;;  %s1389_s30 = smov (!%p191_p3), 112  }
   0xa   : > { %s1390_s4 = smov (!%p191_p3), 72   ;;  %s1391_s5 = smov (!%p191_p3), 104  }
   0xb   : > { %s1392_s6 = smov (!%p191_p3), 56   ;;  %s1393_s7 = smov (!%p191_p3), 40  }
   0xc   : > { %vm273_vm0 = vcmask 64512   ;;  %v1380_v0 = vmov 0.0   ;;  %vm1381_vm1 = vmmov 0   ;;  %s1589_s12 = smov (!%p232_p4, %s1370_s12), 1  ;;  %vm264_vm2 = vcmask 7168   ;;  %v1483_v5 = vld [vmem:[%s1582_s2] sm:$0xff] }
   0xd   : > { %1248 = vmatprep.subr.mxu0 %v1380_v0  ;;  %274 = vst.msk [vmem:[#allocation4] sm:$0xff] %vm273_vm0, %v1380_v0  ;;  %275 = vst.msk [vmem:[#allocation4 + $0x8] sm:$0xff] %vm273_vm0, %v1380_v0  ;;  %1250 = vmatprep.mubr.msk.f32.mxu0 %vm1381_vm1, %v1380_v0  ;;  %s1450_s16 = sshll.u32 %s1589_s12, 3  ;;  %v1383_v4 = vmov -1e+30   ;;  %v1384_v10 = vmov 0  }
   0xe   : > { %276 = vst.msk [vmem:[#allocation4 + $0x10] sm:$0xff] %vm273_vm0, %v1380_v0  ;;  %277 = vst.msk [vmem:[#allocation4 + $0x18] sm:$0xff] %vm273_vm0, %v1380_v0  ;;  %1253 = vmatprep.subr.mxu1 %v1380_v0  ;;  %1255 = vmatprep.mubr.msk.f32.mxu1 %vm1381_vm1, %v1380_v0  ;;  %s245_s19 = scalar_lea.vmem %s1581_s1, %s1450_s16  ;;  %s238_s23 = scalar_lea.vmem %s1580_s0, %s1450_s16  ;;  %vm1066_vm3 = vcmask 130112   ;;  %vm1081_vm4 = vcmask 195712   ;;  %vm1096_vm5 = vcmask 261312  }
   0xf   : > { %v1456_v1 = vld [vmem:[%s245_s19] sm:$0xff]  ;;  %265 = vst.msk [vmem:[#allocation2] sm:$0xff] %vm264_vm2, %v1383_v4  ;;  %266 = vst.msk [vmem:[#allocation2 + $0x8] sm:$0xff] %vm264_vm2, %v1383_v4  ;;  %1330 = vset.pattern.permute.xlu1 %v1384_v10  ;;  %1331 = vset.pattern.permute.xlu0 %v1384_v10  ;;  %s1394_s8 = smov 48   ;;  %s1561_s11 = scalar_lea.vmem %s1583_s3, %s1450_s16 }
  0x10   : > { %282 = vrot.lane.b32.xlu0 %v1456_v1, %s1382_s20  ;;  %v278_v3 = vld [vmem:[%s238_s23] sm:$0xff]  ;;  %267 = vst.msk [vmem:[#allocation2 + $0x10] sm:$0xff] %vm264_vm2, %v1383_v4  ;;  %268 = vst.msk [vmem:[#allocation2 + $0x18] sm:$0xff] %vm264_vm2, %v1383_v4  ;;  %s1395_s12 = smov 8   ;;  %s1396_s16 = smov 16  }
  0x11   : > { %269 = vst.msk [vmem:[#allocation3] sm:$0xff] %vm264_vm2, %v1380_v0  ;;  %270 = vst.msk [vmem:[#allocation3 + $0x8] sm:$0xff] %vm264_vm2, %v1380_v0  ;;  %s1397_s17 = smov 24  }
  0x12   : > { %271 = vst.msk [vmem:[#allocation3 + $0x10] sm:$0xff] %vm264_vm2, %v1380_v0  ;;  %272 = vst.msk [vmem:[#allocation3 + $0x18] sm:$0xff] %vm264_vm2, %v1380_v0 }
  0x16   : > { %v1487_v11 = vld [vmem:[#allocation2] sm:$0xff]  ;;  %v549_v40 = vld [vmem:[#allocation2 + $0x8] sm:$0xff] }
  0x17   : > { %v1525_v43 = vld [vmem:[#allocation2 + $0x10] sm:$0xff]  ;;  %v929_v47 = vld [vmem:[#allocation2 + $0x18] sm:$0xff] }
  0x82   : > { %v283_v2 = vpop.permute.xlu0 %282 }
  0x83   : > { %1249 = vmatpush3.xpose.msk.msra.mxu0 %vm273_vm0, %v283_v2 }
  0x84   : > { %1263 = vmatprep.subr.mxu0 %v1380_v0 }
  0x86   : > { %1251 = vmatmul.mubr.msk.f32.vlgmr.msra.gmra.mxu0 %vm273_vm0, %v278_v3 }
  0x87   : > { %1265 = vmatprep.mubr.msk.f32.mxu0 %vm1381_vm1, %v1380_v0 }
 0x146   : > { %v356_v6 = vpop.f32.mrf.mxu0 }
 0x147   : > { %v357_v7 = vadd.f32 %v356_v6, %v1483_v5 }
 0x148   : > { %v1252_v8 = vpop.f32.mrf.mxu0 }
 0x149   : > { %v361_v9 = vsel %vm273_vm0, %v357_v7, -inf }
 0x14a   : > { %362 = vmax.xlane.f32.xlu0 %v361_v9 }
 0x1d3   : > { %v363_v12 = vpop.xlane.xlu0 %362 }
 0x1d4   : > { %v1490_v13 = vmax.f32 %v1487_v11, %v363_v12 }
 0x1d6   : > { %v365_v14 = vsub.f32 %v1487_v11, %v1490_v13  ;;  %469 = vst.msk [vmem:[#allocation2] sm:$0xff] %vm264_vm2, %v1490_v13  ;;  %370 = vperm.xlu1 %1330, %v1490_v13   ;;  %v566_v13 = vld [vmem:[#allocation3 + $0x8] sm:$0xff] }
 0x1d8   : > { %v366_v10 = vmul.f32 1.442695, %v365_v14 }
 0x1da   : > { %391 = vrot.lane.b32.xlu1 %v1456_v1, %s1385_s26 }
 0x1de   : > { %472 = vrot.lane.b32.xlu1 %v1456_v1, %s1386_s27 }
 0x1e2   : > { %470 = vrot.lane.b32.xlu1 %v278_v3, %s1387_s28 }
 0x1e6   : > { %662 = vrot.lane.b32.xlu1 %v1456_v1, %s1388_s29 }
 0x1ea   : > { %660 = vrot.lane.b32.xlu1 %v278_v3, %s1389_s30 }
 0x1ee   : > { %852 = vrot.lane.b32.xlu1 %v1456_v1, %s1390_s4 }
 0x1f2   : > { %850 = vrot.lane.b32.xlu1 %v278_v3, %s1391_s5 }
 0x251   : > { %v371_v15 = vpop.permute.xlu1 %370 }
 0x252   : > { %v373_v16 = vsub.f32 %v357_v7, %v371_v15 }
 0x254   : > { %v374_v17 = vmul.f32 1.442695, %v373_v16 }
 0x255   : > { %v392_v18 = vpop.permute.xlu1 %391 }
 0x256   : > { %1332 = vpow2.f32 %v374_v17  ;;  %1254 = vmatpush3.msra.mxu1 %v392_v18  ;;  %v376_v18 = vld [vmem:[#allocation3] sm:$0xff] }
 0x257   : > { %1258 = vmatprep.subr.mxu1 %v1380_v0 }
 0x259   : > { %v473_v19 = vpop.permute.xlu1 %472 }
 0x25d   : > { %v471_v20 = vpop.permute.xlu1 %470 }
 0x261   : > { %v663_v21 = vpop.permute.xlu1 %662 }
 0x263   : > { %v1333_v22 = vpop.eup %1332 }
 0x264   : > { %1256 = vmatmul.mubr.msk.f32.vlgmr.msra.gmra.mxu1 %vm273_vm0, %v1333_v22  ;;  %v378_v52 = vsel %vm273_vm0, %v1333_v22, 0.0 }
 0x265   : > { %1259 = vmatpush3.xpose.msk.msra.mxu1 %vm273_vm0, %v473_v19  ;;  %1260 = vmatprep.mubr.msk.f32.mxu1 %vm1381_vm1, %v1380_v0  ;;  %v661_v23 = vpop.permute.xlu1 %660 }
 0x266   : > { %1268 = vmatprep.subr.mxu1 %v1380_v0 }
 0x268   : > { %1261 = vmatmul.mubr.msk.f32.vlgmr.msra.gmra.mxu1 %vm273_vm0, %v471_v20 }
 0x269   : > { %1269 = vmatpush3.xpose.msk.msra.mxu1 %vm273_vm0, %v663_v21  ;;  %1270 = vmatprep.mubr.msk.f32.mxu1 %vm1381_vm1, %v1380_v0  ;;  %v853_v24 = vpop.permute.xlu1 %852 }
 0x26a   : > { %1278 = vmatprep.subr.mxu1 %v1380_v0 }
 0x26c   : > { %1271 = vmatmul.mubr.msk.f32.vlgmr.msra.gmra.mxu1 %vm273_vm0, %v661_v23 }
 0x26d   : > { %1279 = vmatpush3.xpose.msk.msra.mxu1 %vm273_vm0, %v853_v24  ;;  %1280 = vmatprep.mubr.msk.f32.mxu1 %vm1381_vm1, %v1380_v0  ;;  %v851_v25 = vpop.permute.xlu1 %850  ;;  %v756_v24 = vld [vmem:[#allocation3 + $0x10] sm:$0xff] }
 0x270   : > { %1281 = vmatmul.mubr.msk.f32.vlgmr.msra.gmra.mxu1 %vm273_vm0, %v851_v25 }
 0x324   : > { %v1517_v26 = vpop.f32.mrf.mxu1 }
 0x326   : > { %v1257_v27 = vpop.f32.mrf.mxu1 }
 0x328   : > { %v544_v28 = vpop.f32.mrf.mxu1 }
 0x329   : > { %v545_v29 = vadd.f32 %v544_v28, %v1483_v5 }
 0x32a   : > { %v1262_v30 = vpop.f32.mrf.mxu1 }
 0x32b   : > { %v550_v31 = vsel %vm273_vm0, %v545_v29, -inf }
 0x32c   : > { %551 = vmax.xlane.f32.xlu1 %v550_v31  ;;  %v734_v32 = vpop.f32.mrf.mxu1 }
 0x32d   : > { %v735_v33 = vadd.f32 %v734_v32, %v1483_v5 }
 0x32e   : > { %v1272_v34 = vpop.f32.mrf.mxu1 }
 0x32f   : > { %v740_v35 = vsel %vm273_vm0, %v735_v33, -inf }
 0x330   : > { %741 = vmax.xlane.f32.xlu0 %v740_v35  ;;  %v924_v36 = vpop.f32.mrf.mxu1  ;;  %v384_v35 = vld [vmem:[#allocation4] sm:$0xff] }
 0x331   : > { %v925_v37 = vadd.f32 %v924_v36, %v1483_v5 }
 0x332   : > { %v1282_v38 = vpop.f32.mrf.mxu1 }
 0x333   : > { %v930_v39 = vsel %vm273_vm0, %v925_v37, -inf }
 0x334   : > { %931 = vmax.xlane.f32.xlu0 %v930_v39 }
 0x3b5   : > { %v552_v41 = vpop.xlane.xlu1 %551 }
 0x3b6   : > { %v553_v42 = vmax.f32 %v549_v40, %v552_v41 }
 0x3b8   : > { %v554_v44 = vsub.f32 %v549_v40, %v553_v42  ;;  %659 = vst.msk [vmem:[#allocation2 + $0x8] sm:$0xff] %vm264_vm2, %v553_v42  ;;  %559 = vperm.xlu0 %1331, %v553_v42  }
 0x3b9   : > { %v742_v45 = vpop.xlane.xlu0 %741 }
 0x3ba   : > { %v743_v46 = vmax.f32 %v1525_v43, %v742_v45  ;;  %v555_v5 = vmul.f32 1.442695, %v554_v44 }
 0x3bc   : > { %v744_v48 = vsub.f32 %v1525_v43, %v743_v46  ;;  %849 = vst.msk [vmem:[#allocation2 + $0x10] sm:$0xff] %vm264_vm2, %v743_v46  ;;  %749 = vperm.xlu1 %1330, %v743_v46   ;;  %581 = vrot.lane.b32.xlu0 %v1456_v1, %s1392_s6  ;;  %v574_v46 = vld [vmem:[#allocation4 + $0x8] sm:$0xff] }
 0x3bd   : > { %v932_v49 = vpop.xlane.xlu0 %931 }
 0x3be   : > { %v933_v50 = vmax.f32 %v929_v47, %v932_v49  ;;  %v745_v12 = vmul.f32 1.442695, %v744_v48  ;;  %v764_v49 = vld [vmem:[#allocation4 + $0x10] sm:$0xff] }
 0x3c0   : > { %v934_v51 = vsub.f32 %v929_v47, %v933_v50  ;;  %1039 = vst.msk [vmem:[#allocation2 + $0x18] sm:$0xff] %vm264_vm2, %v933_v50  ;;  %939 = vperm.xlu1 %1330, %v933_v50   ;;  %961 = vrot.lane.b32.xlu0 %v1456_v1, %s1393_s7 }
 0x3c2   : > { %v935_v8 = vmul.f32 1.442695, %v934_v51 }
 0x3c4   : > { %771 = vrot.lane.b32.xlu1 %v1456_v1, %s1394_s8 }
 0x3e8   : > { %379 = vadd.xlane.f32.xlu1 %v378_v52 }
 0x433   : > { %v560_v53 = vpop.permute.xlu0 %559 }
 0x434   : > { %v562_v54 = vsub.f32 %v545_v29, %v560_v53  ;;  %v946_v29 = vld [vmem:[#allocation3 + $0x18] sm:$0xff] }
 0x436   : > { %v563_v55 = vmul.f32 1.442695, %v562_v54 }
 0x437   : > { %v750_v56 = vpop.permute.xlu1 %749  ;;  %v582_v57 = vpop.permute.xlu0 %581 }
 0x438   : > { %1334 = vpow2.f32 %v563_v55  ;;  %v752_v58 = vsub.f32 %v735_v33, %v750_v56  ;;  %1264 = vmatpush3.msra.mxu0 %v582_v57  ;;  %v954_v56 = vld [vmem:[#allocation4 + $0x18] sm:$0xff] }
 0x439   : > { %1273 = vmatprep.subr.mxu0 %v1380_v0 }
 0x43a   : > { %v753_v59 = vmul.f32 1.442695, %v752_v58 }
 0x43b   : > { %v940_v60 = vpop.permute.xlu1 %939  ;;  %v962_v3 = vpop.permute.xlu0 %961 }
 0x43c   : > { %1336 = vpow2.f32 %v753_v59  ;;  %v942_v61 = vsub.f32 %v925_v37, %v940_v60 }
 0x43e   : > { %v943_v62 = vmul.f32 1.442695, %v942_v61 }
 0x43f   : > { %v772_v63 = vpop.permute.xlu1 %771 }
 0x440   : > { %1338 = vpow2.f32 %v943_v62 }
 0x441   : > { %1340 = vpow2.f32 %v555_v5 }
 0x442   : > { %1342 = vpow2.f32 %v935_v8 }
 0x443   : > { %1344 = vpow2.f32 %v366_v10 }
 0x444   : > { %1346 = vpow2.f32 %v745_v12 }
 0x445   : > { %v1335_v1 = vpop.eup %1334 }
 0x446   : > { %1266 = vmatmul.mubr.msk.f32.vlgmr.msra.gmra.mxu0 %vm273_vm0, %v1335_v1  ;;  %v568_v2 = vsel %vm273_vm0, %v1335_v1, 0.0 }
 0x447   : > { %569 = vadd.xlane.f32.xlu0 %v568_v2  ;;  %1274 = vmatpush3.msra.mxu0 %v772_v63 }
 0x448   : > { %1275 = vmatprep.mubr.msk.f32.mxu0 %vm1381_vm1, %v1380_v0  ;;  %1283 = vmatprep.subr.mxu0 %v1380_v0 }
 0x449   : > { %v1337_v4 = vpop.eup %1336 }
 0x44a   : > { %1276 = vmatmul.mubr.msk.f32.vlgmr.msra.gmra.mxu0 %vm273_vm0, %v1337_v4  ;;  %v758_v6 = vsel %vm273_vm0, %v1337_v4, 0.0 }
 0x44b   : > { %759 = vadd.xlane.f32.xlu1 %v758_v6  ;;  %1284 = vmatpush3.msra.mxu0 %v962_v3 }
 0x44c   : > { %1285 = vmatprep.mubr.msk.f32.mxu0 %vm1381_vm1, %v1380_v0 }
 0x44d   : > { %v1339_v7 = vpop.eup %1338 }
 0x44e   : > { %1286 = vmatmul.mubr.msk.f32.vlgmr.msra.gmra.mxu0 %vm273_vm0, %v1339_v7  ;;  %v948_v9 = vsel %vm273_vm0, %v1339_v7, 0.0  ;;  %v1341_v15 = vpop.eup %1340 }
 0x44f   : > { %949 = vadd.xlane.f32.xlu0 %v948_v9  ;;  %v1343_v16 = vpop.eup %1342  ;;  %v567_v14 = vmul.f32 %v1341_v15, %v566_v13 }
 0x450   : > { %v1345_v0 = vpop.eup %1344  ;;  %v947_v31 = vmul.f32 %v1343_v16, %v946_v29 }
 0x451   : > { %v1347_v17 = vpop.eup %1346  ;;  %v377_v19 = vmul.f32 %v1345_v0, %v376_v18 }
 0x452   : > { %v757_v27 = vmul.f32 %v1347_v17, %v756_v24 }
 0x45c   : > { %577 = vperm.xlu1 %1330, %v1341_v15  }
 0x460   : > { %957 = vperm.xlu1 %1330, %v1343_v16  }
 0x465   : > { %387 = vperm.xlu0 %1331, %v1345_v0  }
 0x469   : > { %767 = vperm.xlu0 %1331, %v1347_v17  }
 0x471   : > { %v380_v20 = vpop.xlane.xlu1 %379 }
 0x472   : > { %v381_v21 = vadd.f32 %v380_v20, %v377_v19 }
 0x474   : > { %383 = vst.msk [vmem:[#allocation3] sm:$0xff] %vm264_vm2, %v381_v21 }
 0x47b   : > { %v1043_v22 = vld [vmem:[#allocation3] sm:$0xff] }
 0x47c   : > { %1348 = vrcp.f32 %v1043_v22 }
 0x489   : > { %v1349_v11 = vpop.eup %1348 }
 0x48a   : > { %1048 = vperm.xlu1 %1330, %v1349_v11  }
 0x4d0   : > { %v570_v23 = vpop.xlane.xlu0 %569 }
 0x4d1   : > { %v571_v25 = vadd.f32 %v570_v23, %v567_v14 }
 0x4d3   : > { %572 = vst.msk [vmem:[#allocation3 + $0x8] sm:$0xff] %vm264_vm2, %v571_v25 }
 0x4d4   : > { %v760_v28 = vpop.xlane.xlu1 %759 }
 0x4d5   : > { %v761_v30 = vadd.f32 %v760_v28, %v757_v27 }
 0x4d7   : > { %762 = vst.msk [vmem:[#allocation3 + $0x10] sm:$0xff] %vm264_vm2, %v761_v30 }
 0x4d8   : > { %v950_v32 = vpop.xlane.xlu0 %949  ;;  %v578_v44 = vpop.permute.xlu1 %577 }
 0x4d9   : > { %v951_v33 = vadd.f32 %v950_v32, %v947_v31  ;;  %v580_v47 = vmul.f32 %v578_v44, %v574_v46 }
 0x4da   : > { %v1053_v34 = vld [vmem:[#allocation3 + $0x8] sm:$0xff] }
 0x4db   : > { %952 = vst.msk [vmem:[#allocation3 + $0x18] sm:$0xff] %vm264_vm2, %v951_v33  ;;  %1350 = vrcp.f32 %v1053_v34 }
 0x4dc   : > { %v958_v45 = vpop.permute.xlu1 %957 }
 0x4dd   : > { %v960_v60 = vmul.f32 %v958_v45, %v954_v56 }
 0x4de   : > { %v1068_v36 = vld [vmem:[#allocation3 + $0x10] sm:$0xff] }
 0x4df   : > { %1352 = vrcp.f32 %v1068_v36 }
 0x4e0   : > { %v388_v37 = vpop.permute.xlu0 %387 }
 0x4e1   : > { %v390_v38 = vmul.f32 %v388_v37, %v384_v35 }
 0x4e2   : > { %v1083_v39 = vld [vmem:[#allocation3 + $0x18] sm:$0xff] }
 0x4e3   : > { %v467_v40 = vadd.f32 %v1517_v26, %v390_v38  ;;  %1354 = vrcp.f32 %v1083_v39 }
 0x4e4   : > { %v768_v50 = vpop.permute.xlu0 %767 }
 0x4e5   : > { %468 = vst.msk [vmem:[#allocation4] sm:$0xff] %vm273_vm0, %v467_v40  ;;  %v770_v55 = vmul.f32 %v768_v50, %v764_v49 }
 0x4e8   : > { %v1351_v41 = vpop.eup %1350 }
 0x4e9   : > { %1058 = vperm.xlu0 %1331, %v1351_v41  }
 0x4ec   : > { %v1353_v42 = vpop.eup %1352  ;;  %v1045_v26 = vld [vmem:[#allocation4] sm:$0xff] }
 0x4ed   : > { %1073 = vperm.xlu0 %1331, %v1353_v42  }
 0x4f0   : > { %v1355_v43 = vpop.eup %1354 }
 0x4f1   : > { %1088 = vperm.xlu0 %1331, %v1355_v43  }
 0x505   : > { %v1049_v48 = vpop.permute.xlu1 %1048 }
 0x506   : > { %v1051_v51 = vmul.f32 %v1049_v48, %v1045_v26  ;;  %v653_v52 = vpop.f32.mrf.mxu0 }
 0x507   : > { %v657_v53 = vadd.f32 %v653_v52, %v580_v47 }
 0x508   : > { %1052 = vst.msk [vmem:[%s1561_s11] sm:$0xff] %vm273_vm0, %v1051_v51  ;;  %v1267_v54 = vpop.f32.mrf.mxu0 }
 0x509   : > { %658 = vst.msk [vmem:[#allocation4 + $0x8] sm:$0xff] %vm273_vm0, %v657_v53 }
 0x50a   : > { %v843_v57 = vpop.f32.mrf.mxu0 }
 0x50b   : > { %v847_v58 = vadd.f32 %v843_v57, %v770_v55 }
 0x50c   : > { %v1277_v59 = vpop.f32.mrf.mxu0 }
 0x50d   : > { %848 = vst.msk [vmem:[#allocation4 + $0x10] sm:$0xff] %vm273_vm0, %v847_v58 }
 0x50e   : > { %v1033_v61 = vpop.f32.mrf.mxu0 }
 0x50f   : > { %v1037_v62 = vadd.f32 %v1033_v61, %v960_v60 }
 0x510   : > { %v1287_v63 = vpop.f32.mrf.mxu0  ;;  %v1055_v2 = vld [vmem:[#allocation4 + $0x8] sm:$0xff] }
 0x511   : > { %1038 = vst.msk [vmem:[#allocation4 + $0x18] sm:$0xff] %vm273_vm0, %v1037_v62 }
 0x514   : > { %v1070_v5 = vld [vmem:[#allocation4 + $0x10] sm:$0xff] }
 0x518   : > { %v1085_v8 = vld [vmem:[#allocation4 + $0x18] sm:$0xff] }
 0x564   : > { %v1059_v1 = vpop.permute.xlu0 %1058 }
 0x565   : > { %v1061_v3 = vmul.f32 %v1059_v1, %v1055_v2 }
 0x567   : > { %1063 = vrot.lane.b32.xlu1 %v1061_v3, %s1395_s12 }
 0x568   : > { %v1074_v4 = vpop.permute.xlu0 %1073 }
 0x569   : > { %v1076_v6 = vmul.f32 %v1074_v4, %v1070_v5 }
 0x56b   : > { %1078 = vrot.lane.b32.xlu1 %v1076_v6, %s1396_s16 }
 0x56c   : > { %v1089_v7 = vpop.permute.xlu0 %1088 }
 0x56d   : > { %v1091_v9 = vmul.f32 %v1089_v7, %v1085_v8 }
 0x56f   : > { %1093 = vrot.lane.b32.xlu1 %v1091_v9, %s1397_s17 }
 0x5d9   : > { %v1064_v10 = vpop.permute.xlu1 %1063 }
 0x5da   : > { %1067 = vst.msk [vmem:[%s1561_s11] sm:$0xff] %vm1066_vm3, %v1064_v10 }
 0x5dd   : > { %v1079_v12 = vpop.permute.xlu1 %1078 }
 0x5de   : > { %1082 = vst.msk [vmem:[%s1561_s11] sm:$0xff] %vm1081_vm4, %v1079_v12 }
 0x5e1   : > { %v1094_v15 = vpop.permute.xlu1 %1093 }
 0x5e2   : > { %1097 = vst.msk [vmem:[%s1561_s11] sm:$0xff] %vm1096_vm5, %v1094_v15 }
 0x5e3 PF: > { %s13_s14 = sadd.s32 1, %s1378_s14   ;;  %s1584_s12 = smov %s1374_s13 }
 0x5e4   : > { %p10_p5 = scmp.ge.s32.totalorder %s13_s14, 4   ;;  %s1585_s13 = smov %s1587_s15 }
 0x5e6   :  { %12 = sbr.rel (!%p10_p5) target bundleno = 2 (0x2), region = 85 }

// kernel: decoder_block_forward.16
= control target key start
LH: loop header
LB: loop body
LE: loop exit
PB: predicated region body
PF: predicated region fallthrough
CT: control target
= control target key end

     0   :  { %vm29_vm0 = vcmask 261120   ;;  %vm18_vm1 = vcmask 523264   ;;  %v159_v2 = vmov 0.0   ;;  %s215_s1 = inlined_call_operand.vmem [shape: f32[32,64], index: 1, kind: input, shape index: {}]   ;;  %s216_s0 = inlined_call_operand.vmem [shape: f32[16,32], index: 0, kind: input, shape index: {}]   ;;  %s217_s2 = inlined_call_operand.vmem [shape: f32[1,64], index: 2, kind: input, shape index: {}]   ;;  %s218_s3 = inlined_call_operand.vmem [shape: f32[16,64], index: 3, kind: output, shape index: {}]  }
   0x1   :  { %v28_v0 = vld [vmem:[%s215_s1 + $0x18] sm:$0xff]  ;;  %v27_v1 = vld [vmem:[%s215_s1 + $0x10] sm:$0xff]  ;;  %20 = vst.msk [vmem:[#allocation2 + $0x8] sm:$0xff] %vm18_vm1, %v159_v2  ;;  %19 = vst.msk [vmem:[#allocation2] sm:$0xff] %vm18_vm1, %v159_v2 }
   0x2   :  { %147 = vmatprep.subr.mxu0 %v28_v0  ;;  %v23_v3 = vld [vmem:[%s216_s0] sm:$0xff]  ;;  %v26_v4 = vld [vmem:[%s215_s1 + $0x8] sm:$0xff] }
   0x3   :  { %148 = vmatpush3.msra.mxu0 %v28_v0  ;;  %155 = vmatprep.mubr.msk.f32.mxu0 %vm29_vm0, %v23_v3  ;;  %v25_v5 = vld [vmem:[%s215_s1] sm:$0xff]  ;;  %v24_v6 = vld [vmem:[%s216_s0 + $0x8] sm:$0xff] }
   0x4   :  { %149 = vmatprep.subr.mxu0 %v27_v1  ;;  %v140_v13 = vld [vmem:[%s217_s2] ss:$0 sm:$0xff] }
   0x5   :  { %150 = vmatpush3.msra.mxu0 %v27_v1 }
   0x6   :  { %151 = vmatprep.subr.mxu0 %v26_v4 }
   0x7   :  { %152 = vmatpush3.msra.mxu0 %v26_v4 }
   0x8   :  { %153 = vmatprep.subr.mxu0 %v25_v5  ;;  %v22_v7 = vld [vmem:[#allocation2 + $0x8] sm:$0xff]  ;;  %v21_v9 = vld [vmem:[#allocation2] sm:$0xff] }
   0x9   :  { %154 = vmatpush3.msra.mxu0 %v25_v5 }
   0xa   :  { %156 = vmatmul.mubr.msk.f32.vlgmr.msra.gmra.mxu0 %vm29_vm0, %v24_v6 }
  0xca   :  { %v157_v8 = vpop.f32.mrf.mxu0 }
  0xcb   :  { %v112_v10 = vadd.f32 %v157_v8, %v22_v7 }
  0xcc   :  { %v102_v11 = vpop.f32.mrf.mxu0 }
  0xcd   :  { %115 = vst.msk [vmem:[#allocation2 + $0x8] sm:$0xff] %vm18_vm1, %v112_v10  ;;  %v111_v12 = vadd.f32 %v102_v11, %v21_v9 }
  0xcf   :  { %114 = vst.msk [vmem:[#allocation2] sm:$0xff] %vm18_vm1, %v111_v12 }
  0xd4   :  { %v120_v14 = vld [vmem:[#allocation2 + $0x8] sm:$0xff] }
  0xd5   :  { %v129_v15 = vadd.f32 %v140_v13, %v120_v14 }
  0xd6   :  { %v119_v16 = vld [vmem:[#allocation2] sm:$0xff] }
  0xd7   :  { %v131_v17 = vmax.f32 %v129_v15, 0.0  ;;  %v128_v18 = vadd.f32 %v140_v13, %v119_v16 }
  0xd9   :  { %133 = vst.msk [vmem:[%s218_s3 + $0x8] sm:$0xff] %vm18_vm1, %v131_v17  ;;  %v130_v19 = vmax.f32 %v128_v18, 0.0 }
  0xdb   :  { %132 = vst.msk [vmem:[%s218_s3] sm:$0xff] %vm18_vm1, %v130_v19 }

// kernel: decoder_block_forward.17
= control target key start
LH: loop header
LB: loop body
LE: loop exit
PB: predicated region body
PF: predicated region fallthrough
CT: control target
= control target key end

     0   :  { %vm43_vm0 = vcmask 523264   ;;  %vm28_vm1 = vcmask 261120   ;;  %v275_v2 = vmov 0.0   ;;  %s374_s0 = inlined_call_operand.vmem [shape: f32[16,64], index: 0, kind: input, shape index: {}]   ;;  %s375_s1 = inlined_call_operand.vmem [shape: f32[64,32], index: 1, kind: input, shape index: {}]   ;;  %s376_s2 = inlined_call_operand.vmem [shape: f32[1,32], index: 2, kind: input, shape index: {}]   ;;  %s377_s3 = inlined_call_operand.vmem [shape: f32[16,32], index: 3, kind: input, shape index: {}]   ;;  %s378_s4 = inlined_call_operand.vmem [shape: f32[1,32], index: 4, kind: input, shape index: {}]   ;;  %s379_s5 = inlined_call_operand.vmem [shape: f32[1,32], index: 5, kind: input, shape index: {}]   ;;  %s380_s6 = inlined_call_operand.hbm [shape: f32[16,32], index: 6, kind: output, shape index: {}]  }
   0x1   :  { %v42_v0 = vld [vmem:[%s375_s1 + $0x38] sm:$0xff]  ;;  %v41_v1 = vld [vmem:[%s375_s1 + $0x30] sm:$0xff]  ;;  %30 = vst.msk [vmem:[#allocation2 + $0x8] sm:$0xff] %vm28_vm1, %v275_v2  ;;  %29 = vst.msk [vmem:[#allocation2] sm:$0xff] %vm28_vm1, %v275_v2 }
   0x2   :  { %226 = vmatprep.subr.mxu0 %v42_v0  ;;  %v40_v3 = vld [vmem:[%s375_s1 + $0x28] sm:$0xff]  ;;  %v33_v4 = vld [vmem:[%s374_s0] sm:$0xff] }
   0x3   :  { %227 = vmatpush3.msra.mxu0 %v42_v0  ;;  %242 = vmatprep.mubr.msk.f32.mxu0 %vm43_vm0, %v33_v4 }
   0x4   :  { %228 = vmatprep.subr.mxu0 %v41_v1 }
   0x5   :  { %11 = vsyncpa [#allocation4], 0  ;;  %229 = vmatpush3.msra.mxu0 %v41_v1  ;;  %v39_v5 = vld [vmem:[%s375_s1 + $0x20] sm:$0xff]  ;;  %v38_v6 = vld [vmem:[%s375_s1 + $0x18] sm:$0xff]  ;;  %s276_s23 = smov [#allocation3]  }
   0x6   :  { %230 = vmatprep.subr.mxu0 %v40_v3  ;;  %v37_v7 = vld [vmem:[%s375_s1 + $0x10] sm:$0xff]  ;;  %v36_v8 = vld [vmem:[%s375_s1 + $0x8] sm:$0xff]  ;;  %v35_v9 = vld [vmem:[%s375_s1] sm:$0xff]  ;;  %s200_s24 = sshll.u32 %s276_s23, 4  ;;  %s201_s24 = int_to_ptr.vmem [resolvable:$true] %s200_s24 }
   0x7   :  { %231 = vmatpush3.msra.mxu0 %v40_v3  ;;  %v34_v10 = vld [vmem:[%s374_s0 + $0x8] sm:$0xff]  ;;  %v213_v17 = vld [vmem:[%s376_s2] ss:$0 sm:$0xff]  ;;  %s253_s25 = scalar_lea.vmem %s201_s24, 256  ;;  %p258_p1 = scmp.lt.s32.totalorder %s201_s24, %s201_s24 }
   0x8   :  { %232 = vmatprep.subr.mxu0 %v39_v5  ;;  %v32_v11 = vld [vmem:[#allocation2 + $0x8] sm:$0xff]  ;;  %v31_v13 = vld [vmem:[#allocation2] sm:$0xff]  ;;  %p254_p0 = scmp.ne.s32.totalorder %s201_s24, %s253_s25  ;;  %p259_p2 = scmp.lt.s32.totalorder %s253_s25, %s253_s25 }
   0x9   :  { %233 = vmatpush3.msra.mxu0 %v39_v5  ;;  %v144_v20 = vld [vmem:[%s377_s3] sm:$0xff]  ;;  %v145_v23 = vld [vmem:[%s377_s3 + $0x8] sm:$0xff] }
   0xa   :  { %234 = vmatprep.subr.mxu0 %v38_v6  ;;  %v214_v45 = vld [vmem:[%s378_s4] ss:$0 sm:$0xff]  ;;  %p260_p3 = por %p259_p2, %p258_p1 }
   0xb   :  { %235 = vmatpush3.msra.mxu0 %v38_v6  ;;  %v215_v47 = vld [vmem:[%s379_s5] ss:$0 sm:$0xff] }
   0xc   :  { %236 = vmatprep.subr.mxu0 %v37_v7  ;;  %p261_p4 = pnand %p260_p3, %p254_p0 }
   0xd   :  { %237 = vmatpush3.msra.mxu0 %v37_v7 }
   0xe   :  { %238 = vmatprep.subr.mxu0 %v36_v8 }
   0xf   :  { %239 = vmatpush3.msra.mxu0 %v36_v8 }
  0x10   :  { %240 = vmatprep.subr.mxu0 %v35_v9 }
  0x11   :  { %241 = vmatpush3.msra.mxu0 %v35_v9 }
  0x12   :  { %243 = vmatmul.mubr.msk.f32.vlgmr.msra.gmra.mxu0 %vm43_vm0, %v34_v10 }
  0xd2   :  { %v244_v12 = vpop.f32.mrf.mxu0 }
  0xd3   :  { %v126_v14 = vadd.f32 %v244_v12, %v32_v11 }
  0xd4   :  { %v116_v15 = vpop.f32.mrf.mxu0 }
  0xd5   :  { %129 = vst.msk [vmem:[#allocation2 + $0x8] sm:$0xff] %vm28_vm1, %v126_v14  ;;  %v125_v16 = vadd.f32 %v116_v15, %v31_v13 }
  0xd7   :  { %128 = vst.msk [vmem:[#allocation2] sm:$0xff] %vm28_vm1, %v125_v16 }
  0xdc   :  { %v134_v18 = vld [vmem:[#allocation2 + $0x8] sm:$0xff] }
  0xdd   :  { %v143_v22 = vadd.f32 %v213_v17, %v134_v18 }
  0xde   :  { %v133_v19 = vld [vmem:[#allocation2] sm:$0xff] }
  0xdf   :  { %v142_v21 = vadd.f32 %v213_v17, %v133_v19  ;;  %v147_v26 = vadd.f32 %v145_v23, %v143_v22 }
  0xe1   :  { %v146_v24 = vadd.f32 %v144_v20, %v142_v21  ;;  %v151_v27 = vsel %vm28_vm1, %v147_v26, 0.0 }
  0xe3   :  { %v148_v25 = vsel %vm28_vm1, %v146_v24, 0.0 }
  0xe4   :  { %149 = vadd.xlane.f32.xlu0 %v148_v25 }
  0xe8   :  { %152 = vadd.xlane.f32.xlu0 %v151_v27 }
 0x16d   :  { %v150_v28 = vpop.xlane.xlu0 %149 }
 0x16e   :  { %v155_v29 = vmul.f32 0.03125, %v150_v28 }
 0x170   :  { %v157_v30 = vsub.f32 %v146_v24, %v155_v29 }
 0x171   :  { %v153_v31 = vpop.xlane.xlu0 %152 }
 0x172   :  { %v156_v32 = vmul.f32 0.03125, %v153_v31  ;;  %v159_v33 = vmul.f32 %v157_v30, %v157_v30 }
 0x174   :  { %v158_v34 = vsub.f32 %v147_v26, %v156_v32  ;;  %v161_v35 = vsel %vm28_vm1, %v159_v33, 0.0 }
 0x175   :  { %162 = vadd.xlane.f32.xlu1 %v161_v35 }
 0x176   :  { %v160_v36 = vmul.f32 %v158_v34, %v158_v34 }
 0x178   :  { %v164_v37 = vsel %vm28_vm1, %v160_v36, 0.0 }
 0x179   :  { %165 = vadd.xlane.f32.xlu1 %v164_v37 }
 0x1fe   :  { %v163_v38 = vpop.xlane.xlu1 %162 }
 0x1ff   :  { %v167_v39 = vmul.f32 0.03125, %v163_v38 }
 0x201   :  { %v169_v40 = vadd.f32 1e-05, %v167_v39 }
 0x202   :  { %v166_v41 = vpop.xlane.xlu1 %165 }
 0x203   :  { %249 = vrsqrt.f32 %v169_v40  ;;  %v168_v42 = vmul.f32 0.03125, %v166_v41 }
 0x205   :  { %v170_v43 = vadd.f32 1e-05, %v168_v42 }
 0x207   :  { %251 = vrsqrt.f32 %v170_v43 }
 0x210   :  { %v250_v44 = vpop.eup %249 }
 0x211   :  { %v173_v46 = vmul.f32 %v250_v44, %v157_v30 }
 0x213   :  { %v182_v48 = vmul.f32 %v214_v45, %v173_v46 }
 0x214   :  { %v252_v49 = vpop.eup %251 }
 0x215   :  { %v174_v50 = vmul.f32 %v252_v49, %v158_v34  ;;  %v191_v51 = vadd.f32 %v215_v47, %v182_v48 }
 0x217   :  { %v183_v52 = vmul.f32 %v214_v45, %v174_v50  ;;  %193 = vst.msk [vmem:[#allocation3] sm:$0xff] %vm28_vm1, %v191_v51 }
 0x219   :  { %v192_v53 = vadd.f32 %v215_v47, %v183_v52 }
 0x21b   :  { %194 = vst.msk [vmem:[#allocation3 + $0x8] sm:$0xff] %vm28_vm1, %v192_v53 }
 0x21c   :  { %264 = shalt.err (!%p261_p4)
}
 0x21d   :  { %s277_s4 = smov 128   ;;  %s278_s5 = smov 8  }
 0x21e   :  { %206 = dma.vmem_to_hbm [thread:$0]  %s201_s24, 256, %s380_s6, [#allocation4], %s277_s4, %s277_s4, %s278_s5  }
 0x21f   :  { %273 = dma.done.wait [#allocation4], 256  }
 0x220   :  { %274 = vsyncadd [#allocation4], 4294967040 }
 0x221   :  { %210 = vsyncpa [#allocation4], 1 }

// kernel: decoder_block_forward.14
= control target key start
LH: loop header
LB: loop body
LE: loop exit
PB: predicated region body
PF: predicated region fallthrough
CT: control target
= control target key end

     0   :  { %s1327_s9 = smov 0   ;;  %s1329_s10 = smov 0   ;;  %s1485_s0 = inlined_call_operand.vmem [shape: f32[2,8,32], index: 0, kind: input, shape index: {}]   ;;  %s1486_s1 = inlined_call_operand.vmem [shape: f32[2,8,64], index: 1, kind: input, shape index: {}]   ;;  %s1487_s2 = inlined_call_operand.vmem [shape: f32[2,8,32], index: 2, kind: output, shape index: {}]  }
   0x1   :  { %s1331_s11 = smov 0  }
   0x2 LB: > { %s31_s12 = sadd.s32 1, %s1292_s10  ;;  %p1136_p0 = scmp.ge.s32.totalorder %s1296_s11, 1  ;;  %s1296_s11 = sphi %s1331_s11, %s12_s11   ;;  %s1292_s10 = sphi %s1329_s10, %s1489_s10   ;;  %s1288_s9 = sphi %s1327_s9, %s1488_s9  }
   0x3   : > { %p33_p1 = scmp.ge.s32.totalorder %s31_s12, 2  ;;  %p151_p2 = scmp.lt.s32.totalorder %s1296_s11, 3 }
   0x5   : > { %s1491_s12 = smov (%p33_p1, %s31_s12), 0  ;;  %p152_p3 = pnand %p1136_p0, %p151_p2 }
   0x6   : > { %p184_p4 = scmp.lt.s32.totalorder (!%p152_p3), %s1288_s9, 1  ;;  %s1302_s20 = smov (!%p152_p3), 96  }
   0x7   : > { %155 = sbr.rel (%p152_p3) target bundleno = 1388 (0x56c), region = 28  ;;  %s1303_s21 = smov (!%p152_p3), 120  }
   0x8   : > { %s1304_s22 = smov (!%p152_p3), 112   ;;  %s1305_s23 = smov (!%p152_p3), 104  }
   0x9   : > { %s1306_s24 = smov (!%p152_p3), 88   ;;  %s1307_s25 = smov (!%p152_p3), 80  }
   0xa   : > { %s1308_s26 = smov (!%p152_p3), 72   ;;  %s1309_s30 = smov (!%p152_p3), 8  }
   0xb   : > { %s1310_s3 = smov (!%p152_p3), 16   ;;  %s1311_s4 = smov (!%p152_p3), 24  }
   0xc   : > { %vm218_vm0 = vcmask 64512   ;;  %v1298_v0 = vmov 0.0   ;;  %vm1299_vm1 = vmmov 0   ;;  %s1493_s9 = smov (!%p184_p4, %s1288_s9), 1  ;;  %vm209_vm2 = vcmask 7168  }
   0xd   : > { %1170 = vmatprep.subr.mxu0 %v1298_v0  ;;  %219 = vst.msk [vmem:[#allocation4] sm:$0xff] %vm218_vm0, %v1298_v0  ;;  %220 = vst.msk [vmem:[#allocation4 + $0x8] sm:$0xff] %vm218_vm0, %v1298_v0  ;;  %1172 = vmatprep.mubr.msk.f32.mxu0 %vm1299_vm1, %v1298_v0  ;;  %s1359_s13 = sshll.u32 %s1493_s9, 3  ;;  %v1300_v3 = vmov -1e+30   ;;  %v1301_v7 = vmov 0  }
   0xe   : > { %221 = vst.msk [vmem:[#allocation4 + $0x10] sm:$0xff] %vm218_vm0, %v1298_v0  ;;  %222 = vst.msk [vmem:[#allocation4 + $0x18] sm:$0xff] %vm218_vm0, %v1298_v0  ;;  %1175 = vmatprep.subr.mxu1 %v1298_v0  ;;  %1177 = vmatprep.mubr.msk.f32.mxu1 %vm1299_vm1, %v1298_v0  ;;  %s197_s16 = scalar_lea.vmem %s1486_s1, %s1359_s13  ;;  %s190_s19 = scalar_lea.vmem %s1485_s0, %s1359_s13  ;;  %vm1008_vm3 = vcmask 130112   ;;  %vm1023_vm4 = vcmask 195712   ;;  %vm1038_vm5 = vcmask 261312  }
   0xf   : > { %v1369_v1 = vld [vmem:[%s197_s16] sm:$0xff]  ;;  %210 = vst.msk [vmem:[#allocation2] sm:$0xff] %vm209_vm2, %v1300_v3  ;;  %211 = vst.msk [vmem:[#allocation2 + $0x8] sm:$0xff] %vm209_vm2, %v1300_v3  ;;  %1248 = vset.pattern.permute.xlu0 %v1301_v7  ;;  %1249 = vset.pattern.permute.xlu1 %v1301_v7  ;;  %s1466_s29 = scalar_lea.vmem %s1487_s2, %s1359_s13 }
  0x10   : > { %1171 = vmatpush3.xpose.msk.msra.mxu0 %vm218_vm0, %v1369_v1  ;;  %v223_v2 = vld [vmem:[%s190_s19] sm:$0xff]  ;;  %212 = vst.msk [vmem:[#allocation2 + $0x10] sm:$0xff] %vm209_vm2, %v1300_v3  ;;  %213 = vst.msk [vmem:[#allocation2 + $0x18] sm:$0xff] %vm209_vm2, %v1300_v3  ;;  %333 = vrot.lane.b32.xlu1 %v1369_v1, %s1302_s20 }
  0x11   : > { %1185 = vmatprep.subr.mxu0 %v1298_v0  ;;  %214 = vst.msk [vmem:[#allocation3] sm:$0xff] %vm209_vm2, %v1298_v0  ;;  %215 = vst.msk [vmem:[#allocation3 + $0x8] sm:$0xff] %vm209_vm2, %v1298_v0 }
  0x12   : > { %216 = vst.msk [vmem:[#allocation3 + $0x10] sm:$0xff] %vm209_vm2, %v1298_v0  ;;  %217 = vst.msk [vmem:[#allocation3 + $0x18] sm:$0xff] %vm209_vm2, %v1298_v0 }
  0x13   : > { %1173 = vmatmul.mubr.msk.f32.vlgmr.msra.gmra.mxu0 %vm218_vm0, %v223_v2 }
  0x14   : > { %1187 = vmatprep.mubr.msk.f32.mxu0 %vm1299_vm1, %v1298_v0  ;;  %414 = vrot.lane.b32.xlu1 %v1369_v1, %s1303_s21 }
  0x16   : > { %v1394_v8 = vld [vmem:[#allocation2] sm:$0xff]  ;;  %v1425_v34 = vld [vmem:[#allocation2 + $0x8] sm:$0xff] }
  0x17   : > { %v681_v37 = vld [vmem:[#allocation2 + $0x10] sm:$0xff]  ;;  %v871_v41 = vld [vmem:[#allocation2 + $0x18] sm:$0xff] }
  0x18   : > { %412 = vrot.lane.b32.xlu1 %v223_v2, %s1303_s21 }
  0x1c   : > { %604 = vrot.lane.b32.xlu1 %v1369_v1, %s1304_s22 }
  0x20   : > { %602 = vrot.lane.b32.xlu1 %v223_v2, %s1304_s22 }
  0x24   : > { %794 = vrot.lane.b32.xlu1 %v1369_v1, %s1305_s23 }
  0x28   : > { %792 = vrot.lane.b32.xlu1 %v223_v2, %s1305_s23 }
  0x82   : > { %v334_v12 = vpop.permute.xlu1 %333 }
  0x83   : > { %1176 = vmatpush3.msra.mxu1 %v334_v12 }
  0x84   : > { %1180 = vmatprep.subr.mxu1 %v1298_v0 }
  0x86   : > { %v415_v13 = vpop.permute.xlu1 %414 }
  0x8a   : > { %v413_v17 = vpop.permute.xlu1 %412 }
  0x8e   : > { %v605_v18 = vpop.permute.xlu1 %604 }
  0x92   : > { %v603_v19 = vpop.permute.xlu1 %602 }
  0x96   : > { %v795_v21 = vpop.permute.xlu1 %794 }
  0x9a   : > { %v793_v22 = vpop.permute.xlu1 %792 }
  0xd3   : > { %v298_v4 = vpop.f32.mrf.mxu0 }
  0xd4   : > { %v303_v5 = vsel %vm218_vm0, %v298_v4, -inf }
  0xd5   : > { %304 = vmax.xlane.f32.xlu0 %v303_v5  ;;  %v1174_v6 = vpop.f32.mrf.mxu0 }
 0x15e   : > { %v305_v9 = vpop.xlane.xlu0 %304 }
 0x15f   : > { %v1397_v10 = vmax.f32 %v1394_v8, %v305_v9  ;;  %v318_v9 = vld [vmem:[#allocation3] sm:$0xff] }
 0x161   : > { %v307_v11 = vsub.f32 %v1394_v8, %v1397_v10  ;;  %411 = vst.msk [vmem:[#allocation2] sm:$0xff] %vm209_vm2, %v1397_v10  ;;  %312 = vperm.xlu0 %1248, %v1397_v10  }
 0x163   : > { %v308_v59 = vmul.f32 1.442695, %v307_v11 }
 0x1dc   : > { %v313_v14 = vpop.permute.xlu0 %312 }
 0x1dd   : > { %v315_v15 = vsub.f32 %v298_v4, %v313_v14 }
 0x1df   : > { %v316_v16 = vmul.f32 1.442695, %v315_v15  ;;  %v508_v15 = vld [vmem:[#allocation3 + $0x8] sm:$0xff] }
 0x1e1   : > { %1250 = vpow2.f32 %v316_v16 }
 0x1ee   : > { %v1251_v20 = vpop.eup %1250 }
 0x1ef   : > { %1178 = vmatmul.mubr.msk.f32.vlgmr.msra.gmra.mxu1 %vm218_vm0, %v1251_v20  ;;  %v320_v46 = vsel %vm218_vm0, %v1251_v20, 0.0  ;;  %v326_v20 = vld [vmem:[#allocation4] sm:$0xff] }
 0x1f0   : > { %1181 = vmatpush3.xpose.msk.msra.mxu1 %vm218_vm0, %v415_v13  ;;  %1182 = vmatprep.mubr.msk.f32.mxu1 %vm1299_vm1, %v1298_v0 }
 0x1f1   : > { %1190 = vmatprep.subr.mxu1 %v1298_v0 }
 0x1f3   : > { %1183 = vmatmul.mubr.msk.f32.vlgmr.msra.gmra.mxu1 %vm218_vm0, %v413_v17 }
 0x1f4   : > { %1191 = vmatpush3.xpose.msk.msra.mxu1 %vm218_vm0, %v605_v18  ;;  %1192 = vmatprep.mubr.msk.f32.mxu1 %vm1299_vm1, %v1298_v0  ;;  %v698_v18 = vld [vmem:[#allocation3 + $0x10] sm:$0xff] }
 0x1f5   : > { %1200 = vmatprep.subr.mxu1 %v1298_v0 }
 0x1f7   : > { %1193 = vmatmul.mubr.msk.f32.vlgmr.msra.gmra.mxu1 %vm218_vm0, %v603_v19 }
 0x1f8   : > { %1201 = vmatpush3.xpose.msk.msra.mxu1 %vm218_vm0, %v795_v21  ;;  %1202 = vmatprep.mubr.msk.f32.mxu1 %vm1299_vm1, %v1298_v0 }
 0x1fb   : > { %1203 = vmatmul.mubr.msk.f32.vlgmr.msra.gmra.mxu1 %vm218_vm0, %v793_v22 }
 0x2af   : > { %v1420_v23 = vpop.f32.mrf.mxu1 }
 0x2b1   : > { %v1179_v24 = vpop.f32.mrf.mxu1 }
 0x2b3   : > { %v486_v25 = vpop.f32.mrf.mxu1 }
 0x2b4   : > { %v492_v26 = vsel %vm218_vm0, %v486_v25, -inf }
 0x2b5   : > { %493 = vmax.xlane.f32.xlu1 %v492_v26  ;;  %v1184_v27 = vpop.f32.mrf.mxu1 }
 0x2b7   : > { %v676_v28 = vpop.f32.mrf.mxu1 }
 0x2b8   : > { %v682_v29 = vsel %vm218_vm0, %v676_v28, -inf }
 0x2b9   : > { %683 = vmax.xlane.f32.xlu0 %v682_v29  ;;  %v1194_v30 = vpop.f32.mrf.mxu1 }
 0x2bb   : > { %v866_v31 = vpop.f32.mrf.mxu1 }
 0x2bc   : > { %v872_v32 = vsel %vm218_vm0, %v866_v31, -inf }
 0x2bd   : > { %873 = vmax.xlane.f32.xlu1 %v872_v32  ;;  %v1204_v33 = vpop.f32.mrf.mxu1 }
 0x33e   : > { %v494_v35 = vpop.xlane.xlu1 %493 }
 0x33f   : > { %v1428_v36 = vmax.f32 %v1425_v34, %v494_v35 }
 0x341   : > { %v496_v38 = vsub.f32 %v1425_v34, %v1428_v36  ;;  %601 = vst.msk [vmem:[#allocation2 + $0x8] sm:$0xff] %vm209_vm2, %v1428_v36  ;;  %501 = vperm.xlu1 %1249, %v1428_v36  }
 0x342   : > { %v684_v39 = vpop.xlane.xlu0 %683 }
 0x343   : > { %v685_v40 = vmax.f32 %v681_v37, %v684_v39  ;;  %v497_v5 = vmul.f32 1.442695, %v496_v38 }
 0x345   : > { %v686_v42 = vsub.f32 %v681_v37, %v685_v40  ;;  %791 = vst.msk [vmem:[#allocation2 + $0x10] sm:$0xff] %vm209_vm2, %v685_v40  ;;  %691 = vperm.xlu0 %1248, %v685_v40  }
 0x346   : > { %v874_v43 = vpop.xlane.xlu1 %873 }
 0x347   : > { %v875_v44 = vmax.f32 %v871_v41, %v874_v43  ;;  %v687_v63 = vmul.f32 1.442695, %v686_v42 }
 0x349   : > { %v876_v45 = vsub.f32 %v871_v41, %v875_v44  ;;  %981 = vst.msk [vmem:[#allocation2 + $0x18] sm:$0xff] %vm209_vm2, %v875_v44  ;;  %881 = vperm.xlu1 %1249, %v875_v44   ;;  %v516_v41 = vld [vmem:[#allocation4 + $0x8] sm:$0xff]  ;;  %v706_v44 = vld [vmem:[#allocation4 + $0x10] sm:$0xff] }
 0x34b   : > { %v877_v3 = vmul.f32 1.442695, %v876_v45 }
 0x34d   : > { %523 = vrot.lane.b32.xlu1 %v1369_v1, %s1306_s24 }
 0x351   : > { %713 = vrot.lane.b32.xlu1 %v1369_v1, %s1307_s25 }
 0x355   : > { %903 = vrot.lane.b32.xlu1 %v1369_v1, %s1308_s26 }
 0x364   : > { %321 = vadd.xlane.f32.xlu0 %v320_v46 }
 0x3bc   : > { %v502_v47 = vpop.permute.xlu1 %501 }
 0x3bd   : > { %v504_v48 = vsub.f32 %v486_v25, %v502_v47  ;;  %v888_v25 = vld [vmem:[#allocation3 + $0x18] sm:$0xff] }
 0x3bf   : > { %v505_v49 = vmul.f32 1.442695, %v504_v48 }
 0x3c0   : > { %v692_v50 = vpop.permute.xlu0 %691 }
 0x3c1   : > { %1252 = vpow2.f32 %v505_v49  ;;  %v694_v51 = vsub.f32 %v676_v28, %v692_v50  ;;  %v896_v49 = vld [vmem:[#allocation4 + $0x18] sm:$0xff] }
 0x3c3   : > { %v695_v52 = vmul.f32 1.442695, %v694_v51 }
 0x3c4   : > { %v882_v53 = vpop.permute.xlu1 %881 }
 0x3c5   : > { %1254 = vpow2.f32 %v695_v52  ;;  %v884_v54 = vsub.f32 %v866_v31, %v882_v53 }
 0x3c7   : > { %v885_v55 = vmul.f32 1.442695, %v884_v54 }
 0x3c8   : > { %v524_v56 = vpop.permute.xlu1 %523 }
 0x3c9   : > { %1256 = vpow2.f32 %v885_v55  ;;  %1186 = vmatpush3.msra.mxu0 %v524_v56 }
 0x3ca   : > { %1195 = vmatprep.subr.mxu0 %v1298_v0  ;;  %1258 = vpow2.f32 %v308_v59 }
 0x3cb   : > { %1260 = vpow2.f32 %v687_v63 }
 0x3cc   : > { %v714_v57 = vpop.permute.xlu1 %713  ;;  %1262 = vpow2.f32 %v877_v3 }
 0x3cd   : > { %1264 = vpow2.f32 %v497_v5 }
 0x3ce   : > { %v1253_v58 = vpop.eup %1252 }
 0x3cf   : > { %1188 = vmatmul.mubr.msk.f32.vlgmr.msra.gmra.mxu0 %vm218_vm0, %v1253_v58  ;;  %v510_v60 = vsel %vm218_vm0, %v1253_v58, 0.0 }
 0x3d0   : > { %511 = vadd.xlane.f32.xlu1 %v510_v60  ;;  %1196 = vmatpush3.msra.mxu0 %v714_v57  ;;  %v904_v61 = vpop.permute.xlu1 %903 }
 0x3d1   : > { %1197 = vmatprep.mubr.msk.f32.mxu0 %vm1299_vm1, %v1298_v0  ;;  %1205 = vmatprep.subr.mxu0 %v1298_v0 }
 0x3d2   : > { %v1255_v62 = vpop.eup %1254 }
 0x3d3   : > { %1198 = vmatmul.mubr.msk.f32.vlgmr.msra.gmra.mxu0 %vm218_vm0, %v1255_v62  ;;  %v700_v1 = vsel %vm218_vm0, %v1255_v62, 0.0 }
 0x3d4   : > { %701 = vadd.xlane.f32.xlu0 %v700_v1  ;;  %1206 = vmatpush3.msra.mxu0 %v904_v61 }
 0x3d5   : > { %1207 = vmatprep.mubr.msk.f32.mxu0 %vm1299_vm1, %v1298_v0 }
 0x3d6   : > { %v1257_v2 = vpop.eup %1256 }
 0x3d7   : > { %1208 = vmatmul.mubr.msk.f32.vlgmr.msra.gmra.mxu0 %vm218_vm0, %v1257_v2  ;;  %v890_v4 = vsel %vm218_vm0, %v1257_v2, 0.0  ;;  %v1259_v6 = vpop.eup %1258 }
 0x3d8   : > { %891 = vadd.xlane.f32.xlu0 %v890_v4  ;;  %v1261_v7 = vpop.eup %1260  ;;  %v319_v10 = vmul.f32 %v1259_v6, %v318_v9 }
 0x3d9   : > { %v1263_v8 = vpop.eup %1262  ;;  %v699_v21 = vmul.f32 %v1261_v7, %v698_v18 }
 0x3da   : > { %v1265_v0 = vpop.eup %1264  ;;  %v889_v29 = vmul.f32 %v1263_v8, %v888_v25 }
 0x3db   : > { %v509_v16 = vmul.f32 %v1265_v0, %v508_v15 }
 0x3e1   : > { %329 = vperm.xlu1 %1249, %v1259_v6  }
 0x3e5   : > { %709 = vperm.xlu1 %1249, %v1261_v7  }
 0x3e9   : > { %899 = vperm.xlu1 %1249, %v1263_v8  }
 0x3ed   : > { %v322_v11 = vpop.xlane.xlu0 %321 }
 0x3ee   : > { %v323_v12 = vadd.f32 %v322_v11, %v319_v10  ;;  %519 = vperm.xlu0 %1248, %v1265_v0  }
 0x3f0   : > { %325 = vst.msk [vmem:[#allocation3] sm:$0xff] %vm209_vm2, %v323_v12 }
 0x3f7   : > { %v985_v13 = vld [vmem:[#allocation3] sm:$0xff] }
 0x3f8   : > { %1266 = vrcp.f32 %v985_v13 }
 0x405   : > { %v1267_v14 = vpop.eup %1266 }
 0x406   : > { %990 = vperm.xlu0 %1248, %v1267_v14  }
 0x459   : > { %v512_v17 = vpop.xlane.xlu1 %511 }
 0x45a   : > { %v513_v19 = vadd.f32 %v512_v17, %v509_v16 }
 0x45c   : > { %514 = vst.msk [vmem:[#allocation3 + $0x8] sm:$0xff] %vm209_vm2, %v513_v19 }
 0x45d   : > { %v702_v22 = vpop.xlane.xlu0 %701  ;;  %v330_v24 = vpop.permute.xlu1 %329 }
 0x45e   : > { %v703_v26 = vadd.f32 %v702_v22, %v699_v21  ;;  %v332_v27 = vmul.f32 %v330_v24, %v326_v20 }
 0x460   : > { %704 = vst.msk [vmem:[#allocation3 + $0x10] sm:$0xff] %vm209_vm2, %v703_v26  ;;  %v409_v28 = vadd.f32 %v1420_v23, %v332_v27 }
 0x461   : > { %v892_v30 = vpop.xlane.xlu0 %891  ;;  %v710_v42 = vpop.permute.xlu1 %709 }
 0x462   : > { %410 = vst.msk [vmem:[#allocation4] sm:$0xff] %vm218_vm0, %v409_v28  ;;  %v893_v31 = vadd.f32 %v892_v30, %v889_v29  ;;  %v712_v48 = vmul.f32 %v710_v42, %v706_v44 }
 0x463   : > { %v995_v32 = vld [vmem:[#allocation3 + $0x8] sm:$0xff] }
 0x464   : > { %894 = vst.msk [vmem:[#allocation3 + $0x18] sm:$0xff] %vm209_vm2, %v893_v31  ;;  %1268 = vrcp.f32 %v995_v32 }
 0x465   : > { %v900_v50 = vpop.permute.xlu1 %899 }
 0x466   : > { %v902_v54 = vmul.f32 %v900_v50, %v896_v49 }
 0x467   : > { %v1010_v33 = vld [vmem:[#allocation3 + $0x10] sm:$0xff] }
 0x468   : > { %1270 = vrcp.f32 %v1010_v33 }
 0x469   : > { %v520_v23 = vpop.permute.xlu0 %519  ;;  %v987_v38 = vld [vmem:[#allocation4] sm:$0xff] }
 0x46a   : > { %v522_v43 = vmul.f32 %v520_v23, %v516_v41 }
 0x46b   : > { %v1025_v34 = vld [vmem:[#allocation3 + $0x18] sm:$0xff] }
 0x46c   : > { %1272 = vrcp.f32 %v1025_v34 }
 0x471   : > { %v1269_v35 = vpop.eup %1268 }
 0x472   : > { %1000 = vperm.xlu1 %1249, %v1269_v35  }
 0x475   : > { %v1271_v36 = vpop.eup %1270 }
 0x476   : > { %1015 = vperm.xlu1 %1249, %v1271_v36  }
 0x479   : > { %v1273_v37 = vpop.eup %1272 }
 0x47a   : > { %1030 = vperm.xlu1 %1249, %v1273_v37  }
 0x481   : > { %v991_v39 = vpop.permute.xlu0 %990 }
 0x482   : > { %v993_v40 = vmul.f32 %v991_v39, %v987_v38 }
 0x484   : > { %994 = vst.msk [vmem:[%s1466_s29] sm:$0xff] %vm218_vm0, %v993_v40 }
 0x48f   : > { %v595_v45 = vpop.f32.mrf.mxu0 }
 0x490   : > { %v599_v46 = vadd.f32 %v595_v45, %v522_v43 }
 0x491   : > { %v1189_v47 = vpop.f32.mrf.mxu0 }
 0x492   : > { %600 = vst.msk [vmem:[#allocation4 + $0x8] sm:$0xff] %vm218_vm0, %v599_v46 }
 0x493   : > { %v785_v51 = vpop.f32.mrf.mxu0 }
 0x494   : > { %v789_v52 = vadd.f32 %v785_v51, %v712_v48 }
 0x495   : > { %v1199_v53 = vpop.f32.mrf.mxu0 }
 0x496   : > { %790 = vst.msk [vmem:[#allocation4 + $0x10] sm:$0xff] %vm218_vm0, %v789_v52 }
 0x497   : > { %v975_v55 = vpop.f32.mrf.mxu0 }
 0x498   : > { %v979_v56 = vadd.f32 %v975_v55, %v902_v54 }
 0x499   : > { %v1209_v57 = vpop.f32.mrf.mxu0  ;;  %v997_v59 = vld [vmem:[#allocation4 + $0x8] sm:$0xff] }
 0x49a   : > { %980 = vst.msk [vmem:[#allocation4 + $0x18] sm:$0xff] %vm218_vm0, %v979_v56 }
 0x49d   : > { %v1012_v62 = vld [vmem:[#allocation4 + $0x10] sm:$0xff] }
 0x4a1   : > { %v1027_v2 = vld [vmem:[#allocation4 + $0x18] sm:$0xff] }
 0x4ed   : > { %v1001_v58 = vpop.permute.xlu1 %1000 }
 0x4ee   : > { %v1003_v60 = vmul.f32 %v1001_v58, %v997_v59 }
 0x4f0   : > { %1005 = vrot.lane.b32.xlu0 %v1003_v60, %s1309_s30 }
 0x4f1   : > { %v1016_v61 = vpop.permute.xlu1 %1015 }
 0x4f2   : > { %v1018_v63 = vmul.f32 %v1016_v61, %v1012_v62 }
 0x4f4   : > { %1020 = vrot.lane.b32.xlu0 %v1018_v63, %s1310_s3 }
 0x4f5   : > { %v1031_v1 = vpop.permute.xlu1 %1030 }
 0x4f6   : > { %v1033_v3 = vmul.f32 %v1031_v1, %v1027_v2 }
 0x4f8   : > { %1035 = vrot.lane.b32.xlu0 %v1033_v3, %s1311_s4 }
 0x562   : > { %v1006_v4 = vpop.permute.xlu0 %1005 }
 0x563   : > { %1009 = vst.msk [vmem:[%s1466_s29] sm:$0xff] %vm1008_vm3, %v1006_v4 }
 0x566   : > { %v1021_v5 = vpop.permute.xlu0 %1020 }
 0x567   : > { %1024 = vst.msk [vmem:[%s1466_s29] sm:$0xff] %vm1023_vm4, %v1021_v5 }
 0x56a   : > { %v1036_v6 = vpop.permute.xlu0 %1035 }
 0x56b   : > { %1039 = vst.msk [vmem:[%s1466_s29] sm:$0xff] %vm1038_vm5, %v1036_v6 }
 0x56c PF: > { %s12_s11 = sadd.s32 1, %s1296_s11   ;;  %s1488_s9 = smov %s1292_s10 }
 0x56d   : > { %p9_p5 = scmp.ge.s32.totalorder %s12_s11, 4   ;;  %s1489_s10 = smov %s1491_s12 }
 0x56f   :  { %11 = sbr.rel (!%p9_p5) target bundleno = 2 (0x2), region = 78 }

</bundles_post_ra>
